<compile_context>
chip_gen: v6e
topology: v6e:2x2x1
jax: 0.10.0
libtpu: 0.0.40
codegen_flags: <defaults>
</compile_context>

<pallas_src>
import functools

import jax
import jax.numpy as jnp
from jax import lax
from jax.experimental import pallas as pl
from jax.experimental.pallas import tpu as pltpu

EPS = 1e-5
K = 4        # ConvTranspose2d kernel size used throughout the Generator
LANES = 128  # pad every output-channel dimension to a full vreg lane width


# ----------------------------------------------------------------------------
# Pallas kernels (hot path: batched phase matmul + fused BN/ReLU or Tanh)
# ----------------------------------------------------------------------------
def _phase_matmul_bn_relu_kernel(a_ref, b_ref, gamma_ref, beta_ref, o_ref, *, count):
    # Batched (per output phase) matmul on the MXU; bf16 operands, f32 accumulate.
    c = jnp.einsum("pmk,pkc->pmc", a_ref[...], b_ref[...],
                   preferred_element_type=jnp.float32)
    # One-pass training-mode BatchNorm2d: stats over all (phase, row) pairs
    # == all (N, H, W) positions; biased variance. gamma folded into the scale.
    s1 = jnp.sum(c, axis=(0, 1), keepdims=True)
    s2 = jnp.sum(c * c, axis=(0, 1), keepdims=True)
    inv = 1.0 / count
    mean = s1 * inv
    var = s2 * inv - mean * mean
    scale = gamma_ref[...] * lax.rsqrt(var + EPS)
    shift = beta_ref[...] - mean * scale
    o_ref[...] = jnp.maximum(c * scale + shift, 0.0)  # ReLU


def _phase_matmul_tanh_kernel(a_ref, b_ref, o_ref):
    c = jnp.einsum("pmk,pkc->pmc", a_ref[...], b_ref[...],
                   preferred_element_type=jnp.float32)
    o_ref[...] = jnp.tanh(c)


def _pallas_phase_matmul_bn_relu(a, b, gamma, beta):
    p, m, kdim = a.shape
    _, _, cpad = b.shape
    kernel = functools.partial(_phase_matmul_bn_relu_kernel, count=float(p * m))
    return pl.pallas_call(
        kernel,
        out_shape=jax.ShapeDtypeStruct((p, m, cpad), jnp.float32),
        in_specs=[
            pl.BlockSpec((p, m, kdim), lambda: (0, 0, 0)),
            pl.BlockSpec((p, kdim, cpad), lambda: (0, 0, 0)),
            pl.BlockSpec((1, cpad), lambda: (0, 0)),
            pl.BlockSpec((1, cpad), lambda: (0, 0)),
        ],
        out_specs=pl.BlockSpec((p, m, cpad), lambda: (0, 0, 0)),
    )(a, b, gamma, beta)


def _pallas_phase_matmul_tanh(a, b, tile_m=256):
    p, m, kdim = a.shape
    _, _, cpad = b.shape
    tm = tile_m if (m > tile_m and m % tile_m == 0) else m
    return pl.pallas_call(
        _phase_matmul_tanh_kernel,
        out_shape=jax.ShapeDtypeStruct((p, m, cpad), jnp.float32),
        grid=(m // tm,),
        in_specs=[
            pl.BlockSpec((p, tm, kdim), lambda i: (0, i, 0)),
            pl.BlockSpec((p, kdim, cpad), lambda i: (0, 0, 0)),
        ],
        out_specs=pl.BlockSpec((p, tm, cpad), lambda i: (0, i, 0)),
        compiler_params=pltpu.CompilerParams(dimension_semantics=("parallel",)),
    )(a, b)


# ----------------------------------------------------------------------------
# One-time parameter preparation (done outside the jitted forward)
# ----------------------------------------------------------------------------
def _pad_lanes(x, axis=-1):
    c = x.shape[axis]
    cpad = ((c + LANES - 1) // LANES) * LANES
    if cpad == c:
        return x
    pads = [(0, 0)] * x.ndim
    pads[axis] = (0, cpad - c)
    return jnp.pad(x, pads)


def _weight_phases_stride1_full(w):
    """Layer 1 (stride=1, pad=0, 1x1 input): out[n,kh,kw,:] = x[n,:] @ W[:,:,kh,kw].
    w: (Cin, Cout, K, K) -> B: (K*K, Cin, Cpad), phase p = kh*K + kw."""
    b = jnp.transpose(w, (2, 3, 0, 1)).reshape(K * K, w.shape[0], w.shape[1])
    return _pad_lanes(b)


def _weight_phases_stride2(w):
    """Stride-2, pad-1 ConvTranspose2d as 4 sub-pixel phases with 2x2 taps each.
    Phase p = 2*a + b (output (2i+a, 2j+b)); row order (t_h, t_w, ci) with kernel
    taps kh = 3 - a - 2*t_h, kw = 3 - b - 2*t_w.
    w: (Cin, Cout, K, K) -> B: (4, 4*Cin, Cpad)."""
    cin, cout = w.shape[0], w.shape[1]
    phases = []
    for a in (0, 1):
        for bph in (0, 1):
            kh_idx = jnp.array([3 - a, 1 - a])        # t_h = 0, 1
            kw_idx = jnp.array([3 - bph, 1 - bph])    # t_w = 0, 1
            sub = w[:, :, kh_idx, :][:, :, :, kw_idx]  # (Cin, Cout, 2, 2)
            sub = jnp.transpose(sub, (2, 3, 0, 1)).reshape(4 * cin, cout)
            phases.append(sub)
    return _pad_lanes(jnp.stack(phases, axis=0))


def init_generator_params(key, latent_dim=32, num_channels=1, feature_map_gen=8):
    """PyTorch-layout ConvTranspose2d weights (Cin, Cout, K, K); BN gamma=1, beta=0."""
    fg = feature_map_gen
    dims = [(latent_dim, fg * 8), (fg * 8, fg * 4), (fg * 4, fg * 2), (fg * 2, num_channels)]
    params = {"convs": [], "bn": []}
    for i, (cin, cout) in enumerate(dims):
        key, sub = jax.random.split(key)
        w = 0.05 * jax.random.normal(sub, (cin, cout, K, K), dtype=jnp.float32)
        params["convs"].append(w)
        if i < 3:  # last layer has no BatchNorm
            params["bn"].append(
                (jnp.ones((cout,), jnp.float32), jnp.zeros((cout,), jnp.float32)))
    return params


def prepare_params(params):
    """Precompute matmul-ready bf16 weight matrices and lane-padded BN params."""
    prepared = {"b": [], "bn": []}
    convs = params["convs"]
    prepared["b"].append(_weight_phases_stride1_full(convs[0]).astype(jnp.bfloat16))
    for i in (1, 2, 3):
        prepared["b"].append(_weight_phases_stride2(convs[i]).astype(jnp.bfloat16))
    for gamma, beta in params["bn"]:
        prepared["bn"].append((_pad_lanes(gamma.reshape(1, -1)),
                               _pad_lanes(beta.reshape(1, -1))))
    return prepared


# ----------------------------------------------------------------------------
# JAX glue for the sub-pixel decomposition
# ----------------------------------------------------------------------------
def _phase_patches_stride2(x):
    """x: (N, H, W, Cin) NHWC -> A: (4, N*H*W, 4*Cin) for the 4 output phases."""
    n, h, w, c = x.shape
    xp = jnp.pad(x, ((0, 0), (1, 1), (1, 1), (0, 0)))
    phases = []
    for a in (0, 1):
        for b in (0, 1):
            taps = [xp[:, a + th:a + th + h, b + tw:b + tw + w, :]
                    for th in (0, 1) for tw in (0, 1)]
            phases.append(jnp.concatenate(taps, axis=-1).reshape(n * h * w, 4 * c))
    return jnp.stack(phases, axis=0)


def _interleave_phases(y, n, h, w, cout):
    """y: (4, N*H*W, Cpad) -> (N, 2H, 2W, Cout); phase p = 2*a + b -> (2i+a, 2j+b)."""
    y = y[:, :, :cout].reshape(2, 2, n, h, w, cout)
    y = jnp.transpose(y, (2, 3, 0, 4, 1, 5))
    return y.reshape(n, 2 * h, 2 * w, cout)


# ----------------------------------------------------------------------------
# Generator forward
# ----------------------------------------------------------------------------
@functools.partial(jax.jit, static_argnames=("couts",))
def generator_forward(prepared, x_nchw, *, couts):
    """x_nchw: (N, latent_dim, 1, 1) -> (N, num_channels, 32, 32), NCHW like PyTorch."""
    n = x_nchw.shape[0]

    # ---- layer 1: ConvTranspose2d(latent, fg*8, 4, 1, 0) + BN + ReLU ------------
    z = x_nchw.reshape(n, -1).astype(jnp.bfloat16)            # (N, Cin)
    a1 = jnp.broadcast_to(z, (K * K, n, z.shape[1]))           # one phase per pixel
    g1, b1 = prepared["bn"][0]
    y = _pallas_phase_matmul_bn_relu(a1, prepared["b"][0], g1, b1)
    x = jnp.transpose(y[:, :, :couts[0]].reshape(K, K, n, couts[0]), (2, 0, 1, 3))

    # ---- layers 2-3: stride-2 ConvTranspose2d + BN + ReLU (sub-pixel phases) ----
    for i in (1, 2):
        nh, nw = x.shape[1], x.shape[2]
        a = _phase_patches_stride2(x).astype(jnp.bfloat16)
        g, b = prepared["bn"][i]
        y = _pallas_phase_matmul_bn_relu(a, prepared["b"][i], g, b)
        x = _interleave_phases(y, n, nh, nw, couts[i])

    # ---- layer 4: stride-2 ConvTranspose2d + Tanh --------------------------------
    nh, nw = x.shape[1], x.shape[2]
    a = _phase_patches_stride2(x).astype(jnp.bfloat16)
    y = _pallas_phase_matmul_tanh(a, prepared["b"][3])
    x = _interleave_phases(y, n, nh, nw, couts[3])

    return jnp.transpose(x, (0, 3, 1, 2))  # NHWC -> NCHW


# ----------------------------------------------------------------------------
# Pure-JAX reference (PyTorch semantics) for a sanity check
# ----------------------------------------------------------------------------
def _reference_forward(params, x_nchw):
    strides = (1, 2, 2, 2)
    pads = (0, 1, 1, 1)
    h = jnp.transpose(x_nchw.astype(jnp.float32), (0, 2, 3, 1))  # NHWC
    for i, w in enumerate(params["convs"]):
        w_hwio = jnp.transpose(w[:, :, ::-1, ::-1], (2, 3, 0, 1))  # (K, K, Cin, Cout)
        p = K - 1 - pads[i]
        h = lax.conv_general_dilated(
            h, w_hwio, window_strides=(1, 1), padding=[(p, p), (p, p)],
            lhs_dilation=(strides[i], strides[i]),
            dimension_numbers=("NHWC", "HWIO", "NHWC"))
        if i < 3:
            mean = jnp.mean(h, axis=(0, 1, 2), keepdims=True)
            var = jnp.mean(jnp.square(h - mean), axis=(0, 1, 2), keepdims=True)
            gamma, beta = params["bn"][i]
            h = jnp.maximum((h - mean) * lax.rsqrt(var + EPS) * gamma + beta, 0.0)
        else:
            h = jnp.tanh(h)
    return jnp.transpose(h, (0, 3, 1, 2))


# ----------------------------------------------------------------------------
if __name__ == "__main__":
    batch, latent_dim, num_channels, feature_map_gen = 2, 32, 1, 8

    key = jax.random.PRNGKey(0)
    key, pkey, xkey = jax.random.split(key, 3)
    params = init_generator_params(pkey, latent_dim, num_channels, feature_map_gen)
    prepared = prepare_params(params)
    couts = tuple(int(w.shape[1]) for w in params["convs"])

    # PyTorch-style latent input: (N, latent_dim, 1, 1)
    x = jax.random.normal(xkey, (batch, latent_dim, 1, 1), dtype=jnp.float32)

    out = generator_forward(prepared, x, couts=couts)
    out = jax.block_until_ready(out)

    assert out.shape == (batch, num_channels, 32, 32), out.shape
    assert bool(jnp.all(jnp.isfinite(out)))
    assert bool(jnp.all(jnp.abs(out) <= 1.0 + 1e-6))  # tanh range

    ref = _reference_forward(params, x)
    max_err = float(jnp.max(jnp.abs(out - ref)))
    assert max_err < 0.15, f"max abs error vs reference: {max_err}"
    print("KERNEL_OK")
</pallas_src>

<mosaic_0001>
module attributes {stable_mosaic.version = 11 : i64} {
  func.func @_phase_matmul_bn_relu_kernel(%arg0: memref<16x2x32xbf16, #tpu.memory_space<vmem>>, %arg1: memref<16x32x128xbf16, #tpu.memory_space<vmem>>, %arg2: memref<1x128xf32, #tpu.memory_space<vmem>>, %arg3: memref<1x128xf32, #tpu.memory_space<vmem>>, %arg4: memref<16x2x128xf32, #tpu.memory_space<vmem>>) attributes {dimension_semantics = [], scalar_prefetch = 0 : i64, scratch_operands = 0 : i64, tpu.core_type = #tpu.core_type<tc>} {
    %c0 = arith.constant 0 : index
    %c0_0 = arith.constant 0 : index
    %c0_1 = arith.constant 0 : index
    %0 = vector.load %arg0[%c0, %c0_0, %c0_1] : memref<16x2x32xbf16, #tpu.memory_space<vmem>>, vector<16x2x32xbf16>
    %c0_2 = arith.constant 0 : index
    %c0_3 = arith.constant 0 : index
    %c0_4 = arith.constant 0 : index
    %1 = vector.load %arg1[%c0_2, %c0_3, %c0_4] : memref<16x32x128xbf16, #tpu.memory_space<vmem>>, vector<16x32x128xbf16>
    "tpu.trace_start"() <{level = 10 : i32, message = "pmk,pkc->pmc"}> : () -> ()
    %cst = arith.constant dense<0.000000e+00> : vector<16x2x128xf32>
    %2 = tpu.matmul %0, %1, %cst {dimension_numbers = #tpu.dot_dimension_numbers<[2], [1], [1], [2], [0, 0, 0, 1, 1, 2], [0], [0]>} : vector<16x2x32xbf16>, vector<16x32x128xbf16>, vector<16x2x128xf32> -> vector<16x2x128xf32>
    "tpu.trace_stop"() : () -> ()
    %cst_5 = arith.constant dense<0.000000e+00> : vector<128xf32>
    %3 = vector.multi_reduction <add>, %2, %cst_5 [0, 1] : vector<16x2x128xf32> to vector<128xf32>
    %4 = vector.shape_cast %3 : vector<128xf32> to vector<1x1x128xf32>
    %5 = arith.mulf %2, %2 : vector<16x2x128xf32>
    %cst_6 = arith.constant dense<0.000000e+00> : vector<128xf32>
    %6 = vector.multi_reduction <add>, %5, %cst_6 [0, 1] : vector<16x2x128xf32> to vector<128xf32>
    %7 = vector.shape_cast %6 : vector<128xf32> to vector<1x1x128xf32>
    %cst_7 = arith.constant 3.125000e-02 : f32
    %8 = vector.broadcast %cst_7 : f32 to vector<1x1x128xf32>
    %9 = arith.mulf %4, %8 : vector<1x1x128xf32>
    %cst_8 = arith.constant 3.125000e-02 : f32
    %10 = vector.broadcast %cst_8 : f32 to vector<1x1x128xf32>
    %11 = arith.mulf %7, %10 : vector<1x1x128xf32>
    %12 = arith.mulf %9, %9 : vector<1x1x128xf32>
    %13 = arith.subf %11, %12 : vector<1x1x128xf32>
    %c0_9 = arith.constant 0 : index
    %c0_10 = arith.constant 0 : index
    %14 = vector.load %arg2[%c0_9, %c0_10] : memref<1x128xf32, #tpu.memory_space<vmem>>, vector<1x128xf32>
    %cst_11 = arith.constant 9.99999974E-6 : f32
    %15 = vector.broadcast %cst_11 : f32 to vector<1x1x128xf32>
    %16 = arith.addf %13, %15 : vector<1x1x128xf32>
    %17 = math.rsqrt %16 : vector<1x1x128xf32>
    %18 = vector.shape_cast %14 : vector<1x128xf32> to vector<1x1x128xf32>
    %19 = arith.mulf %18, %17 : vector<1x1x128xf32>
    %c0_12 = arith.constant 0 : index
    %c0_13 = arith.constant 0 : index
    %20 = vector.load %arg3[%c0_12, %c0_13] : memref<1x128xf32, #tpu.memory_space<vmem>>, vector<1x128xf32>
    %21 = arith.mulf %9, %19 : vector<1x1x128xf32>
    %22 = vector.shape_cast %20 : vector<1x128xf32> to vector<1x1x128xf32>
    %23 = arith.subf %22, %21 : vector<1x1x128xf32>
    %24 = vector.broadcast %19 : vector<1x1x128xf32> to vector<16x2x128xf32>
    %25 = arith.mulf %2, %24 : vector<16x2x128xf32>
    %26 = vector.broadcast %23 : vector<1x1x128xf32> to vector<16x2x128xf32>
    %27 = arith.addf %25, %26 : vector<16x2x128xf32>
    %cst_14 = arith.constant 0.000000e+00 : f32
    %28 = vector.broadcast %cst_14 : f32 to vector<16x2x128xf32>
    %29 = arith.maximumf %27, %28 : vector<16x2x128xf32>
    %c0_15 = arith.constant 0 : index
    %c0_16 = arith.constant 0 : index
    %c0_17 = arith.constant 0 : index
    %30 = vector.load %arg4[%c0_15, %c0_16, %c0_17] : memref<16x2x128xf32, #tpu.memory_space<vmem>>, vector<16x2x128xf32>
    tpu.vector_store %arg4[%c0_15, %c0_16, %c0_17], %29 {strides = array<i32>} : memref<16x2x128xf32, #tpu.memory_space<vmem>>, vector<16x2x128xf32>,
    return
  }
}

module attributes {stable_mosaic.version = 11 : i64} {
  func.func @_phase_matmul_bn_relu_kernel(%arg0: memref<4x32x256xbf16, #tpu.memory_space<vmem>>, %arg1: memref<4x256x128xbf16, #tpu.memory_space<vmem>>, %arg2: memref<1x128xf32, #tpu.memory_space<vmem>>, %arg3: memref<1x128xf32, #tpu.memory_space<vmem>>, %arg4: memref<4x32x128xf32, #tpu.memory_space<vmem>>) attributes {dimension_semantics = [], scalar_prefetch = 0 : i64, scratch_operands = 0 : i64, tpu.core_type = #tpu.core_type<tc>} {
    %c0 = arith.constant 0 : index
    %c0_0 = arith.constant 0 : index
    %c0_1 = arith.constant 0 : index
    %0 = vector.load %arg0[%c0, %c0_0, %c0_1] : memref<4x32x256xbf16, #tpu.memory_space<vmem>>, vector<4x32x256xbf16>
    %c0_2 = arith.constant 0 : index
    %c0_3 = arith.constant 0 : index
    %c0_4 = arith.constant 0 : index
    %1 = vector.load %arg1[%c0_2, %c0_3, %c0_4] : memref<4x256x128xbf16, #tpu.memory_space<vmem>>, vector<4x256x128xbf16>
    "tpu.trace_start"() <{level = 10 : i32, message = "pmk,pkc->pmc"}> : () -> ()
    %cst = arith.constant dense<0.000000e+00> : vector<4x32x128xf32>
    %2 = tpu.matmul %0, %1, %cst {dimension_numbers = #tpu.dot_dimension_numbers<[2], [1], [1], [2], [0, 0, 0, 1, 1, 2], [0], [0]>} : vector<4x32x256xbf16>, vector<4x256x128xbf16>, vector<4x32x128xf32> -> vector<4x32x128xf32>
    "tpu.trace_stop"() : () -> ()
    %cst_5 = arith.constant dense<0.000000e+00> : vector<128xf32>
    %3 = vector.multi_reduction <add>, %2, %cst_5 [0, 1] : vector<4x32x128xf32> to vector<128xf32>
    %4 = vector.shape_cast %3 : vector<128xf32> to vector<1x1x128xf32>
    %5 = arith.mulf %2, %2 : vector<4x32x128xf32>
    %cst_6 = arith.constant dense<0.000000e+00> : vector<128xf32>
    %6 = vector.multi_reduction <add>, %5, %cst_6 [0, 1] : vector<4x32x128xf32> to vector<128xf32>
    %7 = vector.shape_cast %6 : vector<128xf32> to vector<1x1x128xf32>
    %cst_7 = arith.constant 7.812500e-03 : f32
    %8 = vector.broadcast %cst_7 : f32 to vector<1x1x128xf32>
    %9 = arith.mulf %4, %8 : vector<1x1x128xf32>
    %cst_8 = arith.constant 7.812500e-03 : f32
    %10 = vector.broadcast %cst_8 : f32 to vector<1x1x128xf32>
    %11 = arith.mulf %7, %10 : vector<1x1x128xf32>
    %12 = arith.mulf %9, %9 : vector<1x1x128xf32>
    %13 = arith.subf %11, %12 : vector<1x1x128xf32>
    %c0_9 = arith.constant 0 : index
    %c0_10 = arith.constant 0 : index
    %14 = vector.load %arg2[%c0_9, %c0_10] : memref<1x128xf32, #tpu.memory_space<vmem>>, vector<1x128xf32>
    %cst_11 = arith.constant 9.99999974E-6 : f32
    %15 = vector.broadcast %cst_11 : f32 to vector<1x1x128xf32>
    %16 = arith.addf %13, %15 : vector<1x1x128xf32>
    %17 = math.rsqrt %16 : vector<1x1x128xf32>
    %18 = vector.shape_cast %14 : vector<1x128xf32> to vector<1x1x128xf32>
    %19 = arith.mulf %18, %17 : vector<1x1x128xf32>
    %c0_12 = arith.constant 0 : index
    %c0_13 = arith.constant 0 : index
    %20 = vector.load %arg3[%c0_12, %c0_13] : memref<1x128xf32, #tpu.memory_space<vmem>>, vector<1x128xf32>
    %21 = arith.mulf %9, %19 : vector<1x1x128xf32>
    %22 = vector.shape_cast %20 : vector<1x128xf32> to vector<1x1x128xf32>
    %23 = arith.subf %22, %21 : vector<1x1x128xf32>
    %24 = vector.broadcast %19 : vector<1x1x128xf32> to vector<4x32x128xf32>
    %25 = arith.mulf %2, %24 : vector<4x32x128xf32>
    %26 = vector.broadcast %23 : vector<1x1x128xf32> to vector<4x32x128xf32>
    %27 = arith.addf %25, %26 : vector<4x32x128xf32>
    %cst_14 = arith.constant 0.000000e+00 : f32
    %28 = vector.broadcast %cst_14 : f32 to vector<4x32x128xf32>
    %29 = arith.maximumf %27, %28 : vector<4x32x128xf32>
    %c0_15 = arith.constant 0 : index
    %c0_16 = arith.constant 0 : index
    %c0_17 = arith.constant 0 : index
    %30 = vector.load %arg4[%c0_15, %c0_16, %c0_17] : memref<4x32x128xf32, #tpu.memory_space<vmem>>, vector<4x32x128xf32>
    tpu.vector_store %arg4[%c0_15, %c0_16, %c0_17], %29 {strides = array<i32>} : memref<4x32x128xf32, #tpu.memory_space<vmem>>, vector<4x32x128xf32>,
    return
  }
}

module attributes {stable_mosaic.version = 11 : i64} {
  func.func @_phase_matmul_bn_relu_kernel(%arg0: memref<4x128x128xbf16, #tpu.memory_space<vmem>>, %arg1: memref<4x128x128xbf16, #tpu.memory_space<vmem>>, %arg2: memref<1x128xf32, #tpu.memory_space<vmem>>, %arg3: memref<1x128xf32, #tpu.memory_space<vmem>>, %arg4: memref<4x128x128xf32, #tpu.memory_space<vmem>>) attributes {dimension_semantics = [], scalar_prefetch = 0 : i64, scratch_operands = 0 : i64, tpu.core_type = #tpu.core_type<tc>} {
    %c0 = arith.constant 0 : index
    %c0_0 = arith.constant 0 : index
    %c0_1 = arith.constant 0 : index
    %0 = vector.load %arg0[%c0, %c0_0, %c0_1] : memref<4x128x128xbf16, #tpu.memory_space<vmem>>, vector<4x128x128xbf16>
    %c0_2 = arith.constant 0 : index
    %c0_3 = arith.constant 0 : index
    %c0_4 = arith.constant 0 : index
    %1 = vector.load %arg1[%c0_2, %c0_3, %c0_4] : memref<4x128x128xbf16, #tpu.memory_space<vmem>>, vector<4x128x128xbf16>
    "tpu.trace_start"() <{level = 10 : i32, message = "pmk,pkc->pmc"}> : () -> ()
    %cst = arith.constant dense<0.000000e+00> : vector<4x128x128xf32>
    %2 = tpu.matmul %0, %1, %cst {dimension_numbers = #tpu.dot_dimension_numbers<[2], [1], [1], [2], [0, 0, 0, 1, 1, 2], [0], [0]>} : vector<4x128x128xbf16>, vector<4x128x128xbf16>, vector<4x128x128xf32> -> vector<4x128x128xf32>
    "tpu.trace_stop"() : () -> ()
    %cst_5 = arith.constant dense<0.000000e+00> : vector<128xf32>
    %3 = vector.multi_reduction <add>, %2, %cst_5 [0, 1] : vector<4x128x128xf32> to vector<128xf32>
    %4 = vector.shape_cast %3 : vector<128xf32> to vector<1x1x128xf32>
    %5 = arith.mulf %2, %2 : vector<4x128x128xf32>
    %cst_6 = arith.constant dense<0.000000e+00> : vector<128xf32>
    %6 = vector.multi_reduction <add>, %5, %cst_6 [0, 1] : vector<4x128x128xf32> to vector<128xf32>
    %7 = vector.shape_cast %6 : vector<128xf32> to vector<1x1x128xf32>
    %cst_7 = arith.constant 0.001953125 : f32
    %8 = vector.broadcast %cst_7 : f32 to vector<1x1x128xf32>
    %9 = arith.mulf %4, %8 : vector<1x1x128xf32>
    %cst_8 = arith.constant 0.001953125 : f32
    %10 = vector.broadcast %cst_8 : f32 to vector<1x1x128xf32>
    %11 = arith.mulf %7, %10 : vector<1x1x128xf32>
    %12 = arith.mulf %9, %9 : vector<1x1x128xf32>
    %13 = arith.subf %11, %12 : vector<1x1x128xf32>
    %c0_9 = arith.constant 0 : index
    %c0_10 = arith.constant 0 : index
    %14 = vector.load %arg2[%c0_9, %c0_10] : memref<1x128xf32, #tpu.memory_space<vmem>>, vector<1x128xf32>
    %cst_11 = arith.constant 9.99999974E-6 : f32
    %15 = vector.broadcast %cst_11 : f32 to vector<1x1x128xf32>
    %16 = arith.addf %13, %15 : vector<1x1x128xf32>
    %17 = math.rsqrt %16 : vector<1x1x128xf32>
    %18 = vector.shape_cast %14 : vector<1x128xf32> to vector<1x1x128xf32>
    %19 = arith.mulf %18, %17 : vector<1x1x128xf32>
    %c0_12 = arith.constant 0 : index
    %c0_13 = arith.constant 0 : index
    %20 = vector.load %arg3[%c0_12, %c0_13] : memref<1x128xf32, #tpu.memory_space<vmem>>, vector<1x128xf32>
    %21 = arith.mulf %9, %19 : vector<1x1x128xf32>
    %22 = vector.shape_cast %20 : vector<1x128xf32> to vector<1x1x128xf32>
    %23 = arith.subf %22, %21 : vector<1x1x128xf32>
    %24 = vector.broadcast %19 : vector<1x1x128xf32> to vector<4x128x128xf32>
    %25 = arith.mulf %2, %24 : vector<4x128x128xf32>
    %26 = vector.broadcast %23 : vector<1x1x128xf32> to vector<4x128x128xf32>
    %27 = arith.addf %25, %26 : vector<4x128x128xf32>
    %cst_14 = arith.constant 0.000000e+00 : f32
    %28 = vector.broadcast %cst_14 : f32 to vector<4x128x128xf32>
    %29 = arith.maximumf %27, %28 : vector<4x128x128xf32>
    %c0_15 = arith.constant 0 : index
    %c0_16 = arith.constant 0 : index
    %c0_17 = arith.constant 0 : index
    %30 = vector.load %arg4[%c0_15, %c0_16, %c0_17] : memref<4x128x128xf32, #tpu.memory_space<vmem>>, vector<4x128x128xf32>
    tpu.vector_store %arg4[%c0_15, %c0_16, %c0_17], %29 {strides = array<i32>} : memref<4x128x128xf32, #tpu.memory_space<vmem>>, vector<4x128x128xf32>,
    return
  }
}

module attributes {stable_mosaic.version = 11 : i64} {
  func.func @_phase_matmul_tanh_kernel(%arg0: i32, %arg1: memref<4x256x64xbf16, #tpu.memory_space<vmem>>, %arg2: memref<4x64x128xbf16, #tpu.memory_space<vmem>>, %arg3: memref<4x256x128xf32, #tpu.memory_space<vmem>>) attributes {dimension_semantics = [#tpu.dimension_semantics<parallel>], iteration_bounds = array<i64: 2>, scalar_prefetch = 0 : i64, scratch_operands = 0 : i64, tpu.core_type = #tpu.core_type<tc>, window_params = [{transform_indices = @transform_0, window_bounds = array<i64: 4, 256, 64>}, {pipeline_mode = #tpu.pipeline_mode<synchronous>, transform_indices = @transform_1, window_bounds = array<i64: 4, 64, 128>}, {transform_indices = @transform_2, window_bounds = array<i64: 4, 256, 128>}]} {
    %c0 = arith.constant 0 : index
    %c0_0 = arith.constant 0 : index
    %c0_1 = arith.constant 0 : index
    %0 = vector.load %arg1[%c0, %c0_0, %c0_1] : memref<4x256x64xbf16, #tpu.memory_space<vmem>>, vector<4x256x64xbf16>
    %c0_2 = arith.constant 0 : index
    %c0_3 = arith.constant 0 : index
    %c0_4 = arith.constant 0 : index
    %1 = vector.load %arg2[%c0_2, %c0_3, %c0_4] : memref<4x64x128xbf16, #tpu.memory_space<vmem>>, vector<4x64x128xbf16>
    "tpu.trace_start"() <{level = 10 : i32, message = "pmk,pkc->pmc"}> : () -> ()
    %cst = arith.constant dense<0.000000e+00> : vector<4x256x128xf32>
    %2 = tpu.matmul %0, %1, %cst {dimension_numbers = #tpu.dot_dimension_numbers<[2], [1], [1], [2], [0, 0, 0, 1, 1, 2], [0], [0]>} : vector<4x256x64xbf16>, vector<4x64x128xbf16>, vector<4x256x128xf32> -> vector<4x256x128xf32>
    "tpu.trace_stop"() : () -> ()
    %3 = math.tanh %2 : vector<4x256x128xf32>
    %c0_5 = arith.constant 0 : index
    %c0_6 = arith.constant 0 : index
    %c0_7 = arith.constant 0 : index
    %4 = vector.load %arg3[%c0_5, %c0_6, %c0_7] : memref<4x256x128xf32, #tpu.memory_space<vmem>>, vector<4x256x128xf32>
    tpu.vector_store %arg3[%c0_5, %c0_6, %c0_7], %3 {strides = array<i32>} : memref<4x256x128xf32, #tpu.memory_space<vmem>>, vector<4x256x128xf32>,
    return
  }
  func.func @transform_0(%arg0: i32) -> (i32, i32, i32) {
    %c0_i32 = arith.constant 0 : i32
    %c0_i32_0 = arith.constant 0 : i32
    %c0_i32_1 = arith.constant 0 : i32
    return %c0_i32, %arg0, %c0_i32_0 : i32, i32, i32
  }
  func.func @transform_1(%arg0: i32) -> (i32, i32, i32) {
    %c0_i32 = arith.constant 0 : i32
    %c0_i32_0 = arith.constant 0 : i32
    %c0_i32_1 = arith.constant 0 : i32
    %c0_i32_2 = arith.constant 0 : i32
    return %c0_i32, %c0_i32_0, %c0_i32_1 : i32, i32, i32
  }
  func.func @transform_2(%arg0: i32) -> (i32, i32, i32) {
    %c0_i32 = arith.constant 0 : i32
    %c0_i32_0 = arith.constant 0 : i32
    %c0_i32_1 = arith.constant 0 : i32
    return %c0_i32, %arg0, %c0_i32_0 : i32, i32, i32
  }
}

</mosaic_0001>

<bundles_post_ra>
// kernel: generator_forward.4
= control target key start
LH: loop header
LB: loop body
LE: loop exit
PB: predicated region body
PF: predicated region fallthrough
CT: control target
= control target key end

     0   :  { %9 = vsyncpa [#allocation3], 0  ;;  %s1461_s15 = smov [#allocation2]   ;;  %s1792_s0 = inlined_call_operand.vmem [shape: bf16[16,2,32], index: 0, kind: input, shape index: {}]   ;;  %s1793_s1 = inlined_call_operand.hbm [shape: bf16[16,32,128], index: 1, kind: input, shape index: {}]   ;;  %s1794_s2 = inlined_call_operand.vmem [shape: f32[1,128], index: 2, kind: input, shape index: {}]   ;;  %s1795_s3 = inlined_call_operand.vmem [shape: f32[1,128], index: 3, kind: input, shape index: {}]   ;;  %s1796_s4 = inlined_call_operand.vmem [shape: f32[16,2,128], index: 4, kind: output, shape index: {}]  }
   0x1   :  { %s17_s16 = sshll.u32 %s1461_s15, 4  ;;  %s18_s16 = int_to_ptr.vmem [resolvable:$true] %s17_s16 }
   0x2   :  { %s1447_s17 = scalar_lea.vmem %s18_s16, 4096  ;;  %p1452_p1 = scmp.lt.s32.totalorder %s18_s16, %s18_s16 }
   0x3   :  { %p1448_p0 = scmp.ne.s32.totalorder %s18_s16, %s1447_s17  ;;  %p1453_p2 = scmp.lt.s32.totalorder %s1447_s17, %s1447_s17 }
   0x5   :  { %p1454_p3 = por %p1453_p2, %p1452_p1 }
   0x7   :  { %p1455_p4 = pnand %p1454_p3, %p1448_p0 }
   0x9   :  { %1458 = shalt.err (!%p1455_p4)
}
   0xa   :  { %s1462_s18 = smov 64   ;;  %s1463_s19 = smov 4  }
   0xb   :  { %23 = dma.hbm_to_vmem [thread:$0]  %s1793_s1, 4096, %s18_s16, [#allocation3], %s1462_s18, %s1462_s18, %s1463_s19  }
   0xc   :  { %1459 = dma.done.wait [#allocation3], 4096  }
   0xd   :  { %1460 = vsyncadd [#allocation3], 4294963200  ;;  %v1464_v0 = vmov 0.0   ;;  %vm1465_vm0 = vmmov 0   ;;  %v1405_v1 = vld [vmem:[#allocation2 + $0x8] sm:$0xff]   ;;  %v1406_v2 = vld [vmem:[#allocation2 + $0x18] sm:$0xff]  }
   0xe   :  { %1272 = vmatprep.subr.bf16.mxu0 %v1464_v0  ;;  %1280 = vmatprep.subr.bf16.mxu1 %v1464_v0  ;;  %v1407_v3 = vld [vmem:[#allocation2] sm:$0xff]   ;;  %v1408_v4 = vld [vmem:[#allocation2 + $0x10] sm:$0xff]   ;;  %vm124_vm1 = vcmask 261120   ;;  %v1409_v7 = vld [vmem:[#allocation2 + $0x28] sm:$0xff]   ;;  %vm993_vm2 = vcmask 1041408  }
   0xf   :  { %1276 = vmatprep.mubr.msk.bf16.mxu0 %vm1465_vm0, %v1464_v0  ;;  %1284 = vmatprep.mubr.msk.bf16.mxu1 %vm1465_vm0, %v1464_v0  ;;  %v32_v5 = vld [vmem:[%s1792_s0] sm:$0x1]  ;;  %v33_v6 = vld [vmem:[%s1792_s0 + $0x1] sm:$0x1]  ;;  %v1410_v8 = vld [vmem:[#allocation2 + $0x38] sm:$0xff]  }
  0x10   :  { %1273 = vmatpush3.bf16.msra.mxu0 %v1405_v1  ;;  %1281 = vmatpush3.bf16.msra.mxu1 %v1406_v2  ;;  %v1411_v9 = vld [vmem:[#allocation2 + $0x20] sm:$0xff]   ;;  %v1412_v10 = vld [vmem:[#allocation2 + $0x30] sm:$0xff]   ;;  %v1413_v13 = vld [vmem:[#allocation2 + $0x48] sm:$0xff]  }
  0x11   :  { %1274 = vmatprep.subr.bf16.mxu0 %v1464_v0  ;;  %1282 = vmatprep.subr.bf16.mxu1 %v1464_v0  ;;  %v34_v11 = vld [vmem:[%s1792_s0 + $0x2] sm:$0x1]  ;;  %v35_v12 = vld [vmem:[%s1792_s0 + $0x3] sm:$0x1]  ;;  %v1414_v14 = vld [vmem:[#allocation2 + $0x58] sm:$0xff]  }
  0x12   :  { %v1415_v15 = vld [vmem:[#allocation2 + $0x40] sm:$0xff]   ;;  %v1416_v16 = vld [vmem:[#allocation2 + $0x50] sm:$0xff]   ;;  %v1417_v19 = vld [vmem:[#allocation2 + $0x68] sm:$0xff]  }
  0x13   :  { %v36_v17 = vld [vmem:[%s1792_s0 + $0x4] sm:$0x1]  ;;  %v37_v18 = vld [vmem:[%s1792_s0 + $0x5] sm:$0x1]  ;;  %v1418_v20 = vld [vmem:[#allocation2 + $0x78] sm:$0xff]  }
  0x14   :  { %1275 = vmatpush3.bf16.msra.mxu0 %v1407_v3  ;;  %1283 = vmatpush3.bf16.msra.mxu1 %v1408_v4  ;;  %v1419_v21 = vld [vmem:[#allocation2 + $0x60] sm:$0xff]   ;;  %v1420_v22 = vld [vmem:[#allocation2 + $0x70] sm:$0xff]   ;;  %v1421_v25 = vld [vmem:[#allocation2 + $0x88] sm:$0xff]  }
  0x15   :  { %1288 = vmatprep.subr.bf16.mxu0 %v1464_v0  ;;  %1296 = vmatprep.subr.bf16.mxu1 %v1464_v0  ;;  %v38_v23 = vld [vmem:[%s1792_s0 + $0x6] sm:$0x1]  ;;  %v39_v24 = vld [vmem:[%s1792_s0 + $0x7] sm:$0x1]  ;;  %v1422_v26 = vld [vmem:[#allocation2 + $0x98] sm:$0xff]  }
  0x16   :  { %v1423_v27 = vld [vmem:[#allocation2 + $0x80] sm:$0xff]   ;;  %v1424_v28 = vld [vmem:[#allocation2 + $0x90] sm:$0xff]   ;;  %v40_v29 = vld [vmem:[%s1792_s0 + $0x8] sm:$0x1] }
  0x17   :  { %1277 = vmatmul.mubr.msk.bf16.vlgmr.msra.gmra.mxu0 %vm124_vm1, %v32_v5  ;;  %1285 = vmatmul.mubr.msk.bf16.vlgmr.msra.gmra.mxu1 %vm124_vm1, %v33_v6  ;;  %v1425_v30 = vld [vmem:[#allocation2 + $0xa8] sm:$0xff]   ;;  %v1426_v32 = vld [vmem:[#allocation2 + $0xb8] sm:$0xff]   ;;  %v1427_v33 = vld [vmem:[#allocation2 + $0xa0] sm:$0xff]  }
  0x18   :  { %1289 = vmatpush3.bf16.msra.mxu0 %v1409_v7  ;;  %1297 = vmatpush3.bf16.msra.mxu1 %v1410_v8  ;;  %v41_v31 = vld [vmem:[%s1792_s0 + $0x9] sm:$0x1]  ;;  %v1428_v34 = vld [vmem:[#allocation2 + $0xb0] sm:$0xff]   ;;  %v42_v35 = vld [vmem:[%s1792_s0 + $0xa] sm:$0x1] }
  0x19   :  { %1290 = vmatprep.subr.bf16.mxu0 %v1464_v0  ;;  %1298 = vmatprep.subr.bf16.mxu1 %v1464_v0  ;;  %v1429_v36 = vld [vmem:[#allocation2 + $0xc8] sm:$0xff]   ;;  %v1430_v38 = vld [vmem:[#allocation2 + $0xd8] sm:$0xff]   ;;  %v1431_v39 = vld [vmem:[#allocation2 + $0xc0] sm:$0xff]  }
  0x1a   :  { %1292 = vmatprep.mubr.msk.bf16.mxu0 %vm1465_vm0, %v1464_v0  ;;  %1300 = vmatprep.mubr.msk.bf16.mxu1 %vm1465_vm0, %v1464_v0  ;;  %v43_v37 = vld [vmem:[%s1792_s0 + $0xb] sm:$0x1]  ;;  %v1432_v40 = vld [vmem:[#allocation2 + $0xd0] sm:$0xff]   ;;  %v44_v41 = vld [vmem:[%s1792_s0 + $0xc] sm:$0x1] }
  0x1b   :  { %v1433_v42 = vld [vmem:[#allocation2 + $0xe8] sm:$0xff]   ;;  %v1434_v44 = vld [vmem:[#allocation2 + $0xf8] sm:$0xff]   ;;  %v1435_v45 = vld [vmem:[#allocation2 + $0xe0] sm:$0xff]  }
  0x1c   :  { %1291 = vmatpush3.bf16.msra.mxu0 %v1411_v9  ;;  %1299 = vmatpush3.bf16.msra.mxu1 %v1412_v10  ;;  %v45_v43 = vld [vmem:[%s1792_s0 + $0xd] sm:$0x1]  ;;  %v1436_v46 = vld [vmem:[#allocation2 + $0xf0] sm:$0xff]   ;;  %v46_v47 = vld [vmem:[%s1792_s0 + $0xe] sm:$0x1] }
  0x1d   :  { %1304 = vmatprep.subr.bf16.mxu0 %v1464_v0  ;;  %1312 = vmatprep.subr.bf16.mxu1 %v1464_v0  ;;  %v47_v48 = vld [vmem:[%s1792_s0 + $0xf] sm:$0x1] }
  0x1f   :  { %1293 = vmatmul.mubr.msk.bf16.vlgmr.msra.gmra.mxu0 %vm124_vm1, %v34_v11  ;;  %1301 = vmatmul.mubr.msk.bf16.vlgmr.msra.gmra.mxu1 %vm124_vm1, %v35_v12 }
  0x20   :  { %1305 = vmatpush3.bf16.msra.mxu0 %v1413_v13  ;;  %1313 = vmatpush3.bf16.msra.mxu1 %v1414_v14 }
  0x21   :  { %1306 = vmatprep.subr.bf16.mxu0 %v1464_v0  ;;  %1314 = vmatprep.subr.bf16.mxu1 %v1464_v0 }
  0x22   :  { %1308 = vmatprep.mubr.msk.bf16.mxu0 %vm1465_vm0, %v1464_v0  ;;  %1316 = vmatprep.mubr.msk.bf16.mxu1 %vm1465_vm0, %v1464_v0 }
  0x24   :  { %1307 = vmatpush3.bf16.msra.mxu0 %v1415_v15  ;;  %1315 = vmatpush3.bf16.msra.mxu1 %v1416_v16 }
  0x25   :  { %1320 = vmatprep.subr.bf16.mxu0 %v1464_v0  ;;  %1328 = vmatprep.subr.bf16.mxu1 %v1464_v0 }
  0x27   :  { %1309 = vmatmul.mubr.msk.bf16.vlgmr.msra.gmra.mxu0 %vm124_vm1, %v36_v17  ;;  %1317 = vmatmul.mubr.msk.bf16.vlgmr.msra.gmra.mxu1 %vm124_vm1, %v37_v18 }
  0x28   :  { %1321 = vmatpush3.bf16.msra.mxu0 %v1417_v19  ;;  %1329 = vmatpush3.bf16.msra.mxu1 %v1418_v20 }
  0x29   :  { %1322 = vmatprep.subr.bf16.mxu0 %v1464_v0  ;;  %1330 = vmatprep.subr.bf16.mxu1 %v1464_v0 }
  0x2a   :  { %1324 = vmatprep.mubr.msk.bf16.mxu0 %vm1465_vm0, %v1464_v0  ;;  %1332 = vmatprep.mubr.msk.bf16.mxu1 %vm1465_vm0, %v1464_v0 }
  0x2c   :  { %1323 = vmatpush3.bf16.msra.mxu0 %v1419_v21  ;;  %1331 = vmatpush3.bf16.msra.mxu1 %v1420_v22 }
  0x2d   :  { %1336 = vmatprep.subr.bf16.mxu0 %v1464_v0  ;;  %1344 = vmatprep.subr.bf16.mxu1 %v1464_v0 }
  0x2f   :  { %1325 = vmatmul.mubr.msk.bf16.vlgmr.msra.gmra.mxu0 %vm124_vm1, %v38_v23  ;;  %1333 = vmatmul.mubr.msk.bf16.vlgmr.msra.gmra.mxu1 %vm124_vm1, %v39_v24 }
  0x30   :  { %1337 = vmatpush3.bf16.msra.mxu0 %v1421_v25  ;;  %1345 = vmatpush3.bf16.msra.mxu1 %v1422_v26 }
  0x31   :  { %1338 = vmatprep.subr.bf16.mxu0 %v1464_v0  ;;  %1346 = vmatprep.subr.bf16.mxu1 %v1464_v0 }
  0x32   :  { %1340 = vmatprep.mubr.msk.bf16.mxu0 %vm1465_vm0, %v1464_v0  ;;  %1348 = vmatprep.mubr.msk.bf16.mxu1 %vm1465_vm0, %v1464_v0 }
  0x34   :  { %1339 = vmatpush3.bf16.msra.mxu0 %v1423_v27  ;;  %1347 = vmatpush3.bf16.msra.mxu1 %v1424_v28 }
  0x35   :  { %1352 = vmatprep.subr.bf16.mxu0 %v1464_v0  ;;  %1360 = vmatprep.subr.bf16.mxu1 %v1464_v0 }
  0x37   :  { %1341 = vmatmul.mubr.msk.bf16.vlgmr.msra.gmra.mxu0 %vm124_vm1, %v40_v29  ;;  %1349 = vmatmul.mubr.msk.bf16.vlgmr.msra.gmra.mxu1 %vm124_vm1, %v41_v31 }
  0x38   :  { %1353 = vmatpush3.bf16.msra.mxu0 %v1425_v30  ;;  %1361 = vmatpush3.bf16.msra.mxu1 %v1426_v32 }
  0x39   :  { %1354 = vmatprep.subr.bf16.mxu0 %v1464_v0  ;;  %1362 = vmatprep.subr.bf16.mxu1 %v1464_v0 }
  0x3a   :  { %1356 = vmatprep.mubr.msk.bf16.mxu0 %vm1465_vm0, %v1464_v0  ;;  %1364 = vmatprep.mubr.msk.bf16.mxu1 %vm1465_vm0, %v1464_v0 }
  0x3c   :  { %1355 = vmatpush3.bf16.msra.mxu0 %v1427_v33  ;;  %1363 = vmatpush3.bf16.msra.mxu1 %v1428_v34 }
  0x3d   :  { %1368 = vmatprep.subr.bf16.mxu0 %v1464_v0  ;;  %1376 = vmatprep.subr.bf16.mxu1 %v1464_v0 }
  0x3f   :  { %1357 = vmatmul.mubr.msk.bf16.vlgmr.msra.gmra.mxu0 %vm124_vm1, %v42_v35  ;;  %1365 = vmatmul.mubr.msk.bf16.vlgmr.msra.gmra.mxu1 %vm124_vm1, %v43_v37 }
  0x40   :  { %1369 = vmatpush3.bf16.msra.mxu0 %v1429_v36  ;;  %1377 = vmatpush3.bf16.msra.mxu1 %v1430_v38 }
  0x41   :  { %1370 = vmatprep.subr.bf16.mxu0 %v1464_v0  ;;  %1378 = vmatprep.subr.bf16.mxu1 %v1464_v0 }
  0x42   :  { %1372 = vmatprep.mubr.msk.bf16.mxu0 %vm1465_vm0, %v1464_v0  ;;  %1380 = vmatprep.mubr.msk.bf16.mxu1 %vm1465_vm0, %v1464_v0 }
  0x44   :  { %1371 = vmatpush3.bf16.msra.mxu0 %v1431_v39  ;;  %1379 = vmatpush3.bf16.msra.mxu1 %v1432_v40 }
  0x45   :  { %1384 = vmatprep.subr.bf16.mxu0 %v1464_v0  ;;  %1392 = vmatprep.subr.bf16.mxu1 %v1464_v0 }
  0x47   :  { %1373 = vmatmul.mubr.msk.bf16.vlgmr.msra.gmra.mxu0 %vm124_vm1, %v44_v41  ;;  %1381 = vmatmul.mubr.msk.bf16.vlgmr.msra.gmra.mxu1 %vm124_vm1, %v45_v43 }
  0x48   :  { %1385 = vmatpush3.bf16.msra.mxu0 %v1433_v42  ;;  %1393 = vmatpush3.bf16.msra.mxu1 %v1434_v44 }
  0x49   :  { %1386 = vmatprep.subr.bf16.mxu0 %v1464_v0  ;;  %1394 = vmatprep.subr.bf16.mxu1 %v1464_v0 }
  0x4a   :  { %1388 = vmatprep.mubr.msk.bf16.mxu0 %vm1465_vm0, %v1464_v0  ;;  %1396 = vmatprep.mubr.msk.bf16.mxu1 %vm1465_vm0, %v1464_v0 }
  0x4c   :  { %1387 = vmatpush3.bf16.msra.mxu0 %v1435_v45  ;;  %1395 = vmatpush3.bf16.msra.mxu1 %v1436_v46 }
  0x4f   :  { %1389 = vmatmul.mubr.msk.bf16.vlgmr.msra.gmra.mxu0 %vm124_vm1, %v46_v47  ;;  %1397 = vmatmul.mubr.msk.bf16.vlgmr.msra.gmra.mxu1 %vm124_vm1, %v47_v48 }
  0xd7   :  { %v1622_v49 = vpop.f32.mrf.mxu0  ;;  %v1624_v50 = vpop.f32.mrf.mxu1 }
  0xd8   :  { %v1031_v0 = vmul.f32 %v1622_v49, %v1622_v49  ;;  %v1032_v1 = vmul.f32 %v1624_v50, %v1624_v50  ;;  %v994_v4 = vsel %vm993_vm2, %v1622_v49, 0.0  ;;  %v995_v5 = vsel %vm993_vm2, %v1624_v50, 0.0 }
  0xd9   :  { %v1278_v51 = vpop.f32.mrf.mxu0  ;;  %v1286_v52 = vpop.f32.mrf.mxu1  ;;  %v996_v13 = vadd.f32 %v995_v5, %v994_v4 }
  0xda   :  { %v1047_v9 = vsel %vm993_vm2, %v1031_v0, 0.0  ;;  %v1048_v10 = vsel %vm993_vm2, %v1032_v1, 0.0 }
  0xdb   :  { %v165_v53 = vpop.f32.mrf.mxu0  ;;  %v220_v54 = vpop.f32.mrf.mxu1  ;;  %v1049_v18 = vadd.f32 %v1048_v10, %v1047_v9 }
  0xdd   :  { %v1279_v55 = vpop.f32.mrf.mxu0  ;;  %v1287_v56 = vpop.f32.mrf.mxu1 }
  0xdf   :  { %v1626_v57 = vpop.f32.mrf.mxu0  ;;  %v1628_v58 = vpop.f32.mrf.mxu1 }
  0xe0   :  { %v1033_v6 = vmul.f32 %v1626_v57, %v1626_v57  ;;  %v997_v11 = vsel %vm993_vm2, %v1626_v57, 0.0  ;;  %v1034_v16 = vmul.f32 %v1628_v58, %v1628_v58  ;;  %v999_v21 = vsel %vm993_vm2, %v1628_v58, 0.0 }
  0xe1   :  { %v1294_v59 = vpop.f32.mrf.mxu0  ;;  %v1302_v60 = vpop.f32.mrf.mxu1  ;;  %v998_v19 = vadd.f32 %v997_v11, %v996_v13 }
  0xe2   :  { %v1050_v15 = vsel %vm993_vm2, %v1033_v6, 0.0  ;;  %v1052_v26 = vsel %vm993_vm2, %v1034_v16, 0.0 }
  0xe3   :  { %v275_v61 = vpop.f32.mrf.mxu0  ;;  %v330_v62 = vpop.f32.mrf.mxu1  ;;  %v1051_v24 = vadd.f32 %v1050_v15, %v1049_v18  ;;  %v1000_v29 = vadd.f32 %v999_v21, %v998_v19 }
  0xe5   :  { %v1295_v63 = vpop.f32.mrf.mxu0  ;;  %v1303_v2 = vpop.f32.mrf.mxu1  ;;  %v1053_v34 = vadd.f32 %v1052_v26, %v1051_v24 }
  0xe7   :  { %v1634_v3 = vpop.f32.mrf.mxu0  ;;  %v1642_v7 = vpop.f32.mrf.mxu1 }
  0xe8   :  { %v1035_v22 = vmul.f32 %v1634_v3, %v1634_v3  ;;  %v1001_v27 = vsel %vm993_vm2, %v1634_v3, 0.0  ;;  %v1036_v32 = vmul.f32 %v1642_v7, %v1642_v7  ;;  %v1003_v37 = vsel %vm993_vm2, %v1642_v7, 0.0 }
  0xe9   :  { %v1310_v8 = vpop.f32.mrf.mxu0  ;;  %v1318_v12 = vpop.f32.mrf.mxu1  ;;  %v1002_v35 = vadd.f32 %v1001_v27, %v1000_v29 }
  0xea   :  { %v1054_v31 = vsel %vm993_vm2, %v1035_v22, 0.0  ;;  %v1056_v42 = vsel %vm993_vm2, %v1036_v32, 0.0 }
  0xeb   :  { %v385_v14 = vpop.f32.mrf.mxu0  ;;  %v440_v17 = vpop.f32.mrf.mxu1  ;;  %v1055_v40 = vadd.f32 %v1054_v31, %v1053_v34  ;;  %v1004_v45 = vadd.f32 %v1003_v37, %v1002_v35 }
  0xed   :  { %v1311_v20 = vpop.f32.mrf.mxu0  ;;  %v1319_v23 = vpop.f32.mrf.mxu1  ;;  %v1057_v52 = vadd.f32 %v1056_v42, %v1055_v40 }
  0xef   :  { %v1655_v25 = vpop.f32.mrf.mxu0  ;;  %v1660_v28 = vpop.f32.mrf.mxu1 }
  0xf0   :  { %v1037_v38 = vmul.f32 %v1655_v25, %v1655_v25  ;;  %v1005_v43 = vsel %vm993_vm2, %v1655_v25, 0.0  ;;  %v1038_v48 = vmul.f32 %v1660_v28, %v1660_v28  ;;  %v1007_v55 = vsel %vm993_vm2, %v1660_v28, 0.0 }
  0xf1   :  { %v1326_v30 = vpop.f32.mrf.mxu0  ;;  %v1334_v33 = vpop.f32.mrf.mxu1  ;;  %v1006_v53 = vadd.f32 %v1005_v43, %v1004_v45 }
  0xf2   :  { %v1058_v47 = vsel %vm993_vm2, %v1037_v38, 0.0  ;;  %v1060_v62 = vsel %vm993_vm2, %v1038_v48, 0.0 }
  0xf3   :  { %v495_v36 = vpop.f32.mrf.mxu0  ;;  %v550_v39 = vpop.f32.mrf.mxu1  ;;  %v1059_v60 = vadd.f32 %v1058_v47, %v1057_v52  ;;  %v1008_v1 = vadd.f32 %v1007_v55, %v1006_v53 }
  0xf5   :  { %v1327_v41 = vpop.f32.mrf.mxu0  ;;  %v1335_v44 = vpop.f32.mrf.mxu1  ;;  %v1061_v8 = vadd.f32 %v1060_v62, %v1059_v60 }
  0xf7   :  { %v1672_v46 = vpop.f32.mrf.mxu0  ;;  %v1677_v51 = vpop.f32.mrf.mxu1 }
  0xf8   :  { %v1039_v56 = vmul.f32 %v1672_v46, %v1672_v46  ;;  %v1009_v63 = vsel %vm993_vm2, %v1672_v46, 0.0  ;;  %v1040_v5 = vmul.f32 %v1677_v51, %v1677_v51  ;;  %v1011_v11 = vsel %vm993_vm2, %v1677_v51, 0.0 }
  0xf9   :  { %v1342_v54 = vpop.f32.mrf.mxu0  ;;  %v1350_v59 = vpop.f32.mrf.mxu1  ;;  %v1010_v9 = vadd.f32 %v1009_v63, %v1008_v1 }
  0xfa   :  { %v1062_v4 = vsel %vm993_vm2, %v1039_v56, 0.0  ;;  %v1064_v16 = vsel %vm993_vm2, %v1040_v5, 0.0 }
  0xfb   :  { %v605_v61 = vpop.f32.mrf.mxu0  ;;  %v660_v0 = vpop.f32.mrf.mxu1  ;;  %v1063_v14 = vadd.f32 %v1062_v4, %v1061_v8  ;;  %v1012_v19 = vadd.f32 %v1011_v11, %v1010_v9 }
  0xfd   :  { %v1343_v2 = vpop.f32.mrf.mxu0  ;;  %v1351_v6 = vpop.f32.mrf.mxu1  ;;  %v1065_v24 = vadd.f32 %v1064_v16, %v1063_v14 }
  0xff   :  { %v1689_v10 = vpop.f32.mrf.mxu0  ;;  %v1695_v13 = vpop.f32.mrf.mxu1 }
 0x100   :  { %v1041_v12 = vmul.f32 %v1689_v10, %v1689_v10  ;;  %v1013_v17 = vsel %vm993_vm2, %v1689_v10, 0.0  ;;  %v1042_v22 = vmul.f32 %v1695_v13, %v1695_v13  ;;  %v1015_v29 = vsel %vm993_vm2, %v1695_v13, 0.0 }
 0x101   :  { %v1358_v15 = vpop.f32.mrf.mxu0  ;;  %v1366_v18 = vpop.f32.mrf.mxu1  ;;  %v1014_v26 = vadd.f32 %v1013_v17, %v1012_v19 }
 0x102   :  { %v1066_v21 = vsel %vm993_vm2, %v1041_v12, 0.0  ;;  %v1068_v33 = vsel %vm993_vm2, %v1042_v22, 0.0 }
 0x103   :  { %v715_v20 = vpop.f32.mrf.mxu0  ;;  %v770_v23 = vpop.f32.mrf.mxu1  ;;  %v1067_v31 = vadd.f32 %v1066_v21, %v1065_v24  ;;  %v1016_v37 = vadd.f32 %v1015_v29, %v1014_v26 }
 0x105   :  { %v1359_v27 = vpop.f32.mrf.mxu0  ;;  %v1367_v30 = vpop.f32.mrf.mxu1  ;;  %v1069_v42 = vadd.f32 %v1068_v33, %v1067_v31 }
 0x107   :  { %v1705_v32 = vpop.f32.mrf.mxu0  ;;  %v1712_v36 = vpop.f32.mrf.mxu1 }
 0x108   :  { %v1017_v34 = vsel %vm993_vm2, %v1705_v32, 0.0  ;;  %v1043_v35 = vmul.f32 %v1705_v32, %v1705_v32  ;;  %v1044_v40 = vmul.f32 %v1712_v36, %v1712_v36  ;;  %v1019_v45 = vsel %vm993_vm2, %v1712_v36, 0.0 }
 0x109   :  { %v1374_v38 = vpop.f32.mrf.mxu0  ;;  %v1382_v41 = vpop.f32.mrf.mxu1  ;;  %v1018_v43 = vadd.f32 %v1017_v34, %v1016_v37 }
 0x10a   :  { %v1070_v39 = vsel %vm993_vm2, %v1043_v35, 0.0  ;;  %v1072_v53 = vsel %vm993_vm2, %v1044_v40, 0.0  ;;  %v1096_v38 = vlaneseq  ;;  %v1088_v40 = vld [vmem:[%s1794_s2] sm:$0x1] }
 0x10b   :  { %v825_v44 = vpop.f32.mrf.mxu0  ;;  %v880_v47 = vpop.f32.mrf.mxu1  ;;  %v1071_v48 = vadd.f32 %v1070_v39, %v1069_v42  ;;  %v1020_v55 = vadd.f32 %v1019_v45, %v1018_v43 }
 0x10c   :  { %v1097_v39 = vshrl.u32 %v1096_v38, 7  ;;  %v1092_v44 = vld [vmem:[%s1795_s3] sm:$0x1] }
 0x10d   :  { %v1375_v52 = vpop.f32.mrf.mxu0  ;;  %v1383_v54 = vpop.f32.mrf.mxu1  ;;  %v1073_v62 = vadd.f32 %v1072_v53, %v1071_v48 }
 0x10e   :  { %v1098_v41 = vsub.s32 0, %v1097_v39 }
 0x10f   :  { %v932_v56 = vpop.f32.mrf.mxu0  ;;  %v987_v61 = vpop.f32.mrf.mxu1 }
 0x110   :  { %v1021_v59 = vsel %vm993_vm2, %v932_v56, 0.0  ;;  %v1045_v60 = vmul.f32 %v932_v56, %v932_v56  ;;  %v1023_v0 = vsel %vm993_vm2, %v987_v61, 0.0  ;;  %v1046_v1 = vmul.f32 %v987_v61, %v987_v61 }
 0x111   :  { %v1022_v63 = vadd.f32 %v1021_v59, %v1020_v55  ;;  %v1390_v2 = vpop.f32.mrf.mxu0  ;;  %v1398_v5 = vpop.f32.mrf.mxu1 }
 0x112   :  { %v1074_v4 = vsel %vm993_vm2, %v1045_v60, 0.0  ;;  %v1076_v9 = vsel %vm993_vm2, %v1046_v1, 0.0 }
 0x113   :  { %v1075_v6 = vadd.f32 %v1074_v4, %v1073_v62  ;;  %v1024_v8 = vadd.f32 %v1023_v0, %v1022_v63  ;;  %v935_v11 = vpop.f32.mrf.mxu0  ;;  %v990_v12 = vpop.f32.mrf.mxu1 }
 0x115   :  { %v1025_v14 = vrot.slane %v1024_v8, 4  ;;  %v1077_v15 = vadd.f32 %v1076_v9, %v1075_v6  ;;  %v1391_v16 = vpop.f32.mrf.mxu0  ;;  %v1399_v17 = vpop.f32.mrf.mxu1 }
 0x117   :  { %v1026_v18 = vadd.f32 %v1025_v14, %v1024_v8  ;;  %v1078_v19 = vrot.slane %v1077_v15, 4 }
 0x119   :  { %v1027_v20 = vrot.slane %v1026_v18, 2  ;;  %v1079_v21 = vadd.f32 %v1078_v19, %v1077_v15 }
 0x11b   :  { %v1028_v22 = vadd.f32 %v1027_v20, %v1026_v18  ;;  %v1080_v23 = vrot.slane %v1079_v21, 2 }
 0x11d   :  { %v1029_v24 = vrot.slane %v1028_v22, 1  ;;  %v1081_v26 = vadd.f32 %v1080_v23, %v1079_v21 }
 0x11f   :  { %v1030_v27 = vadd.f32 %v1029_v24, %v1028_v22  ;;  %v1082_v29 = vrot.slane %v1081_v26, 1 }
 0x121   :  { %v1083_v30 = vadd.f32 %v1082_v29, %v1081_v26  ;;  %v1084_v31 = vmul.f32 0.03125, %v1030_v27 }
 0x123   :  { %v1085_v33 = vmul.f32 0.03125, %v1083_v30  ;;  %v1086_v34 = vmul.f32 %v1084_v31, %v1084_v31 }
 0x125   :  { %v1087_v35 = vsub.f32 %v1085_v33, %v1086_v34 }
 0x127   :  { %v1089_v37 = vadd.f32 1e-05, %v1087_v35 }
 0x129   :  { %1437 = vrsqrt.f32 %v1089_v37 }
 0x136   :  { %v1438_v42 = vpop.eup %1437 }
 0x137   :  { %v1091_v43 = vmul.f32 %v1438_v42, %v1088_v40 }
 0x139   :  { %v1093_v45 = vmul.f32 %v1091_v43, %v1084_v31  ;;  %v1099_v47 = vrot.slane %v1091_v43, %v1098_v41 }
 0x13b   :  { %v1094_v48 = vsub.f32 %v1092_v44, %v1093_v45  ;;  %v1101_v52 = vmul.f32 %v1099_v47, %v1622_v49  ;;  %v1102_v53 = vmul.f32 %v1099_v47, %v1624_v50  ;;  %v1103_v54 = vmul.f32 %v1099_v47, %v1626_v57 }
 0x13c   :  { %v1104_v55 = vmul.f32 %v1099_v47, %v1628_v58  ;;  %v1105_v59 = vmul.f32 %v1099_v47, %v1634_v3  ;;  %v1106_v60 = vmul.f32 %v1099_v47, %v1642_v7  ;;  %v1107_v62 = vmul.f32 %v1099_v47, %v1655_v25 }
 0x13d   :  { %v1108_v63 = vmul.f32 %v1099_v47, %v1660_v28  ;;  %v1109_v0 = vmul.f32 %v1099_v47, %v1672_v46  ;;  %v1110_v1 = vmul.f32 %v1099_v47, %v1677_v51  ;;  %v1111_v49 = vmul.f32 %v1099_v47, %v1689_v10 }
 0x13e   :  { %v1112_v50 = vmul.f32 %v1099_v47, %v1695_v13  ;;  %v1121_v2 = vrot.slane %v1094_v48, %v1098_v41  ;;  %v1113_v57 = vmul.f32 %v1099_v47, %v1705_v32  ;;  %v1114_v58 = vmul.f32 %v1099_v47, %v1712_v36 }
 0x13f   :  { %v1115_v3 = vmul.f32 %v1099_v47, %v932_v56  ;;  %v1116_v4 = vmul.f32 %v1099_v47, %v987_v61 }
 0x140   :  { %v1123_v7 = vadd.f32 %v1121_v2, %v1101_v52  ;;  %v1124_v5 = vadd.f32 %v1121_v2, %v1102_v53  ;;  %v1125_v25 = vadd.f32 %v1121_v2, %v1103_v54  ;;  %v1126_v6 = vadd.f32 %v1121_v2, %v1104_v55 }
 0x141   :  { %v1127_v28 = vadd.f32 %v1121_v2, %v1105_v59  ;;  %v1128_v8 = vadd.f32 %v1121_v2, %v1106_v60  ;;  %v1129_v46 = vadd.f32 %v1121_v2, %v1107_v62  ;;  %v1130_v9 = vadd.f32 %v1121_v2, %v1108_v63 }
 0x142   :  { %v1131_v51 = vadd.f32 %v1121_v2, %v1109_v0  ;;  %v1132_v11 = vadd.f32 %v1121_v2, %v1110_v1  ;;  %v1133_v10 = vadd.f32 %v1121_v2, %v1111_v49  ;;  %v1134_v12 = vadd.f32 %v1121_v2, %v1112_v50 }
 0x143   :  { %v1135_v13 = vadd.f32 %v1121_v2, %v1113_v57  ;;  %v1136_v14 = vadd.f32 %v1121_v2, %v1114_v58  ;;  %v1137_v15 = vadd.f32 %v1121_v2, %v1115_v3  ;;  %v1138_v32 = vadd.f32 %v1121_v2, %v1116_v4 }
 0x144   :  { %v1139_v16 = vmax.f32 %v1123_v7, 0.0  ;;  %v1140_v36 = vmax.f32 %v1124_v5, 0.0  ;;  %v1141_v56 = vmax.f32 %v1125_v25, 0.0  ;;  %v1142_v61 = vmax.f32 %v1126_v6, 0.0 }
 0x145   :  { %v1143_v17 = vmax.f32 %v1127_v28, 0.0  ;;  %v1144_v18 = vmax.f32 %v1128_v8, 0.0  ;;  %v1145_v19 = vmax.f32 %v1129_v46, 0.0  ;;  %v1146_v20 = vmax.f32 %v1130_v9, 0.0 }
 0x146   :  { %v1147_v21 = vmax.f32 %v1131_v51, 0.0  ;;  %v1148_v22 = vmax.f32 %v1132_v11, 0.0  ;;  %v1149_v23 = vmax.f32 %v1133_v10, 0.0  ;;  %v1150_v24 = vmax.f32 %v1134_v12, 0.0  ;;  %1155 = vst [vmem:[%s1796_s4] sm:$0x3] %v1139_v16 }
 0x147   :  { %1156 = vst [vmem:[%s1796_s4 + $0x2] sm:$0x3] %v1140_v36  ;;  %1157 = vst [vmem:[%s1796_s4 + $0x4] sm:$0x3] %v1141_v56  ;;  %v1151_v26 = vmax.f32 %v1135_v13, 0.0  ;;  %v1152_v27 = vmax.f32 %v1136_v14, 0.0 }
 0x148   :  { %1158 = vst [vmem:[%s1796_s4 + $0x6] sm:$0x3] %v1142_v61  ;;  %v1153_v29 = vmax.f32 %v1137_v15, 0.0  ;;  %v1154_v30 = vmax.f32 %v1138_v32, 0.0  ;;  %1159 = vst [vmem:[%s1796_s4 + $0x8] sm:$0x3] %v1143_v17 }
 0x149   :  { %1160 = vst [vmem:[%s1796_s4 + $0xa] sm:$0x3] %v1144_v18  ;;  %1161 = vst [vmem:[%s1796_s4 + $0xc] sm:$0x3] %v1145_v19 }
 0x14a   :  { %1162 = vst [vmem:[%s1796_s4 + $0xe] sm:$0x3] %v1146_v20  ;;  %1163 = vst [vmem:[%s1796_s4 + $0x10] sm:$0x3] %v1147_v21 }
 0x14b   :  { %1164 = vst [vmem:[%s1796_s4 + $0x12] sm:$0x3] %v1148_v22  ;;  %1165 = vst [vmem:[%s1796_s4 + $0x14] sm:$0x3] %v1149_v23 }
 0x14c   :  { %1166 = vst [vmem:[%s1796_s4 + $0x16] sm:$0x3] %v1150_v24  ;;  %1167 = vst [vmem:[%s1796_s4 + $0x18] sm:$0x3] %v1151_v26 }
 0x14d   :  { %1168 = vst [vmem:[%s1796_s4 + $0x1a] sm:$0x3] %v1152_v27  ;;  %1169 = vst [vmem:[%s1796_s4 + $0x1c] sm:$0x3] %v1153_v29 }
 0x14e   :  { %1170 = vst [vmem:[%s1796_s4 + $0x1e] sm:$0x3] %v1154_v30 }
 0x14f   :  { %1175 = vsyncpa [#allocation3], 1 }

// kernel: generator_forward.5
= control target key start
LH: loop header
LB: loop body
LE: loop exit
PB: predicated region body
PF: predicated region fallthrough
CT: control target
= control target key end

     0   :  { %s1656_s1 = inlined_call_operand.vmem [shape: bf16[4,256,128], index: 1, kind: input, shape index: {}]   ;;  %s1657_s0 = inlined_call_operand.vmem [shape: bf16[4,32,256], index: 0, kind: input, shape index: {}]   ;;  %s1658_s2 = inlined_call_operand.vmem [shape: f32[1,128], index: 2, kind: input, shape index: {}]   ;;  %s1659_s3 = inlined_call_operand.vmem [shape: f32[1,128], index: 3, kind: input, shape index: {}]   ;;  %s1660_s4 = inlined_call_operand.vmem [shape: f32[4,32,128], index: 4, kind: output, shape index: {}]  }
   0x1   :  { %v1163_v0 = vld [vmem:[%s1656_s1 + $0x78] sm:$0xff]   ;;  %v1167_v4 = vld [vmem:[%s1656_s1 + $0x70] sm:$0xff]   ;;  %v1171_v8 = vld [vmem:[%s1656_s1 + $0x68] sm:$0xff]  }
   0x2   :  { %v1164_v1 = vld [vmem:[%s1656_s1 + $0x38] sm:$0xff]   ;;  %1051 = vmatprep.subr.bf16.mxu0 %v1163_v0  ;;  %v1168_v5 = vld [vmem:[%s1656_s1 + $0x30] sm:$0xff]   ;;  %v1172_v9 = vld [vmem:[%s1656_s1 + $0x28] sm:$0xff]  }
   0x3   :  { %v1165_v2 = vld [vmem:[%s1656_s1 + $0xf8] sm:$0xff]   ;;  %1052 = vmatpush3.bf16.msra.mxu0 %v1164_v1  ;;  %v1169_v6 = vld [vmem:[%s1656_s1 + $0xf0] sm:$0xff]   ;;  %v1173_v10 = vld [vmem:[%s1656_s1 + $0xe8] sm:$0xff]  }
   0x4   :  { %v1166_v3 = vld [vmem:[%s1656_s1 + $0xb8] sm:$0xff]   ;;  %1079 = vmatprep.subr.bf16.mxu1 %v1165_v2  ;;  %1053 = vmatprep.subr.bf16.mxu0 %v1167_v4  ;;  %v1170_v7 = vld [vmem:[%s1656_s1 + $0xb0] sm:$0xff]   ;;  %v1174_v11 = vld [vmem:[%s1656_s1 + $0xa8] sm:$0xff]  }
   0x5   :  { %1080 = vmatpush3.bf16.msra.mxu1 %v1166_v3  ;;  %v1175_v12 = vld [vmem:[%s1656_s1 + $0x60] sm:$0xff]   ;;  %v1179_v16 = vld [vmem:[%s1656_s1 + $0x58] sm:$0xff]   ;;  %v1183_v20 = vld [vmem:[%s1656_s1 + $0x50] sm:$0xff]  }
   0x6   :  { %1081 = vmatprep.subr.bf16.mxu1 %v1169_v6  ;;  %v1176_v13 = vld [vmem:[%s1656_s1 + $0x20] sm:$0xff]   ;;  %v1180_v17 = vld [vmem:[%s1656_s1 + $0x18] sm:$0xff]   ;;  %v1184_v21 = vld [vmem:[%s1656_s1 + $0x10] sm:$0xff]  }
   0x7   :  { %1054 = vmatpush3.bf16.msra.mxu0 %v1168_v5  ;;  %v1177_v14 = vld [vmem:[%s1656_s1 + $0xe0] sm:$0xff]   ;;  %v1181_v18 = vld [vmem:[%s1656_s1 + $0xd8] sm:$0xff]   ;;  %v1185_v22 = vld [vmem:[%s1656_s1 + $0xd0] sm:$0xff]  }
   0x8   :  { %1055 = vmatprep.subr.bf16.mxu0 %v1171_v8  ;;  %v1178_v15 = vld [vmem:[%s1656_s1 + $0xa0] sm:$0xff]   ;;  %v1182_v19 = vld [vmem:[%s1656_s1 + $0x98] sm:$0xff]   ;;  %v1186_v23 = vld [vmem:[%s1656_s1 + $0x90] sm:$0xff]  }
   0x9   :  { %1082 = vmatpush3.bf16.msra.mxu1 %v1170_v7  ;;  %v1187_v24 = vld [vmem:[%s1656_s1 + $0x48] sm:$0xff]   ;;  %v1191_v28 = vld [vmem:[%s1656_s1 + $0x40] sm:$0xff]   ;;  %v1198_v34 = vld [vmem:[%s1656_s1 + $0x178] sm:$0xff]  }
   0xa   :  { %1083 = vmatprep.subr.bf16.mxu1 %v1173_v10  ;;  %v1188_v25 = vld [vmem:[%s1656_s1 + $0x8] sm:$0xff]   ;;  %v1192_v29 = vld [vmem:[%s1656_s1] sm:$0xff]   ;;  %v1199_v35 = vld [vmem:[%s1656_s1 + $0x138] sm:$0xff]  }
   0xb   :  { %1056 = vmatpush3.bf16.msra.mxu0 %v1172_v9  ;;  %v1189_v26 = vld [vmem:[%s1656_s1 + $0xc8] sm:$0xff]   ;;  %v1193_v30 = vld [vmem:[%s1656_s1 + $0xc0] sm:$0xff]   ;;  %v1203_v38 = vld [vmem:[%s1656_s1 + $0x1f8] sm:$0xff]  }
   0xc   :  { %1057 = vmatprep.subr.bf16.mxu0 %v1175_v12  ;;  %v1190_v27 = vld [vmem:[%s1656_s1 + $0x88] sm:$0xff]   ;;  %v1197_v33 = vld [vmem:[%s1656_s1 + $0x80] sm:$0xff]   ;;  %v1204_v39 = vld [vmem:[%s1656_s1 + $0x1b8] sm:$0xff]  }
   0xd   :  { %1084 = vmatpush3.bf16.msra.mxu1 %v1174_v11  ;;  %v1194_v31 = vld [vmem:[%s1657_s0] ss:$8 sps:$4 sm:$0xff]   ;;  %v1196_v32 = vld [vmem:[%s1657_s0 + $0x4] ss:$8 sps:$4 sm:$0xff]   ;;  %v1205_v40 = vld [vmem:[%s1656_s1 + $0x170] sm:$0xff]  }
   0xe   :  { %1085 = vmatprep.subr.bf16.mxu1 %v1177_v14  ;;  %310 = vmatprep.mubr.bf16.mxu0 %v1196_v32  ;;  %v1200_v36 = vld [vmem:[%s1657_s0 + $0x20] ss:$8 sps:$4 sm:$0xff]   ;;  %v1202_v37 = vld [vmem:[%s1657_s0 + $0x24] ss:$8 sps:$4 sm:$0xff]   ;;  %v1206_v41 = vld [vmem:[%s1656_s1 + $0x130] sm:$0xff]  }
   0xf   :  { %1058 = vmatpush3.bf16.msra.mxu0 %v1176_v13  ;;  %475 = vmatprep.mubr.bf16.mxu1 %v1202_v37  ;;  %v1207_v42 = vld [vmem:[%s1656_s1 + $0x1f0] sm:$0xff]   ;;  %v1212_v46 = vld [vmem:[%s1656_s1 + $0x168] sm:$0xff]   ;;  %v1216_v50 = vld [vmem:[%s1656_s1 + $0x160] sm:$0xff]  }
  0x10   :  { %1059 = vmatprep.subr.bf16.mxu0 %v1179_v16  ;;  %v1208_v43 = vld [vmem:[%s1657_s0 + $0x14] ss:$8 sps:$4 sm:$0xff]   ;;  %v1211_v45 = vld [vmem:[%s1657_s0 + $0x10] ss:$8 sps:$4 sm:$0xff]   ;;  %v1213_v47 = vld [vmem:[%s1656_s1 + $0x128] sm:$0xff]  }
  0x11   :  { %1086 = vmatpush3.bf16.msra.mxu1 %v1178_v15  ;;  %v1210_v44 = vld [vmem:[%s1656_s1 + $0x1b0] sm:$0xff]   ;;  %v1214_v48 = vld [vmem:[%s1656_s1 + $0x1e8] sm:$0xff]   ;;  %v1217_v51 = vld [vmem:[%s1656_s1 + $0x120] sm:$0xff]  }
  0x12   :  { %1087 = vmatprep.subr.bf16.mxu1 %v1181_v18  ;;  %v1215_v49 = vld [vmem:[%s1656_s1 + $0x1a8] sm:$0xff]   ;;  %v1218_v52 = vld [vmem:[%s1656_s1 + $0x1e0] sm:$0xff]   ;;  %v1219_v53 = vld [vmem:[%s1657_s0 + $0x34] ss:$8 sps:$4 sm:$0xff]  }
  0x13   :  { %1060 = vmatpush3.bf16.msra.mxu0 %v1180_v17  ;;  %v1221_v54 = vld [vmem:[%s1656_s1 + $0x1a0] sm:$0xff]   ;;  %v1222_v55 = vld [vmem:[%s1657_s0 + $0x30] ss:$8 sps:$4 sm:$0xff]   ;;  %v1231_v0 = vld [vmem:[%s1656_s1 + $0x148] sm:$0xff]  }
  0x14   :  { %1061 = vmatprep.subr.bf16.mxu0 %v1183_v20  ;;  %v1223_v56 = vld [vmem:[%s1656_s1 + $0x158] sm:$0xff]   ;;  %v1227_v60 = vld [vmem:[%s1656_s1 + $0x150] sm:$0xff]   ;;  %v1232_v1 = vld [vmem:[%s1656_s1 + $0x108] sm:$0xff]  }
  0x15   :  { %1088 = vmatpush3.bf16.msra.mxu1 %v1182_v19  ;;  %v1224_v57 = vld [vmem:[%s1656_s1 + $0x118] sm:$0xff]   ;;  %v1228_v61 = vld [vmem:[%s1656_s1 + $0x110] sm:$0xff]   ;;  %v1233_v2 = vld [vmem:[%s1656_s1 + $0x1c8] sm:$0xff]  }
  0x16   :  { %1089 = vmatprep.subr.bf16.mxu1 %v1185_v22  ;;  %v1225_v58 = vld [vmem:[%s1656_s1 + $0x1d8] sm:$0xff]   ;;  %v1229_v62 = vld [vmem:[%s1656_s1 + $0x1d0] sm:$0xff]   ;;  %v1234_v3 = vld [vmem:[%s1656_s1 + $0x188] sm:$0xff]  }
  0x17   :  { %1062 = vmatpush3.bf16.msra.mxu0 %v1184_v21  ;;  %v1226_v59 = vld [vmem:[%s1656_s1 + $0x198] sm:$0xff]   ;;  %v1230_v63 = vld [vmem:[%s1656_s1 + $0x190] sm:$0xff]   ;;  %v1235_v4 = vld [vmem:[%s1656_s1 + $0x140] sm:$0xff]  }
  0x18   :  { %1063 = vmatprep.subr.bf16.mxu0 %v1187_v24  ;;  %v1236_v5 = vld [vmem:[%s1656_s1 + $0x100] sm:$0xff]   ;;  %v1245_v12 = vld [vmem:[%s1657_s0 + $0x54] ss:$8 sps:$4 sm:$0xff]   ;;  %v1247_v14 = vld [vmem:[%s1657_s0 + $0x50] ss:$8 sps:$4 sm:$0xff]  }
  0x19   :  { %1090 = vmatpush3.bf16.msra.mxu1 %v1186_v23  ;;  %v1237_v6 = vld [vmem:[%s1656_s1 + $0x1c0] sm:$0xff]   ;;  %v1248_v13 = vld [vmem:[%s1657_s0 + $0x74] ss:$8 sps:$4 sm:$0xff]   ;;  %v1250_v15 = vld [vmem:[%s1657_s0 + $0x70] ss:$8 sps:$4 sm:$0xff]  }
  0x1a   :  { %1091 = vmatprep.subr.bf16.mxu1 %v1189_v26  ;;  %v1238_v7 = vld [vmem:[%s1657_s0 + $0x40] ss:$8 sps:$4 sm:$0xff]   ;;  %v1240_v8 = vld [vmem:[%s1657_s0 + $0x44] ss:$8 sps:$4 sm:$0xff]  }
  0x1b   :  { %1064 = vmatpush3.bf16.msra.mxu0 %v1188_v25  ;;  %v1241_v9 = vld [vmem:[%s1656_s1 + $0x180] sm:$0xff]  }
  0x1c   :  { %1065 = vmatprep.subr.bf16.mxu0 %v1191_v28  ;;  %v1242_v10 = vld [vmem:[%s1657_s0 + $0x60] ss:$8 sps:$4 sm:$0xff]   ;;  %v1244_v11 = vld [vmem:[%s1657_s0 + $0x64] ss:$8 sps:$4 sm:$0xff]  }
  0x1d   :  { %1092 = vmatpush3.bf16.msra.mxu1 %v1190_v27 }
  0x1e   :  { %1093 = vmatprep.subr.bf16.mxu1 %v1193_v30 }
  0x1f   :  { %1066 = vmatpush3.bf16.msra.mxu0 %v1192_v29 }
  0x20   :  { %1107 = vmatprep.subr.bf16.mxu0 %v1198_v34 }
  0x21   :  { %1094 = vmatpush3.bf16.msra.mxu1 %v1197_v33 }
  0x22   :  { %311 = vmatmul.mubr.bf16.vlgmr.msra.gmra.mxu0 %v1194_v31  ;;  %1135 = vmatprep.subr.bf16.mxu1 %v1203_v38 }
  0x23   :  { %1108 = vmatpush3.bf16.msra.mxu0 %v1199_v35  ;;  %318 = vmatprep.mubr.bf16.mxu0 %v1208_v43 }
  0x24   :  { %476 = vmatmul.mubr.bf16.vlgmr.msra.gmra.mxu1 %v1200_v36  ;;  %1109 = vmatprep.subr.bf16.mxu0 %v1205_v40 }
  0x25   :  { %1136 = vmatpush3.bf16.msra.mxu1 %v1204_v39  ;;  %483 = vmatprep.mubr.bf16.mxu1 %v1219_v53 }
  0x26   :  { %1137 = vmatprep.subr.bf16.mxu1 %v1207_v42 }
  0x27   :  { %1110 = vmatpush3.bf16.msra.mxu0 %v1206_v41 }
  0x28   :  { %1111 = vmatprep.subr.bf16.mxu0 %v1212_v46 }
  0x29   :  { %1138 = vmatpush3.bf16.msra.mxu1 %v1210_v44 }
  0x2a   :  { %319 = vmatmul.mubr.bf16.gmra.mxu0 %v1211_v45  ;;  %1139 = vmatprep.subr.bf16.mxu1 %v1214_v48 }
  0x2b   :  { %1112 = vmatpush3.bf16.msra.mxu0 %v1213_v47  ;;  %640 = vmatprep.mubr.bf16.mxu0 %v1240_v8 }
  0x2c   :  { %1113 = vmatprep.subr.bf16.mxu0 %v1216_v50  ;;  %484 = vmatmul.mubr.bf16.gmra.mxu1 %v1222_v55 }
  0x2d   :  { %1140 = vmatpush3.bf16.msra.mxu1 %v1215_v49  ;;  %805 = vmatprep.mubr.bf16.mxu1 %v1244_v11 }
  0x2e   :  { %1141 = vmatprep.subr.bf16.mxu1 %v1218_v52 }
  0x2f   :  { %1114 = vmatpush3.bf16.msra.mxu0 %v1217_v51 }
  0x30   :  { %1115 = vmatprep.subr.bf16.mxu0 %v1223_v56 }
  0x31   :  { %1142 = vmatpush3.bf16.msra.mxu1 %v1221_v54 }
  0x32   :  { %1143 = vmatprep.subr.bf16.mxu1 %v1225_v58 }
  0x33   :  { %1116 = vmatpush3.bf16.msra.mxu0 %v1224_v57 }
  0x34   :  { %1117 = vmatprep.subr.bf16.mxu0 %v1227_v60 }
  0x35   :  { %1144 = vmatpush3.bf16.msra.mxu1 %v1226_v59 }
  0x36   :  { %1145 = vmatprep.subr.bf16.mxu1 %v1229_v62 }
  0x37   :  { %1118 = vmatpush3.bf16.msra.mxu0 %v1228_v61 }
  0x38   :  { %1119 = vmatprep.subr.bf16.mxu0 %v1231_v0 }
  0x39   :  { %1146 = vmatpush3.bf16.msra.mxu1 %v1230_v63 }
  0x3a   :  { %1147 = vmatprep.subr.bf16.mxu1 %v1233_v2 }
  0x3b   :  { %1120 = vmatpush3.bf16.msra.mxu0 %v1232_v1 }
  0x3c   :  { %1121 = vmatprep.subr.bf16.mxu0 %v1235_v4 }
  0x3d   :  { %1148 = vmatpush3.bf16.msra.mxu1 %v1234_v3 }
  0x3e   :  { %1149 = vmatprep.subr.bf16.mxu1 %v1237_v6 }
  0x3f   :  { %1122 = vmatpush3.bf16.msra.mxu0 %v1236_v5 }
  0x41   :  { %1150 = vmatpush3.bf16.msra.mxu1 %v1241_v9 }
  0x42   :  { %641 = vmatmul.mubr.bf16.vlgmr.msra.gmra.mxu0 %v1238_v7 }
  0x43   :  { %648 = vmatprep.mubr.bf16.mxu0 %v1245_v12 }
  0x44   :  { %806 = vmatmul.mubr.bf16.vlgmr.msra.gmra.mxu1 %v1242_v10 }
  0x45   :  { %813 = vmatprep.mubr.bf16.mxu1 %v1248_v13 }
  0x4a   :  { %649 = vmatmul.mubr.bf16.gmra.mxu0 %v1247_v14 }
  0x4c   :  { %814 = vmatmul.mubr.bf16.gmra.mxu1 %v1250_v15 }
  0xe2   :  { %v1067_v16 = vpop.f32.mrf.mxu0 }
  0xe4   :  { %v1068_v17 = vpop.f32.mrf.mxu0  ;;  %v1095_v21 = vpop.f32.mrf.mxu1 }
  0xe5   :  { %v1520_v28 = vadd.f32 %v1068_v17, %v1067_v16 }
  0xe6   :  { %v1070_v18 = vpop.f32.mrf.mxu0  ;;  %v1096_v23 = vpop.f32.mrf.mxu1 }
  0xe7   :  { %v843_v34 = vmul.f32 %v1520_v28, %v1520_v28  ;;  %v1537_v41 = vadd.f32 %v1096_v23, %v1095_v21 }
  0xe8   :  { %v1071_v19 = vpop.f32.mrf.mxu0  ;;  %v1098_v25 = vpop.f32.mrf.mxu1 }
  0xe9   :  { %v1518_v26 = vadd.f32 %v1071_v19, %v1070_v18  ;;  %v847_v46 = vmul.f32 %v1537_v41, %v1537_v41 }
  0xea   :  { %v1073_v20 = vpop.f32.mrf.mxu0  ;;  %v1099_v30 = vpop.f32.mrf.mxu1 }
  0xeb   :  { %v844_v31 = vmul.f32 %v1518_v26, %v1518_v26  ;;  %v822_v35 = vadd.f32 %v1518_v26, %v1520_v28  ;;  %v1542_v47 = vadd.f32 %v1099_v30, %v1098_v25 }
  0xec   :  { %v1074_v22 = vpop.f32.mrf.mxu0  ;;  %v1101_v33 = vpop.f32.mrf.mxu1 }
  0xed   :  { %v1522_v29 = vadd.f32 %v1074_v22, %v1073_v20  ;;  %v859_v37 = vadd.f32 %v844_v31, %v843_v34  ;;  %v848_v53 = vmul.f32 %v1542_v47, %v1542_v47 }
  0xee   :  { %v1076_v24 = vpop.f32.mrf.mxu0  ;;  %v1102_v40 = vpop.f32.mrf.mxu1 }
  0xef   :  { %v845_v36 = vmul.f32 %v1522_v29, %v1522_v29  ;;  %v823_v38 = vadd.f32 %v1522_v29, %v822_v35  ;;  %v1545_v50 = vadd.f32 %v1102_v40, %v1101_v33 }
  0xf0   :  { %v1077_v27 = vpop.f32.mrf.mxu0  ;;  %v1104_v45 = vpop.f32.mrf.mxu1 }
  0xf1   :  { %v1526_v32 = vadd.f32 %v1077_v27, %v1076_v24  ;;  %v860_v42 = vadd.f32 %v859_v37, %v845_v36  ;;  %v849_v56 = vmul.f32 %v1545_v50, %v1545_v50 }
  0xf2   :  { %v1105_v51 = vpop.f32.mrf.mxu1 }
  0xf3   :  { %v846_v39 = vmul.f32 %v1526_v32, %v1526_v32  ;;  %v824_v43 = vadd.f32 %v1526_v32, %v823_v38  ;;  %v1552_v58 = vadd.f32 %v1105_v51, %v1104_v45 }
  0xf5   :  { %v861_v44 = vadd.f32 %v860_v42, %v846_v39  ;;  %v825_v48 = vadd.f32 %v1537_v41, %v824_v43  ;;  %v850_v2 = vmul.f32 %v1552_v58, %v1552_v58 }
  0xf7   :  { %v862_v49 = vadd.f32 %v861_v44, %v847_v46  ;;  %v826_v54 = vadd.f32 %v1542_v47, %v825_v48 }
  0xf9   :  { %v863_v57 = vadd.f32 %v862_v49, %v848_v53  ;;  %v827_v61 = vadd.f32 %v1545_v50, %v826_v54 }
  0xfb   :  { %v864_v1 = vadd.f32 %v863_v57, %v849_v56  ;;  %v828_v6 = vadd.f32 %v1552_v58, %v827_v61 }
  0xfd   :  { %v865_v10 = vadd.f32 %v864_v1, %v850_v2 }
 0x102   :  { %v1123_v52 = vpop.f32.mrf.mxu0 }
 0x104   :  { %v1124_v55 = vpop.f32.mrf.mxu0  ;;  %v1151_v59 = vpop.f32.mrf.mxu1 }
 0x105   :  { %v1555_v62 = vadd.f32 %v1124_v55, %v1123_v52 }
 0x106   :  { %v1126_v60 = vpop.f32.mrf.mxu0  ;;  %v1152_v63 = vpop.f32.mrf.mxu1 }
 0x107   :  { %v851_v7 = vmul.f32 %v1555_v62, %v1555_v62  ;;  %v829_v11 = vadd.f32 %v1555_v62, %v828_v6  ;;  %v1572_v21 = vadd.f32 %v1152_v63, %v1151_v59 }
 0x108   :  { %v1127_v0 = vpop.f32.mrf.mxu0  ;;  %v1154_v4 = vpop.f32.mrf.mxu1 }
 0x109   :  { %v1559_v3 = vadd.f32 %v1127_v0, %v1126_v60  ;;  %v866_v16 = vadd.f32 %v865_v10, %v851_v7  ;;  %v855_v35 = vmul.f32 %v1572_v21, %v1572_v21 }
 0x10a   :  { %v1129_v5 = vpop.f32.mrf.mxu0  ;;  %v1155_v8 = vpop.f32.mrf.mxu1 }
 0x10b   :  { %v852_v12 = vmul.f32 %v1559_v3, %v1559_v3  ;;  %v830_v17 = vadd.f32 %v1559_v3, %v829_v11  ;;  %v1577_v27 = vadd.f32 %v1155_v8, %v1154_v4  ;;  %v884_v11 = vld [vmem:[%s1658_s2] sm:$0x1] }
 0x10c   :  { %v1130_v9 = vpop.f32.mrf.mxu0  ;;  %v1157_v14 = vpop.f32.mrf.mxu1 }
 0x10d   :  { %v1567_v13 = vadd.f32 %v1130_v9, %v1129_v5  ;;  %v867_v22 = vadd.f32 %v866_v16, %v852_v12  ;;  %v856_v39 = vmul.f32 %v1577_v27, %v1577_v27  ;;  %v892_v9 = vlaneseq  ;;  %v888_v16 = vld [vmem:[%s1659_s3] sm:$0x1] }
 0x10e   :  { %v1132_v15 = vpop.f32.mrf.mxu0  ;;  %v1158_v19 = vpop.f32.mrf.mxu1 }
 0x10f   :  { %v853_v18 = vmul.f32 %v1567_v13, %v1567_v13  ;;  %v831_v23 = vadd.f32 %v1567_v13, %v830_v17  ;;  %v1159_v36 = vadd.f32 %v1158_v19, %v1157_v14  ;;  %v893_v10 = vshrl.u32 %v892_v9, 7 }
 0x110   :  { %v1133_v20 = vpop.f32.mrf.mxu0  ;;  %v1160_v25 = vpop.f32.mrf.mxu1 }
 0x111   :  { %v1575_v24 = vadd.f32 %v1133_v20, %v1132_v15  ;;  %v868_v30 = vadd.f32 %v867_v22, %v853_v18  ;;  %v857_v44 = vmul.f32 %v1159_v36, %v1159_v36  ;;  %v894_v12 = vsub.s32 0, %v893_v10 }
 0x112   :  { %v1161_v34 = vpop.f32.mrf.mxu1 }
 0x113   :  { %v832_v31 = vadd.f32 %v1575_v24, %v831_v23  ;;  %v854_v33 = vmul.f32 %v1575_v24, %v1575_v24  ;;  %v1162_v42 = vadd.f32 %v1161_v34, %v1160_v25 }
 0x115   :  { %v833_v37 = vadd.f32 %v1572_v21, %v832_v31  ;;  %v869_v38 = vadd.f32 %v868_v30, %v854_v33  ;;  %v858_v49 = vmul.f32 %v1162_v42, %v1162_v42 }
 0x117   :  { %v870_v40 = vadd.f32 %v869_v38, %v855_v35  ;;  %v834_v43 = vadd.f32 %v1577_v27, %v833_v37 }
 0x119   :  { %v835_v45 = vadd.f32 %v1159_v36, %v834_v43  ;;  %v871_v46 = vadd.f32 %v870_v40, %v856_v39 }
 0x11b   :  { %v836_v48 = vadd.f32 %v1162_v42, %v835_v45  ;;  %v872_v51 = vadd.f32 %v871_v46, %v857_v44 }
 0x11d   :  { %v837_v52 = vrot.slane %v836_v48, 4  ;;  %v873_v53 = vadd.f32 %v872_v51, %v858_v49 }
 0x11f   :  { %v838_v54 = vadd.f32 %v837_v52, %v836_v48  ;;  %v874_v55 = vrot.slane %v873_v53, 4 }
 0x121   :  { %v839_v56 = vrot.slane %v838_v54, 2  ;;  %v875_v57 = vadd.f32 %v874_v55, %v873_v53 }
 0x123   :  { %v840_v59 = vadd.f32 %v839_v56, %v838_v54  ;;  %v876_v60 = vrot.slane %v875_v57, 2 }
 0x125   :  { %v841_v61 = vrot.slane %v840_v59, 1  ;;  %v877_v63 = vadd.f32 %v876_v60, %v875_v57 }
 0x127   :  { %v842_v0 = vadd.f32 %v841_v61, %v840_v59  ;;  %v878_v1 = vrot.slane %v877_v63, 1 }
 0x129   :  { %v879_v2 = vadd.f32 %v878_v1, %v877_v63  ;;  %v880_v4 = vmul.f32 0.0078125, %v842_v0 }
 0x12b   :  { %v881_v5 = vmul.f32 0.0078125, %v879_v2  ;;  %v882_v6 = vmul.f32 %v880_v4, %v880_v4 }
 0x12d   :  { %v883_v7 = vsub.f32 %v881_v5, %v882_v6 }
 0x12f   :  { %v885_v8 = vadd.f32 1e-05, %v883_v7 }
 0x131   :  { %1251 = vrsqrt.f32 %v885_v8 }
 0x13e   :  { %v1252_v14 = vpop.eup %1251 }
 0x13f   :  { %v887_v15 = vmul.f32 %v1252_v14, %v884_v11 }
 0x141   :  { %v889_v17 = vmul.f32 %v887_v15, %v880_v4  ;;  %v895_v18 = vrot.slane %v887_v15, %v894_v12 }
 0x143   :  { %v890_v19 = vsub.f32 %v888_v16, %v889_v17  ;;  %v897_v20 = vmul.f32 %v1520_v28, %v895_v18  ;;  %v898_v22 = vmul.f32 %v1518_v26, %v895_v18  ;;  %v899_v23 = vmul.f32 %v1522_v29, %v895_v18 }
 0x144   :  { %v900_v25 = vmul.f32 %v1526_v32, %v895_v18  ;;  %v901_v30 = vmul.f32 %v1537_v41, %v895_v18  ;;  %v902_v31 = vmul.f32 %v1542_v47, %v895_v18  ;;  %v903_v33 = vmul.f32 %v1545_v50, %v895_v18 }
 0x145   :  { %v904_v34 = vmul.f32 %v1552_v58, %v895_v18  ;;  %v905_v35 = vmul.f32 %v1555_v62, %v895_v18  ;;  %v906_v37 = vmul.f32 %v1559_v3, %v895_v18  ;;  %v907_v28 = vmul.f32 %v1567_v13, %v895_v18 }
 0x146   :  { %v908_v26 = vmul.f32 %v1575_v24, %v895_v18  ;;  %v917_v38 = vrot.slane %v890_v19, %v894_v12  ;;  %v909_v29 = vmul.f32 %v1572_v21, %v895_v18  ;;  %v910_v32 = vmul.f32 %v1577_v27, %v895_v18 }
 0x147   :  { %v911_v41 = vmul.f32 %v1159_v36, %v895_v18  ;;  %v912_v39 = vmul.f32 %v1162_v42, %v895_v18 }
 0x148   :  { %v919_v47 = vadd.f32 %v917_v38, %v897_v20  ;;  %v920_v40 = vadd.f32 %v917_v38, %v898_v22  ;;  %v921_v50 = vadd.f32 %v917_v38, %v899_v23  ;;  %v922_v43 = vadd.f32 %v917_v38, %v900_v25 }
 0x149   :  { %v923_v58 = vadd.f32 %v917_v38, %v901_v30  ;;  %v924_v44 = vadd.f32 %v917_v38, %v902_v31  ;;  %v925_v62 = vadd.f32 %v917_v38, %v903_v33  ;;  %v926_v45 = vadd.f32 %v917_v38, %v904_v34 }
 0x14a   :  { %v927_v3 = vadd.f32 %v917_v38, %v905_v35  ;;  %v928_v46 = vadd.f32 %v917_v38, %v906_v37  ;;  %v929_v13 = vadd.f32 %v917_v38, %v907_v28  ;;  %v930_v48 = vadd.f32 %v917_v38, %v908_v26 }
 0x14b   :  { %v931_v24 = vadd.f32 %v917_v38, %v909_v29  ;;  %v932_v49 = vadd.f32 %v917_v38, %v910_v32  ;;  %v933_v51 = vadd.f32 %v917_v38, %v911_v41  ;;  %v934_v21 = vadd.f32 %v917_v38, %v912_v39 }
 0x14c   :  { %v935_v52 = vmax.f32 %v919_v47, 0.0  ;;  %v936_v27 = vmax.f32 %v920_v40, 0.0  ;;  %v937_v36 = vmax.f32 %v921_v50, 0.0  ;;  %v938_v42 = vmax.f32 %v922_v43, 0.0 }
 0x14d   :  { %v939_v53 = vmax.f32 %v923_v58, 0.0  ;;  %v940_v54 = vmax.f32 %v924_v44, 0.0  ;;  %v941_v55 = vmax.f32 %v925_v62, 0.0  ;;  %v942_v56 = vmax.f32 %v926_v45, 0.0 }
 0x14e   :  { %v943_v57 = vmax.f32 %v927_v3, 0.0  ;;  %v944_v59 = vmax.f32 %v928_v46, 0.0  ;;  %v945_v60 = vmax.f32 %v929_v13, 0.0  ;;  %v946_v61 = vmax.f32 %v930_v48, 0.0  ;;  %951 = vst [vmem:[%s1660_s4] sm:$0xff] %v935_v52  ;;  %952 = vst [vmem:[%s1660_s4 + $0x8] sm:$0xff] %v936_v27 }
 0x14f   :  { %953 = vst [vmem:[%s1660_s4 + $0x10] sm:$0xff] %v937_v36  ;;  %954 = vst [vmem:[%s1660_s4 + $0x18] sm:$0xff] %v938_v42  ;;  %v947_v63 = vmax.f32 %v931_v24, 0.0  ;;  %v948_v0 = vmax.f32 %v932_v49, 0.0  ;;  %v949_v1 = vmax.f32 %v933_v51, 0.0  ;;  %v950_v2 = vmax.f32 %v934_v21, 0.0 }
 0x150   :  { %955 = vst [vmem:[%s1660_s4 + $0x20] sm:$0xff] %v939_v53  ;;  %956 = vst [vmem:[%s1660_s4 + $0x28] sm:$0xff] %v940_v54 }
 0x151   :  { %957 = vst [vmem:[%s1660_s4 + $0x30] sm:$0xff] %v941_v55  ;;  %958 = vst [vmem:[%s1660_s4 + $0x38] sm:$0xff] %v942_v56 }
 0x152   :  { %959 = vst [vmem:[%s1660_s4 + $0x40] sm:$0xff] %v943_v57  ;;  %960 = vst [vmem:[%s1660_s4 + $0x48] sm:$0xff] %v944_v59 }
 0x153   :  { %961 = vst [vmem:[%s1660_s4 + $0x50] sm:$0xff] %v945_v60  ;;  %962 = vst [vmem:[%s1660_s4 + $0x58] sm:$0xff] %v946_v61 }
 0x154   :  { %963 = vst [vmem:[%s1660_s4 + $0x60] sm:$0xff] %v947_v63  ;;  %964 = vst [vmem:[%s1660_s4 + $0x68] sm:$0xff] %v948_v0 }
 0x155   :  { %965 = vst [vmem:[%s1660_s4 + $0x70] sm:$0xff] %v949_v1  ;;  %966 = vst [vmem:[%s1660_s4 + $0x78] sm:$0xff] %v950_v2 }

// kernel: generator_forward.6
= control target key start
LH: loop header
LB: loop body
LE: loop exit
PB: predicated region body
PF: predicated region fallthrough
CT: control target
= control target key end

     0   :  { %s3053_s1 = inlined_call_operand.vmem [shape: bf16[4,128,128], index: 1, kind: input, shape index: {}]   ;;  %s3054_s0 = inlined_call_operand.vmem [shape: bf16[4,128,128], index: 0, kind: input, shape index: {}]   ;;  %s3055_s2 = inlined_call_operand.vmem [shape: f32[1,128], index: 2, kind: input, shape index: {}]   ;;  %s3056_s3 = inlined_call_operand.vmem [shape: f32[1,128], index: 3, kind: input, shape index: {}]   ;;  %s3057_s4 = inlined_call_operand.vmem [shape: f32[4,128,128], index: 4, kind: output, shape index: {}]  }
   0x1   :  { %v1659_v0 = vld [vmem:[%s3053_s1 + $0x38] sm:$0xff]   ;;  %v1660_v1 = vld [vmem:[%s3053_s1 + $0x30] sm:$0xff]   ;;  %v1661_v2 = vld [vmem:[%s3053_s1 + $0x28] sm:$0xff]  }
   0x2   :  { %1531 = vmatprep.subr.bf16.mxu0 %v1659_v0  ;;  %v1666_v3 = vld [vmem:[%s3053_s1 + $0x78] sm:$0xff]   ;;  %v1662_v4 = vld [vmem:[%s3053_s1 + $0x20] sm:$0xff]   ;;  %v1668_v5 = vld [vmem:[%s3053_s1 + $0x70] sm:$0xff]  }
   0x3   :  { %1532 = vmatpush3.bf16.msra.mxu0 %v1659_v0  ;;  %1563 = vmatprep.subr.bf16.mxu1 %v1666_v3  ;;  %v1669_v6 = vld [vmem:[%s3054_s0] sm:$0xff]   ;;  %v1663_v7 = vld [vmem:[%s3053_s1 + $0x18] sm:$0xff]   ;;  %v1671_v8 = vld [vmem:[%s3053_s1 + $0x68] sm:$0xff]  }
   0x4   :  { %1533 = vmatprep.subr.bf16.mxu0 %v1660_v1  ;;  %1564 = vmatpush3.bf16.msra.mxu1 %v1666_v3  ;;  %v1672_v9 = vld [vmem:[%s3053_s1 + $0x60] sm:$0xff]   ;;  %v1664_v10 = vld [vmem:[%s3053_s1 + $0x10] sm:$0xff]   ;;  %v1675_v11 = vld [vmem:[%s3053_s1 + $0x58] sm:$0xff]  }
   0x5   :  { %1565 = vmatprep.subr.bf16.mxu1 %v1668_v5  ;;  %1547 = vmatprep.mubr.bf16.mxu0 %v1669_v6  ;;  %v1665_v12 = vld [vmem:[%s3053_s1 + $0x8] sm:$0xff]   ;;  %v1667_v13 = vld [vmem:[%s3053_s1] sm:$0xff]   ;;  %v1676_v14 = vld [vmem:[%s3053_s1 + $0x50] sm:$0xff]  }
   0x6   :  { %v1683_v15 = vld [vmem:[%s3054_s0 + $0x40] sm:$0xff]   ;;  %v1679_v16 = vld [vmem:[%s3053_s1 + $0x48] sm:$0xff]   ;;  %v1685_v17 = vld [vmem:[%s3053_s1 + $0xb8] sm:$0xff]  }
   0x7   :  { %1534 = vmatpush3.bf16.msra.mxu0 %v1660_v1  ;;  %1579 = vmatprep.mubr.bf16.mxu1 %v1683_v15  ;;  %v1670_v18 = vld [vmem:[%s3054_s0 + $0x8] sm:$0xff]   ;;  %v1673_v19 = vld [vmem:[%s3054_s0 + $0x10] sm:$0xff]   ;;  %v1680_v20 = vld [vmem:[%s3053_s1 + $0x40] sm:$0xff]  }
   0x8   :  { %1535 = vmatprep.subr.bf16.mxu0 %v1661_v2  ;;  %1566 = vmatpush3.bf16.msra.mxu1 %v1668_v5  ;;  %v1686_v21 = vld [vmem:[%s3053_s1 + $0xb0] sm:$0xff]   ;;  %v1674_v22 = vld [vmem:[%s3054_s0 + $0x18] sm:$0xff]   ;;  %v1684_v23 = vld [vmem:[%s3054_s0 + $0x48] sm:$0xff]  }
   0x9   :  { %1567 = vmatprep.subr.bf16.mxu1 %v1671_v8  ;;  %v1689_v24 = vld [vmem:[%s3053_s1 + $0xa8] sm:$0xff]   ;;  %v1687_v25 = vld [vmem:[%s3054_s0 + $0x50] sm:$0xff]   ;;  %v1677_v26 = vld [vmem:[%s3054_s0 + $0x20] sm:$0xff]  }
   0xa   :  { %v1690_v27 = vld [vmem:[%s3053_s1 + $0xa0] sm:$0xff]   ;;  %v1701_v28 = vld [vmem:[%s3053_s1 + $0xf8] sm:$0xff]   ;;  %v1702_v29 = vld [vmem:[%s3053_s1 + $0xf0] sm:$0xff]  }
   0xb   :  { %1536 = vmatpush3.bf16.msra.mxu0 %v1661_v2  ;;  %v1678_v30 = vld [vmem:[%s3054_s0 + $0x28] sm:$0xff]   ;;  %v1688_v31 = vld [vmem:[%s3054_s0 + $0x58] sm:$0xff]   ;;  %v1691_v33 = vld [vmem:[%s3054_s0 + $0x60] sm:$0xff]  }
   0xc   :  { %1537 = vmatprep.subr.bf16.mxu0 %v1662_v4  ;;  %1568 = vmatpush3.bf16.msra.mxu1 %v1671_v8  ;;  %v1693_v32 = vld [vmem:[%s3053_s1 + $0x98] sm:$0xff]   ;;  %v1681_v34 = vld [vmem:[%s3054_s0 + $0x30] sm:$0xff]   ;;  %v1705_v35 = vld [vmem:[%s3053_s1 + $0xe8] sm:$0xff]  }
   0xd   :  { %1569 = vmatprep.subr.bf16.mxu1 %v1672_v9  ;;  %v1694_v36 = vld [vmem:[%s3053_s1 + $0x90] sm:$0xff]   ;;  %v1692_v37 = vld [vmem:[%s3054_s0 + $0x68] sm:$0xff]   ;;  %v1682_v38 = vld [vmem:[%s3054_s0 + $0x38] sm:$0xff]  }
   0xe   :  { %v1706_v39 = vld [vmem:[%s3053_s1 + $0xe0] sm:$0xff]   ;;  %v1697_v40 = vld [vmem:[%s3053_s1 + $0x88] sm:$0xff]   ;;  %v1695_v41 = vld [vmem:[%s3054_s0 + $0x70] sm:$0xff]  }
   0xf   :  { %1538 = vmatpush3.bf16.msra.mxu0 %v1662_v4  ;;  %v1699_v42 = vld [vmem:[%s3054_s0 + $0x80] sm:$0xff]   ;;  %v1709_v43 = vld [vmem:[%s3053_s1 + $0xd8] sm:$0xff]   ;;  %v1710_v45 = vld [vmem:[%s3053_s1 + $0xd0] sm:$0xff]  }
  0x10   :  { %1539 = vmatprep.subr.bf16.mxu0 %v1663_v7  ;;  %1570 = vmatpush3.bf16.msra.mxu1 %v1672_v9  ;;  %v1698_v44 = vld [vmem:[%s3053_s1 + $0x80] sm:$0xff]   ;;  %v1696_v46 = vld [vmem:[%s3054_s0 + $0x78] sm:$0xff]   ;;  %v1700_v48 = vld [vmem:[%s3054_s0 + $0x88] sm:$0xff]  }
  0x11   :  { %1571 = vmatprep.subr.bf16.mxu1 %v1675_v11  ;;  %v1715_v47 = vld [vmem:[%s3054_s0 + $0xc0] sm:$0xff]   ;;  %v1703_v49 = vld [vmem:[%s3054_s0 + $0x90] sm:$0xff]   ;;  %v1713_v50 = vld [vmem:[%s3053_s1 + $0xc8] sm:$0xff]  }
  0x12   :  { %v1714_v51 = vld [vmem:[%s3053_s1 + $0xc0] sm:$0xff]   ;;  %v1704_v52 = vld [vmem:[%s3054_s0 + $0x98] sm:$0xff]   ;;  %v1716_v54 = vld [vmem:[%s3054_s0 + $0xc8] sm:$0xff]  }
  0x13   :  { %1540 = vmatpush3.bf16.msra.mxu0 %v1663_v7  ;;  %v1707_v53 = vld [vmem:[%s3054_s0 + $0xa0] sm:$0xff]   ;;  %v1717_v55 = vld [vmem:[%s3054_s0 + $0xd0] sm:$0xff]   ;;  %v1708_v56 = vld [vmem:[%s3054_s0 + $0xa8] sm:$0xff]  }
  0x14   :  { %1541 = vmatprep.subr.bf16.mxu0 %v1664_v10  ;;  %1572 = vmatpush3.bf16.msra.mxu1 %v1675_v11  ;;  %v1711_v57 = vld [vmem:[%s3054_s0 + $0xb0] sm:$0xff]   ;;  %v1718_v58 = vld [vmem:[%s3054_s0 + $0xd8] sm:$0xff]   ;;  %v1719_v59 = vld [vmem:[%s3054_s0 + $0xe0] sm:$0xff]  }
  0x15   :  { %1573 = vmatprep.subr.bf16.mxu1 %v1676_v14  ;;  %v1712_v60 = vld [vmem:[%s3054_s0 + $0xb8] sm:$0xff]   ;;  %v1720_v61 = vld [vmem:[%s3054_s0 + $0xe8] sm:$0xff]   ;;  %v1721_v62 = vld [vmem:[%s3054_s0 + $0xf0] sm:$0xff]  }
  0x16   :  { %v1722_v63 = vld [vmem:[%s3054_s0 + $0xf8] sm:$0xff]  }
  0x17   :  { %1542 = vmatpush3.bf16.msra.mxu0 %v1664_v10 }
  0x18   :  { %1543 = vmatprep.subr.bf16.mxu0 %v1665_v12  ;;  %1574 = vmatpush3.bf16.msra.mxu1 %v1676_v14 }
  0x19   :  { %1575 = vmatprep.subr.bf16.mxu1 %v1679_v16 }
  0x1b   :  { %1544 = vmatpush3.bf16.msra.mxu0 %v1665_v12 }
  0x1c   :  { %1545 = vmatprep.subr.bf16.mxu0 %v1667_v13  ;;  %1576 = vmatpush3.bf16.msra.mxu1 %v1679_v16 }
  0x1d   :  { %1577 = vmatprep.subr.bf16.mxu1 %v1680_v20 }
  0x1f   :  { %1546 = vmatpush3.bf16.msra.mxu0 %v1667_v13 }
  0x20   :  { %1595 = vmatprep.subr.bf16.mxu0 %v1685_v17  ;;  %1578 = vmatpush3.bf16.msra.mxu1 %v1680_v20 }
  0x21   :  { %1627 = vmatprep.subr.bf16.mxu1 %v1701_v28 }
  0x22   :  { %1548 = vmatmul.mubr.bf16.vlgmr.msra.gmra.mxu0 %v1670_v18 }
  0x23   :  { %1551 = vmatprep.mubr.bf16.mxu0 %v1673_v19  ;;  %1596 = vmatpush3.bf16.msra.mxu0 %v1685_v17 }
  0x24   :  { %1597 = vmatprep.subr.bf16.mxu0 %v1686_v21  ;;  %1580 = vmatmul.mubr.bf16.vlgmr.msra.gmra.mxu1 %v1684_v23 }
  0x25   :  { %1583 = vmatprep.mubr.bf16.mxu1 %v1687_v25  ;;  %1628 = vmatpush3.bf16.msra.mxu1 %v1701_v28 }
  0x26   :  { %1629 = vmatprep.subr.bf16.mxu1 %v1702_v29 }
  0x27   :  { %1598 = vmatpush3.bf16.msra.mxu0 %v1686_v21 }
  0x28   :  { %1599 = vmatprep.subr.bf16.mxu0 %v1689_v24 }
  0x29   :  { %1630 = vmatpush3.bf16.msra.mxu1 %v1702_v29 }
  0x2a   :  { %1552 = vmatmul.mubr.bf16.gmra.mxu0 %v1674_v22  ;;  %1631 = vmatprep.subr.bf16.mxu1 %v1705_v35 }
  0x2b   :  { %1555 = vmatprep.mubr.bf16.mxu0 %v1677_v26  ;;  %1600 = vmatpush3.bf16.msra.mxu0 %v1689_v24 }
  0x2c   :  { %1601 = vmatprep.subr.bf16.mxu0 %v1690_v27  ;;  %1584 = vmatmul.mubr.bf16.gmra.mxu1 %v1688_v31 }
  0x2d   :  { %1587 = vmatprep.mubr.bf16.mxu1 %v1691_v33  ;;  %1632 = vmatpush3.bf16.msra.mxu1 %v1705_v35 }
  0x2e   :  { %1633 = vmatprep.subr.bf16.mxu1 %v1706_v39 }
  0x2f   :  { %1602 = vmatpush3.bf16.msra.mxu0 %v1690_v27 }
  0x30   :  { %1603 = vmatprep.subr.bf16.mxu0 %v1693_v32 }
  0x31   :  { %1634 = vmatpush3.bf16.msra.mxu1 %v1706_v39 }
  0x32   :  { %1556 = vmatmul.mubr.bf16.gmra.mxu0 %v1678_v30  ;;  %1635 = vmatprep.subr.bf16.mxu1 %v1709_v43 }
  0x33   :  { %1559 = vmatprep.mubr.bf16.mxu0 %v1681_v34  ;;  %1604 = vmatpush3.bf16.msra.mxu0 %v1693_v32 }
  0x34   :  { %1605 = vmatprep.subr.bf16.mxu0 %v1694_v36  ;;  %1588 = vmatmul.mubr.bf16.gmra.mxu1 %v1692_v37 }
  0x35   :  { %1591 = vmatprep.mubr.bf16.mxu1 %v1695_v41  ;;  %1636 = vmatpush3.bf16.msra.mxu1 %v1709_v43 }
  0x36   :  { %1637 = vmatprep.subr.bf16.mxu1 %v1710_v45 }
  0x37   :  { %1606 = vmatpush3.bf16.msra.mxu0 %v1694_v36 }
  0x38   :  { %1607 = vmatprep.subr.bf16.mxu0 %v1697_v40 }
  0x39   :  { %1638 = vmatpush3.bf16.msra.mxu1 %v1710_v45 }
  0x3a   :  { %1560 = vmatmul.mubr.bf16.gmra.mxu0 %v1682_v38  ;;  %1639 = vmatprep.subr.bf16.mxu1 %v1713_v50 }
  0x3b   :  { %1611 = vmatprep.mubr.bf16.mxu0 %v1699_v42  ;;  %1608 = vmatpush3.bf16.msra.mxu0 %v1697_v40 }
  0x3c   :  { %1609 = vmatprep.subr.bf16.mxu0 %v1698_v44  ;;  %1592 = vmatmul.mubr.bf16.gmra.mxu1 %v1696_v46 }
  0x3d   :  { %1643 = vmatprep.mubr.bf16.mxu1 %v1715_v47  ;;  %1640 = vmatpush3.bf16.msra.mxu1 %v1713_v50 }
  0x3e   :  { %1641 = vmatprep.subr.bf16.mxu1 %v1714_v51 }
  0x3f   :  { %1610 = vmatpush3.bf16.msra.mxu0 %v1698_v44 }
  0x41   :  { %1642 = vmatpush3.bf16.msra.mxu1 %v1714_v51 }
  0x42   :  { %1612 = vmatmul.mubr.bf16.vlgmr.msra.gmra.mxu0 %v1700_v48 }
  0x43   :  { %1615 = vmatprep.mubr.bf16.mxu0 %v1703_v49 }
  0x44   :  { %1644 = vmatmul.mubr.bf16.vlgmr.msra.gmra.mxu1 %v1716_v54 }
  0x45   :  { %1647 = vmatprep.mubr.bf16.mxu1 %v1717_v55 }
  0x4a   :  { %1616 = vmatmul.mubr.bf16.gmra.mxu0 %v1704_v52 }
  0x4b   :  { %1619 = vmatprep.mubr.bf16.mxu0 %v1707_v53 }
  0x4c   :  { %1648 = vmatmul.mubr.bf16.gmra.mxu1 %v1718_v58 }
  0x4d   :  { %1651 = vmatprep.mubr.bf16.mxu1 %v1719_v59 }
  0x52   :  { %1620 = vmatmul.mubr.bf16.gmra.mxu0 %v1708_v56 }
  0x53   :  { %1623 = vmatprep.mubr.bf16.mxu0 %v1711_v57 }
  0x54   :  { %1652 = vmatmul.mubr.bf16.gmra.mxu1 %v1720_v61 }
  0x55   :  { %1655 = vmatprep.mubr.bf16.mxu1 %v1721_v62 }
  0x5a   :  { %1624 = vmatmul.mubr.bf16.gmra.mxu0 %v1712_v60 }
  0x5c   :  { %1656 = vmatmul.mubr.bf16.gmra.mxu1 %v1722_v63 }
  0xe2   :  { %v1942_v0 = vpop.f32.mrf.mxu0 }
  0xe3   :  { %v989_v9 = vmul.f32 %v1942_v0, %v1942_v0 }
  0xe4   :  { %v1944_v1 = vpop.f32.mrf.mxu0  ;;  %v1956_v7 = vpop.f32.mrf.mxu1 }
  0xe5   :  { %v987_v4 = vmul.f32 %v1944_v1, %v1944_v1 }
  0xe6   :  { %v1946_v2 = vpop.f32.mrf.mxu0  ;;  %v1963_v12 = vpop.f32.mrf.mxu1 }
  0xe7   :  { %v990_v14 = vmul.f32 %v1946_v2, %v1946_v2 }
  0xe8   :  { %v1948_v3 = vpop.f32.mrf.mxu0  ;;  %v1970_v17 = vpop.f32.mrf.mxu1 }
  0xe9   :  { %v918_v5 = vadd.f32 %v1948_v3, %v1944_v1  ;;  %v988_v6 = vmul.f32 %v1948_v3, %v1948_v3 }
  0xea   :  { %v1958_v8 = vpop.f32.mrf.mxu0  ;;  %v1977_v22 = vpop.f32.mrf.mxu1 }
  0xeb   :  { %v919_v10 = vadd.f32 %v1942_v0, %v918_v5  ;;  %v1051_v11 = vadd.f32 %v988_v6, %v987_v4  ;;  %v993_v29 = vmul.f32 %v1958_v8, %v1958_v8 }
  0xec   :  { %v1965_v13 = vpop.f32.mrf.mxu0  ;;  %v1986_v28 = vpop.f32.mrf.mxu1 }
  0xed   :  { %v1052_v15 = vadd.f32 %v1051_v11, %v989_v9  ;;  %v920_v16 = vadd.f32 %v1946_v2, %v919_v10  ;;  %v991_v20 = vmul.f32 %v1965_v13, %v1965_v13 }
  0xee   :  { %v1972_v18 = vpop.f32.mrf.mxu0  ;;  %v1998_v37 = vpop.f32.mrf.mxu1 }
  0xef   :  { %v921_v19 = vadd.f32 %v920_v16, %v1965_v13  ;;  %v1053_v21 = vadd.f32 %v1052_v15, %v990_v14  ;;  %v994_v33 = vmul.f32 %v1972_v18, %v1972_v18 }
  0xf0   :  { %v1979_v23 = vpop.f32.mrf.mxu0  ;;  %v2010_v46 = vpop.f32.mrf.mxu1 }
  0xf1   :  { %v1054_v24 = vadd.f32 %v1053_v21, %v991_v20  ;;  %v922_v25 = vadd.f32 %v921_v19, %v1979_v23  ;;  %v992_v26 = vmul.f32 %v1979_v23, %v1979_v23  ;;  %v1003_v19 = vmul.f32 %v1963_v12, %v1963_v12 }
  0xf2   :  { %v1984_v27 = vpop.f32.mrf.mxu0  ;;  %v2022_v55 = vpop.f32.mrf.mxu1 }
  0xf3   :  { %v923_v30 = vadd.f32 %v1958_v8, %v922_v25  ;;  %v1055_v31 = vadd.f32 %v1054_v24, %v992_v26  ;;  %v997_v47 = vmul.f32 %v1984_v27, %v1984_v27  ;;  %v1004_v25 = vmul.f32 %v1977_v22, %v1977_v22 }
  0xf4   :  { %v1991_v32 = vpop.f32.mrf.mxu0  ;;  %v2032_v63 = vpop.f32.mrf.mxu1 }
  0xf5   :  { %v1056_v34 = vadd.f32 %v1055_v31, %v993_v29  ;;  %v924_v35 = vadd.f32 %v1972_v18, %v923_v30  ;;  %v995_v39 = vmul.f32 %v1991_v32, %v1991_v32  ;;  %v1005_v31 = vmul.f32 %v1956_v7, %v1956_v7 }
  0xf6   :  { %v1996_v36 = vpop.f32.mrf.mxu0  ;;  %v2042_v15 = vpop.f32.mrf.mxu1 }
  0xf7   :  { %v925_v38 = vadd.f32 %v924_v35, %v1991_v32  ;;  %v1057_v40 = vadd.f32 %v1056_v34, %v994_v33  ;;  %v998_v51 = vmul.f32 %v1996_v36, %v1996_v36  ;;  %v1006_v35 = vmul.f32 %v1970_v17, %v1970_v17 }
  0xf8   :  { %v2003_v41 = vpop.f32.mrf.mxu0  ;;  %v2052_v29 = vpop.f32.mrf.mxu1 }
  0xf9   :  { %v1058_v42 = vadd.f32 %v1057_v40, %v995_v39  ;;  %v926_v43 = vadd.f32 %v925_v38, %v2003_v41  ;;  %v996_v44 = vmul.f32 %v2003_v41, %v2003_v41 }
  0xfa   :  { %v2008_v45 = vpop.f32.mrf.mxu0  ;;  %v2062_v40 = vpop.f32.mrf.mxu1 }
  0xfb   :  { %v927_v48 = vadd.f32 %v1984_v27, %v926_v43  ;;  %v1059_v49 = vadd.f32 %v1058_v42, %v996_v44  ;;  %v1001_v4 = vmul.f32 %v2008_v45, %v2008_v45  ;;  %v1007_v44 = vmul.f32 %v1998_v37, %v1998_v37 }
  0xfc   :  { %v2015_v50 = vpop.f32.mrf.mxu0 }
  0xfd   :  { %v1060_v52 = vadd.f32 %v1059_v49, %v997_v47  ;;  %v928_v53 = vadd.f32 %v1996_v36, %v927_v48  ;;  %v999_v57 = vmul.f32 %v2015_v50, %v2015_v50 }
  0xfe   :  { %v2020_v54 = vpop.f32.mrf.mxu0 }
  0xff   :  { %v929_v56 = vadd.f32 %v928_v53, %v2015_v50  ;;  %v1061_v58 = vadd.f32 %v1060_v52, %v998_v51  ;;  %v1002_v10 = vmul.f32 %v2020_v54, %v2020_v54  ;;  %v1008_v51 = vmul.f32 %v2022_v55, %v2022_v55  ;;  %v2072_v52 = vpop.f32.mrf.mxu1 }
 0x100   :  { %v2027_v59 = vpop.f32.mrf.mxu0 }
 0x101   :  { %v1062_v60 = vadd.f32 %v1061_v58, %v999_v57  ;;  %v930_v61 = vadd.f32 %v929_v56, %v2027_v59  ;;  %v1000_v62 = vmul.f32 %v2027_v59, %v2027_v59  ;;  %v1009_v56 = vmul.f32 %v1986_v28, %v1986_v28 }
 0x102   :  { %v2037_v9 = vpop.f32.mrf.mxu0 }
 0x103   :  { %v931_v5 = vadd.f32 %v2008_v45, %v930_v61  ;;  %v1063_v6 = vadd.f32 %v1062_v60, %v1000_v62  ;;  %v1010_v60 = vmul.f32 %v2010_v46, %v2010_v46 }
 0x104   :  { %v2044_v16 = vpop.f32.mrf.mxu0 }
 0x105   :  { %v1064_v11 = vadd.f32 %v1063_v6, %v1001_v4  ;;  %v932_v14 = vadd.f32 %v2020_v54, %v931_v5  ;;  %v2082_v4 = vpop.f32.mrf.mxu1 }
 0x106   :  { %v2054_v30 = vpop.f32.mrf.mxu0 }
 0x107   :  { %v933_v20 = vadd.f32 %v932_v14, %v1963_v12  ;;  %v1065_v21 = vadd.f32 %v1064_v11, %v1002_v10  ;;  %v1011_v10 = vmul.f32 %v2042_v15, %v2042_v15 }
 0x108   :  { %v2064_v42 = vpop.f32.mrf.mxu0 }
 0x109   :  { %v934_v24 = vadd.f32 %v933_v20, %v1977_v22  ;;  %v1066_v26 = vadd.f32 %v1065_v21, %v1003_v19  ;;  %v1012_v20 = vmul.f32 %v2062_v40, %v2062_v40  ;;  %v2092_v21 = vpop.f32.mrf.mxu1 }
 0x10a   :  { %v2074_v53 = vpop.f32.mrf.mxu0 }
 0x10b   :  { %v935_v33 = vadd.f32 %v1956_v7, %v934_v24  ;;  %v1067_v34 = vadd.f32 %v1066_v26, %v1004_v25  ;;  %3083 = vst [vmem:[#allocation2_spill] sm:$0xff] %v2074_v53  ;;  %v1013_v25 = vmul.f32 %v2032_v63, %v2032_v63 }
 0x10c   :  { %v2084_v5 = vpop.f32.mrf.mxu0 }
 0x10d   :  { %v1068_v38 = vadd.f32 %v1067_v34, %v1005_v31  ;;  %v936_v39 = vadd.f32 %v1970_v17, %v935_v33  ;;  %v1014_v33 = vmul.f32 %v2052_v29, %v2052_v29 }
 0x10e   :  { %v2094_v24 = vpop.f32.mrf.mxu0 }
 0x10f   :  { %v937_v43 = vadd.f32 %v936_v39, %v1998_v37  ;;  %v1069_v47 = vadd.f32 %v1068_v38, %v1006_v35  ;;  %3084 = vst [vmem:[#allocation3_spill] sm:$0xff] %v2094_v24  ;;  %v2102_v38 = vpop.f32.mrf.mxu1 }
 0x110   :  { %v2104_v39 = vpop.f32.mrf.mxu0 }
 0x111   :  { %v1070_v48 = vadd.f32 %v1069_v47, %v1007_v44  ;;  %v938_v49 = vadd.f32 %v937_v43, %v2022_v55  ;;  %3085 = vst [vmem:[#allocation4_spill] sm:$0xff] %v2104_v39  ;;  %v1015_v44 = vmul.f32 %v2082_v4, %v2082_v4 }
 0x113   :  { %v939_v57 = vadd.f32 %v1986_v28, %v938_v49  ;;  %v1071_v58 = vadd.f32 %v1070_v48, %v1008_v51  ;;  %v1016_v51 = vmul.f32 %v2102_v38, %v2102_v38 }
 0x115   :  { %v1072_v61 = vadd.f32 %v1071_v58, %v1009_v56  ;;  %v940_v62 = vadd.f32 %v2010_v46, %v939_v57  ;;  %v2112_v56 = vpop.f32.mrf.mxu0  ;;  %v2114_v57 = vpop.f32.mrf.mxu1  ;;  %v1017_v58 = vmul.f32 %v2072_v52, %v2072_v52 }
 0x116   :  { %3086 = vst [vmem:[#allocation5_spill] sm:$0xff] %v2114_v57 }
 0x117   :  { %v941_v6 = vadd.f32 %v940_v62, %v2042_v15  ;;  %v1073_v11 = vadd.f32 %v1072_v61, %v1010_v60  ;;  %v1018_v62 = vmul.f32 %v2092_v21, %v2092_v21 }
 0x119   :  { %v1074_v14 = vadd.f32 %v1073_v11, %v1011_v10  ;;  %v942_v19 = vadd.f32 %v941_v6, %v2062_v40  ;;  %v2122_v11 = vpop.f32.mrf.mxu0 }
 0x11a   :  { %3087 = vst [vmem:[#allocation6_spill] sm:$0xff] %v2122_v11 }
 0x11b   :  { %v943_v26 = vadd.f32 %v2032_v63, %v942_v19  ;;  %v1075_v31 = vadd.f32 %v1074_v14, %v1012_v20  ;;  %v2124_v14 = vpop.f32.mrf.mxu1  ;;  %v1019_v20 = vmul.f32 %v2044_v16, %v2044_v16 }
 0x11c   :  { %3088 = vst [vmem:[#allocation7_spill] sm:$0xff] %v2124_v14 }
 0x11d   :  { %v1076_v34 = vadd.f32 %v1075_v31, %v1013_v25  ;;  %v944_v35 = vadd.f32 %v2052_v29, %v943_v26 }
 0x11f   :  { %v945_v43 = vadd.f32 %v944_v35, %v2082_v4  ;;  %v1077_v47 = vadd.f32 %v1076_v34, %v1014_v33  ;;  %v1020_v33 = vmul.f32 %v2064_v42, %v2064_v42  ;;  %v2132_v34 = vpop.f32.mrf.mxu0  ;;  %v2134_v35 = vpop.f32.mrf.mxu1 }
 0x120   :  { %3089 = vst [vmem:[#allocation8_spill] sm:$0xff] %v2132_v34  ;;  %3090 = vst [vmem:[#allocation9_spill] sm:$0xff] %v2134_v35 }
 0x121   :  { %v1078_v48 = vadd.f32 %v1077_v47, %v1015_v44  ;;  %v946_v49 = vadd.f32 %v945_v43, %v2102_v38  ;;  %v1021_v43 = vmul.f32 %v2037_v9, %v2037_v9 }
 0x123   :  { %v947_v60 = vadd.f32 %v2072_v52, %v946_v49  ;;  %v1079_v61 = vadd.f32 %v1078_v48, %v1016_v51  ;;  %v1022_v48 = vmul.f32 %v2054_v30, %v2054_v30 }
 0x125   :  { %v1080_v6 = vadd.f32 %v1079_v61, %v1017_v58  ;;  %v948_v10 = vadd.f32 %v2092_v21, %v947_v60  ;;  %v2142_v58 = vpop.f32.mrf.mxu0  ;;  %v2144_v60 = vpop.f32.mrf.mxu1 }
 0x126   :  { %3091 = vst [vmem:[#allocation10_spill] sm:$0xff] %v2142_v58  ;;  %3092 = vst [vmem:[#allocation11_spill] sm:$0xff] %v2144_v60 }
 0x127   :  { %v949_v19 = vadd.f32 %v948_v10, %v2044_v16  ;;  %v1081_v25 = vadd.f32 %v1080_v6, %v1018_v62  ;;  %v1023_v62 = vmul.f32 %v2084_v5, %v2084_v5 }
 0x129   :  { %v1082_v26 = vadd.f32 %v1081_v25, %v1019_v20  ;;  %v950_v31 = vadd.f32 %v949_v19, %v2064_v42  ;;  %v1024_v20 = vmul.f32 %v2104_v39, %v2104_v39  ;;  %v2152_v25 = vpop.f32.mrf.mxu0 }
 0x12b   :  { %v951_v44 = vadd.f32 %v2037_v9, %v950_v31  ;;  %v1083_v47 = vadd.f32 %v1082_v26, %v1020_v33  ;;  %v2154_v26 = vpop.f32.mrf.mxu1  ;;  %v1025_v31 = vmul.f32 %v2074_v53, %v2074_v53 }
 0x12c   :  { %3093 = vst [vmem:[#allocation12_spill] sm:$0xff] %v2154_v26 }
 0x12d   :  { %v1084_v49 = vadd.f32 %v1083_v47, %v1021_v43  ;;  %v952_v51 = vadd.f32 %v2054_v30, %v951_v44  ;;  %v1026_v44 = vmul.f32 %v2094_v24, %v2094_v24 }
 0x12f   :  { %v953_v61 = vadd.f32 %v952_v51, %v2084_v5  ;;  %v1085_v6 = vadd.f32 %v1084_v49, %v1022_v48  ;;  %v2162_v49 = vpop.f32.mrf.mxu0  ;;  %v2164_v51 = vpop.f32.mrf.mxu1 }
 0x130   :  { %3094 = vst [vmem:[#allocation13_spill] sm:$0xff] %v2162_v49  ;;  %3095 = vst [vmem:[#allocation14_spill] sm:$0xff] %v2164_v51 }
 0x131   :  { %v1086_v10 = vadd.f32 %v1085_v6, %v1023_v62  ;;  %v954_v19 = vadd.f32 %v953_v61, %v2104_v39  ;;  %v1027_v62 = vmul.f32 %v2122_v11, %v2122_v11 }
 0x133   :  { %v955_v33 = vadd.f32 %v2074_v53, %v954_v19  ;;  %v1087_v43 = vadd.f32 %v1086_v10, %v1024_v20  ;;  %v1028_v10 = vmul.f32 %v2142_v58, %v2142_v58  ;;  %v2172_v20 = vpop.f32.mrf.mxu0 }
 0x134   :  { %3096 = vst [vmem:[#allocation15_spill] sm:$0xff] %v2172_v20 }
 0x135   :  { %v1088_v47 = vadd.f32 %v1087_v43, %v1025_v31  ;;  %v956_v48 = vadd.f32 %v2094_v24, %v955_v33  ;;  %v2174_v31 = vpop.f32.mrf.mxu1  ;;  %v1029_v33 = vmul.f32 %v2112_v56, %v2112_v56 }
 0x136   :  { %3097 = vst [vmem:[#allocation16_spill] sm:$0xff] %v2174_v31 }
 0x137   :  { %v957_v61 = vadd.f32 %v956_v48, %v2122_v11  ;;  %v1089_v6 = vadd.f32 %v1088_v47, %v1026_v44  ;;  %v1030_v11 = vmul.f32 %v2132_v34, %v2132_v34 }
 0x139   :  { %v1090_v39 = vadd.f32 %v1089_v6, %v1027_v62  ;;  %v958_v19 = vadd.f32 %v957_v61, %v2142_v58  ;;  %v2182_v61 = vpop.f32.mrf.mxu0  ;;  %v2184_v62 = vpop.f32.mrf.mxu1  ;;  %v1031_v58 = vmul.f32 %v2162_v49, %v2162_v49 }
 0x13a   :  { %3098 = vst [vmem:[#allocation17_spill] sm:$0xff] %v2182_v61  ;;  %3099 = vst [vmem:[#allocation18_spill] sm:$0xff] %v2184_v62 }
 0x13b   :  { %v959_v43 = vadd.f32 %v2112_v56, %v958_v19  ;;  %v1091_v48 = vadd.f32 %v1090_v39, %v1028_v10  ;;  %v1032_v39 = vmul.f32 %v2182_v61, %v2182_v61  ;;  %v2192_v10 = vpop.f32.mrf.mxu1 }
 0x13c   :  { %3100 = vst [vmem:[#allocation19_spill] sm:$0xff] %v2192_v10 }
 0x13d   :  { %v1092_v44 = vadd.f32 %v1091_v48, %v1029_v33  ;;  %v960_v47 = vadd.f32 %v2132_v34, %v959_v43  ;;  %v1033_v33 = vmul.f32 %v2152_v25, %v2152_v25 }
 0x13f   :  { %v961_v6 = vadd.f32 %v960_v47, %v2162_v49  ;;  %v1093_v24 = vadd.f32 %v1092_v44, %v1030_v11  ;;  %v1034_v47 = vmul.f32 %v2172_v20, %v2172_v20  ;;  %v1035_v44 = vmul.f32 %v2124_v14, %v2124_v14 }
 0x141   :  { %v1094_v53 = vadd.f32 %v1093_v24, %v1031_v58  ;;  %v962_v19 = vadd.f32 %v961_v6, %v2182_v61  ;;  %v2200_v24 = vpop.f32.mrf.mxu1 }
 0x142   :  { %3101 = vst [vmem:[#allocation20_spill] sm:$0xff] %v2200_v24 }
 0x143   :  { %v963_v43 = vadd.f32 %v2152_v25, %v962_v19  ;;  %v1095_v48 = vadd.f32 %v1094_v53, %v1032_v39  ;;  %v1036_v53 = vmul.f32 %v2144_v60, %v2144_v60  ;;  %v2208_v19 = vpop.f32.mrf.mxu1  ;;  %v1037_v39 = vmul.f32 %v2114_v57, %v2114_v57 }
 0x144   :  { %3102 = vst [vmem:[#allocation21_spill] sm:$0xff] %v2208_v19 }
 0x145   :  { %v1096_v34 = vadd.f32 %v1095_v48, %v1033_v33  ;;  %v964_v11 = vadd.f32 %v2172_v20, %v963_v43  ;;  %v1038_v48 = vmul.f32 %v2134_v35, %v2134_v35 }
 0x147   :  { %v965_v58 = vadd.f32 %v964_v11, %v2124_v14  ;;  %v1097_v6 = vadd.f32 %v1096_v34, %v1034_v47  ;;  %v2216_v47 = vpop.f32.mrf.mxu1 }
 0x148   :  { %3103 = vst [vmem:[#allocation22_spill] sm:$0xff] %v2216_v47 }
 0x149   :  { %v1098_v61 = vadd.f32 %v1097_v6, %v1035_v44  ;;  %v966_v49 = vadd.f32 %v965_v58, %v2144_v60  ;;  %v1039_v44 = vmul.f32 %v2164_v51, %v2164_v51 }
 0x14b   :  { %v967_v33 = vadd.f32 %v2114_v57, %v966_v49  ;;  %v1099_v43 = vadd.f32 %v1098_v61, %v1036_v53  ;;  %v1040_v49 = vmul.f32 %v2184_v62, %v2184_v62  ;;  %v2224_v61 = vpop.f32.mrf.mxu1  ;;  %v1041_v53 = vmul.f32 %v2154_v26, %v2154_v26 }
 0x14c   :  { %3104 = vst [vmem:[#allocation23_spill] sm:$0xff] %v2224_v61 }
 0x14d   :  { %v1100_v11 = vadd.f32 %v1099_v43, %v1037_v39  ;;  %v968_v34 = vadd.f32 %v2134_v35, %v967_v33  ;;  %v1042_v43 = vmul.f32 %v2174_v31, %v2174_v31 }
 0x14f   :  { %v969_v58 = vadd.f32 %v968_v34, %v2164_v51  ;;  %v1101_v6 = vadd.f32 %v1100_v11, %v1038_v48  ;;  %v2232_v11 = vpop.f32.mrf.mxu1 }
 0x150   :  { %3105 = vst [vmem:[#allocation24_spill] sm:$0xff] %v2232_v11 }
 0x151   :  { %v1102_v60 = vadd.f32 %v1101_v6, %v1039_v44  ;;  %v970_v14 = vadd.f32 %v969_v58, %v2184_v62  ;;  %v1043_v44 = vmul.f32 %v2200_v24, %v2200_v24 }
 0x153   :  { %v971_v39 = vadd.f32 %v2154_v26, %v970_v14  ;;  %v1103_v33 = vadd.f32 %v1102_v60, %v1040_v49  ;;  %v1044_v14 = vmul.f32 %v2216_v47, %v2216_v47  ;;  %v2240_v60 = vpop.f32.mrf.mxu1  ;;  %v1045_v49 = vmul.f32 %v2192_v10, %v2192_v10 }
 0x155   :  { %v1104_v34 = vadd.f32 %v1103_v33, %v1041_v53  ;;  %v972_v48 = vadd.f32 %v2174_v31, %v971_v39  ;;  %v1046_v33 = vmul.f32 %v2208_v19, %v2208_v19 }
 0x157   :  { %v973_v58 = vadd.f32 %v972_v48, %v2200_v24  ;;  %v1105_v6 = vadd.f32 %v1104_v34, %v1042_v43  ;;  %v2248_v34 = vpop.f32.mrf.mxu1 }
 0x158   :  { %3106 = vst [vmem:[#allocation25_spill] sm:$0xff] %v2248_v34 }
 0x159   :  { %v1106_v62 = vadd.f32 %v1105_v6, %v1043_v44  ;;  %v974_v51 = vadd.f32 %v973_v58, %v2216_v47  ;;  %v1047_v44 = vmul.f32 %v2232_v11, %v2232_v11 }
 0x15b   :  { %v975_v53 = vadd.f32 %v2192_v10, %v974_v51  ;;  %v1107_v39 = vadd.f32 %v1106_v62, %v1044_v14  ;;  %v1048_v51 = vmul.f32 %v2248_v34, %v2248_v34  ;;  %v1049_v62 = vmul.f32 %v2224_v61, %v2224_v61 }
 0x15d   :  { %v1108_v48 = vadd.f32 %v1107_v39, %v1045_v49  ;;  %v976_v43 = vadd.f32 %v2208_v19, %v975_v53  ;;  %v1050_v53 = vmul.f32 %v2240_v60, %v2240_v60 }
 0x15f   :  { %v977_v58 = vadd.f32 %v976_v43, %v2232_v11  ;;  %v1109_v6 = vadd.f32 %v1108_v48, %v1046_v33 }
 0x161   :  { %v1110_v47 = vadd.f32 %v1109_v6, %v1047_v44  ;;  %v978_v24 = vadd.f32 %v977_v58, %v2248_v34 }
 0x163   :  { %v979_v14 = vadd.f32 %v2224_v61, %v978_v24  ;;  %v1111_v49 = vadd.f32 %v1110_v47, %v1048_v51 }
 0x165   :  { %v980_v39 = vadd.f32 %v2240_v60, %v979_v14  ;;  %v1112_v43 = vadd.f32 %v1111_v49, %v1049_v62  ;;  %v1132_v62 = vlaneseq }
 0x167   :  { %v981_v11 = vrot.slane %v980_v39, 4  ;;  %v1113_v33 = vadd.f32 %v1112_v43, %v1050_v53  ;;  %v2262_v14 = vshrl.u32 %v1132_v62, 7  ;;  %v3107_v43 = vld [vmem:[#allocation4_spill] sm:$0xff] }
 0x169   :  { %v982_v48 = vadd.f32 %v981_v11, %v980_v39  ;;  %v1114_v44 = vrot.slane %v1113_v33, 4  ;;  %v1124_v11 = vld [vmem:[%s3055_s2] sm:$0x1]  ;;  %v3082_v49 = vsub.s32 0, %v2262_v14 }
 0x16b   :  { %v983_v58 = vrot.slane %v982_v48, 2  ;;  %v1115_v6 = vadd.f32 %v1114_v44, %v1113_v33  ;;  %v3108_v33 = vld [vmem:[#allocation2_spill] sm:$0xff] }
 0x16c   :  { %v3110_v44 = vld [vmem:[#allocation6_spill] sm:$0xff] }
 0x16d   :  { %v984_v19 = vadd.f32 %v983_v58, %v982_v48  ;;  %v1116_v34 = vrot.slane %v1115_v6, 2  ;;  %v3109_v48 = vld [vmem:[#allocation3_spill] sm:$0xff]  ;;  %v3111_v58 = vld [vmem:[#allocation10_spill] sm:$0xff] }
 0x16f   :  { %v985_v10 = vrot.slane %v984_v19, 1  ;;  %v1117_v31 = vadd.f32 %v1116_v34, %v1115_v6 }
 0x171   :  { %v986_v26 = vadd.f32 %v985_v10, %v984_v19  ;;  %v1118_v35 = vrot.slane %v1117_v31, 1 }
 0x173   :  { %v1119_v24 = vadd.f32 %v1118_v35, %v1117_v31  ;;  %v1120_v47 = vmul.f32 0.001953125, %v986_v26  ;;  %v2271_v35 = vld [vmem:[%s3056_s3] sm:$0x1] }
 0x175   :  { %v1121_v51 = vmul.f32 0.001953125, %v1119_v24  ;;  %v1122_v61 = vmul.f32 %v1120_v47, %v1120_v47  ;;  %v3112_v24 = vld [vmem:[#allocation8_spill] sm:$0xff] }
 0x177   :  { %v1123_v57 = vsub.f32 %v1121_v51, %v1122_v61  ;;  %v3113_v51 = vld [vmem:[#allocation13_spill] sm:$0xff] }
 0x179   :  { %v1125_v20 = vadd.f32 1e-05, %v1123_v57 }
 0x17b   :  { %1723 = vrsqrt.f32 %v1125_v20 }
 0x188   :  { %v1724_v53 = vpop.eup %1723 }
 0x189   :  { %v1127_v34 = vmul.f32 %v1724_v53, %v1124_v11  ;;  %v3114_v11 = vld [vmem:[#allocation17_spill] sm:$0xff] }
 0x18b   :  { %v2273_v26 = vmul.f32 %v1127_v34, %v1120_v47  ;;  %v2277_v57 = vrot.slane %v1127_v34, %v3082_v49  ;;  %v3127_v49 = vld [vmem:[#allocation12_spill] sm:$0xff] }
 0x18d   :  { %v1130_v20 = vsub.f32 %v2271_v35, %v2273_v26  ;;  %v2283_v31 = vmul.f32 %v2277_v57, %v1944_v1  ;;  %v2287_v10 = vmul.f32 %v2277_v57, %v1948_v3  ;;  %v2291_v19 = vmul.f32 %v1942_v0, %v2277_v57  ;;  %v3115_v35 = vld [vmem:[#allocation15_spill] sm:$0xff] }
 0x18e   :  { %v2295_v61 = vmul.f32 %v1946_v2, %v2277_v57  ;;  %v2299_v39 = vmul.f32 %v2277_v57, %v1965_v13  ;;  %v2303_v1 = vmul.f32 %v2277_v57, %v1979_v23  ;;  %v2307_v3 = vmul.f32 %v1958_v8, %v2277_v57  ;;  %v3116_v26 = vld [vmem:[#allocation7_spill] sm:$0xff] }
 0x18f   :  { %v2311_v0 = vmul.f32 %v1972_v18, %v2277_v57  ;;  %v2315_v2 = vmul.f32 %v2277_v57, %v1991_v32  ;;  %v2319_v13 = vmul.f32 %v2277_v57, %v2003_v41  ;;  %v2323_v23 = vmul.f32 %v1984_v27, %v2277_v57 }
 0x190   :  { %v2327_v8 = vmul.f32 %v1996_v36, %v2277_v57  ;;  %v2331_v18 = vmul.f32 %v2277_v57, %v2015_v50  ;;  %v2335_v32 = vmul.f32 %v2277_v57, %v2027_v59  ;;  %v2339_v41 = vmul.f32 %v2008_v45, %v2277_v57 }
 0x191   :  { %v2343_v27 = vmul.f32 %v2020_v54, %v2277_v57  ;;  %v2347_v36 = vmul.f32 %v2277_v57, %v1963_v12  ;;  %v2351_v50 = vmul.f32 %v2277_v57, %v1977_v22  ;;  %v2355_v59 = vmul.f32 %v1956_v7, %v2277_v57 }
 0x192   :  { %v2359_v45 = vmul.f32 %v1970_v17, %v2277_v57  ;;  %v2363_v54 = vmul.f32 %v2277_v57, %v1998_v37  ;;  %v2367_v12 = vmul.f32 %v2277_v57, %v2022_v55  ;;  %v2371_v22 = vmul.f32 %v1986_v28, %v2277_v57 }
 0x193   :  { %v2375_v7 = vmul.f32 %v2010_v46, %v2277_v57  ;;  %v2379_v17 = vmul.f32 %v2277_v57, %v2042_v15  ;;  %v2383_v37 = vmul.f32 %v2277_v57, %v2062_v40  ;;  %v2387_v55 = vmul.f32 %v2032_v63, %v2277_v57 }
 0x194   :  { %v2391_v28 = vmul.f32 %v2052_v29, %v2277_v57  ;;  %v2395_v46 = vmul.f32 %v2277_v57, %v2082_v4  ;;  %v2399_v15 = vmul.f32 %v2277_v57, %v2102_v38  ;;  %v2403_v40 = vmul.f32 %v2072_v52, %v2277_v57 }
 0x195   :  { %v2407_v63 = vmul.f32 %v2092_v21, %v2277_v57  ;;  %v2411_v29 = vmul.f32 %v2277_v57, %v2044_v16  ;;  %v2415_v4 = vmul.f32 %v2277_v57, %v2064_v42  ;;  %v2419_v38 = vmul.f32 %v2037_v9, %v2277_v57 }
 0x196   :  { %v2423_v52 = vmul.f32 %v2054_v30, %v2277_v57  ;;  %v2427_v21 = vmul.f32 %v2277_v57, %v2084_v5  ;;  %v2431_v16 = vmul.f32 %v2277_v57, %v3107_v43  ;;  %v2435_v42 = vmul.f32 %v3108_v33, %v2277_v57  ;;  %v3117_v33 = vld [vmem:[#allocation11_spill] sm:$0xff] }
 0x197   :  { %v2439_v9 = vmul.f32 %v3109_v48, %v2277_v57  ;;  %v2443_v30 = vmul.f32 %v2277_v57, %v3110_v44  ;;  %v2447_v5 = vmul.f32 %v2277_v57, %v3111_v58  ;;  %v2451_v6 = vmul.f32 %v2112_v56, %v2277_v57  ;;  %v3119_v44 = vld [vmem:[#allocation5_spill] sm:$0xff] }
 0x198   :  { %v2455_v47 = vmul.f32 %v3112_v24, %v2277_v57  ;;  %v2459_v62 = vmul.f32 %v2277_v57, %v3113_v51  ;;  %v2463_v53 = vmul.f32 %v2277_v57, %v3114_v11  ;;  %v2467_v34 = vmul.f32 %v2152_v25, %v2277_v57  ;;  %v3121_v24 = vld [vmem:[#allocation9_spill] sm:$0xff]  ;;  %v3123_v51 = vld [vmem:[#allocation14_spill] sm:$0xff] }
 0x199   :  { %v2471_v56 = vmul.f32 %v3115_v35, %v2277_v57  ;;  %v2475_v43 = vmul.f32 %v2277_v57, %v3116_v26  ;;  %v2479_v48 = vmul.f32 %v2277_v57, %v3117_v33  ;;  %v2483_v58 = vmul.f32 %v3119_v44, %v2277_v57  ;;  %v3125_v35 = vld [vmem:[#allocation18_spill] sm:$0xff] }
 0x19a   :  { %v2487_v25 = vmul.f32 %v3121_v24, %v2277_v57  ;;  %v2491_v11 = vmul.f32 %v2277_v57, %v3123_v51  ;;  %v2495_v26 = vmul.f32 %v2277_v57, %v3125_v35  ;;  %v2499_v33 = vmul.f32 %v3127_v49, %v2277_v57 }
 0x19b   :  { %3118 = vst [vmem:[#allocation4_spill] sm:$0xff] %v2479_v48  ;;  %3120 = vst [vmem:[#allocation2_spill] sm:$0xff] %v2483_v58  ;;  %v3129_v48 = vld [vmem:[#allocation16_spill] sm:$0xff] }
 0x19c   :  { %3122 = vst [vmem:[#allocation3_spill] sm:$0xff] %v2487_v25  ;;  %3124 = vst [vmem:[#allocation6_spill] sm:$0xff] %v2491_v11  ;;  %v2503_v44 = vmul.f32 %v3129_v48, %v2277_v57  ;;  %v3131_v58 = vld [vmem:[#allocation20_spill] sm:$0xff]  ;;  %v3133_v25 = vld [vmem:[#allocation22_spill] sm:$0xff] }
 0x19d   :  { %3126 = vst [vmem:[#allocation10_spill] sm:$0xff] %v2495_v26  ;;  %3128 = vst [vmem:[#allocation8_spill] sm:$0xff] %v2499_v33  ;;  %v2507_v24 = vmul.f32 %v2277_v57, %v3131_v58  ;;  %v2511_v51 = vmul.f32 %v2277_v57, %v3133_v25  ;;  %v3135_v11 = vld [vmem:[#allocation19_spill] sm:$0xff]  ;;  %v3136_v26 = vld [vmem:[#allocation21_spill] sm:$0xff]  ;;  %v3137_v33 = vsub.s32 0, %v2262_v14 }
 0x19e   :  { %3130 = vst [vmem:[#allocation13_spill] sm:$0xff] %v2503_v44  ;;  %v2515_v35 = vmul.f32 %v3135_v11, %v2277_v57  ;;  %v2519_v49 = vmul.f32 %v3136_v26, %v2277_v57  ;;  %v3138_v44 = vld [vmem:[#allocation24_spill] sm:$0xff]  ;;  %v2539_v26 = vmul.f32 %v2240_v60, %v2277_v57 }
 0x19f   :  { %3132 = vst [vmem:[#allocation17_spill] sm:$0xff] %v2507_v24  ;;  %3134 = vst [vmem:[#allocation15_spill] sm:$0xff] %v2511_v51  ;;  %v2523_v48 = vrot.slane %v1130_v20, %v3137_v33  ;;  %v2527_v58 = vmul.f32 %v2277_v57, %v3138_v44  ;;  %v3139_v24 = vld [vmem:[#allocation25_spill] sm:$0xff]  ;;  %v3140_v51 = vld [vmem:[#allocation23_spill] sm:$0xff] }
 0x1a0   :  { %v2531_v25 = vmul.f32 %v2277_v57, %v3139_v24  ;;  %v2535_v11 = vmul.f32 %v3140_v51, %v2277_v57 }
 0x1a1   :  { %v2543_v14 = vadd.f32 %v2523_v48, %v2283_v31  ;;  %v2547_v20 = vadd.f32 %v2523_v48, %v2287_v10  ;;  %v2551_v33 = vadd.f32 %v2523_v48, %v2291_v19  ;;  %v2555_v44 = vadd.f32 %v2523_v48, %v2295_v61 }
 0x1a2   :  { %v2559_v60 = vadd.f32 %v2523_v48, %v2299_v39  ;;  %v2563_v57 = vadd.f32 %v2523_v48, %v2303_v1  ;;  %v2567_v31 = vadd.f32 %v2523_v48, %v2307_v3  ;;  %v2571_v10 = vadd.f32 %v2523_v48, %v2311_v0  ;;  %v3146_v24 = vld [vmem:[#allocation2_spill] sm:$0xff] }
 0x1a3   :  { %v2575_v19 = vadd.f32 %v2523_v48, %v2315_v2  ;;  %v2579_v61 = vadd.f32 %v2523_v48, %v2319_v13  ;;  %v2583_v39 = vadd.f32 %v2523_v48, %v2323_v23  ;;  %v2587_v1 = vadd.f32 %v2523_v48, %v2327_v8  ;;  %v3148_v51 = vld [vmem:[#allocation3_spill] sm:$0xff] }
 0x1a4   :  { %v2591_v3 = vadd.f32 %v2523_v48, %v2331_v18  ;;  %v2595_v0 = vadd.f32 %v2523_v48, %v2335_v32  ;;  %v2599_v2 = vadd.f32 %v2523_v48, %v2339_v41  ;;  %v2603_v13 = vadd.f32 %v2523_v48, %v2343_v27 }
 0x1a5   :  { %v2607_v23 = vadd.f32 %v2523_v48, %v2347_v36  ;;  %v2611_v8 = vadd.f32 %v2523_v48, %v2351_v50  ;;  %v2615_v18 = vadd.f32 %v2523_v48, %v2355_v59  ;;  %v2619_v32 = vadd.f32 %v2523_v48, %v2359_v45 }
 0x1a6   :  { %v2623_v41 = vadd.f32 %v2523_v48, %v2363_v54  ;;  %v2627_v27 = vadd.f32 %v2523_v48, %v2367_v12  ;;  %v2631_v36 = vadd.f32 %v2523_v48, %v2371_v22  ;;  %v2635_v50 = vadd.f32 %v2523_v48, %v2375_v7 }
 0x1a7   :  { %v2639_v59 = vadd.f32 %v2523_v48, %v2379_v17  ;;  %v2643_v45 = vadd.f32 %v2523_v48, %v2383_v37  ;;  %v2647_v54 = vadd.f32 %v2523_v48, %v2387_v55  ;;  %v2651_v12 = vadd.f32 %v2523_v48, %v2391_v28 }
 0x1a8   :  { %v2655_v22 = vadd.f32 %v2523_v48, %v2395_v46  ;;  %v2659_v7 = vadd.f32 %v2523_v48, %v2399_v15  ;;  %v2663_v17 = vadd.f32 %v2523_v48, %v2403_v40  ;;  %v2667_v37 = vadd.f32 %v2523_v48, %v2407_v63 }
 0x1a9   :  { %v2671_v55 = vadd.f32 %v2523_v48, %v2411_v29  ;;  %v2675_v28 = vadd.f32 %v2523_v48, %v2415_v4  ;;  %v2679_v46 = vadd.f32 %v2523_v48, %v2419_v38  ;;  %v2683_v15 = vadd.f32 %v2523_v48, %v2423_v52 }
 0x1aa   :  { %v2687_v40 = vadd.f32 %v2523_v48, %v2427_v21  ;;  %v2691_v63 = vadd.f32 %v2523_v48, %v2431_v16  ;;  %v2695_v29 = vadd.f32 %v2523_v48, %v2435_v42  ;;  %v2699_v4 = vadd.f32 %v2523_v48, %v2439_v9 }
 0x1ab   :  { %v2703_v38 = vadd.f32 %v2523_v48, %v2443_v30  ;;  %v2707_v52 = vadd.f32 %v2523_v48, %v2447_v5  ;;  %v2711_v21 = vadd.f32 %v2523_v48, %v2451_v6  ;;  %v2715_v16 = vadd.f32 %v2523_v48, %v2455_v47  ;;  %v3144_v47 = vld [vmem:[#allocation4_spill] sm:$0xff] }
 0x1ac   :  { %v2719_v42 = vadd.f32 %v2523_v48, %v2459_v62  ;;  %v2723_v9 = vadd.f32 %v2523_v48, %v2463_v53  ;;  %v2727_v30 = vadd.f32 %v2523_v48, %v2467_v34  ;;  %v2731_v5 = vadd.f32 %v2523_v48, %v2471_v56 }
 0x1ad   :  { %v2735_v6 = vadd.f32 %v2523_v48, %v2475_v43  ;;  %v2739_v62 = vadd.f32 %v2523_v48, %v3144_v47  ;;  %v2743_v53 = vadd.f32 %v2523_v48, %v3146_v24  ;;  %v2747_v34 = vadd.f32 %v2523_v48, %v3148_v51 }
 0x1ae   :  { %3141 = vst [vmem:[#allocation7_spill] sm:$0xff] %v2727_v30  ;;  %3142 = vst [vmem:[#allocation11_spill] sm:$0xff] %v2731_v5  ;;  %v3150_v30 = vld [vmem:[#allocation6_spill] sm:$0xff] }
 0x1af   :  { %3143 = vst [vmem:[#allocation5_spill] sm:$0xff] %v2735_v6  ;;  %3145 = vst [vmem:[#allocation9_spill] sm:$0xff] %v2739_v62  ;;  %v2751_v56 = vadd.f32 %v2523_v48, %v3150_v30  ;;  %v3151_v5 = vld [vmem:[#allocation10_spill] sm:$0xff]  ;;  %v3152_v6 = vld [vmem:[#allocation8_spill] sm:$0xff] }
 0x1b0   :  { %3147 = vst [vmem:[#allocation14_spill] sm:$0xff] %v2743_v53  ;;  %3149 = vst [vmem:[#allocation18_spill] sm:$0xff] %v2747_v34  ;;  %v2755_v43 = vadd.f32 %v2523_v48, %v3151_v5  ;;  %v2759_v47 = vadd.f32 %v2523_v48, %v3152_v6  ;;  %v3153_v62 = vld [vmem:[#allocation13_spill] sm:$0xff]  ;;  %v3155_v34 = vld [vmem:[#allocation15_spill] sm:$0xff]  ;;  %v2775_v5 = vadd.f32 %v2523_v48, %v2515_v35 }
 0x1b1   :  { %v2763_v24 = vadd.f32 %v2523_v48, %v3153_v62  ;;  %v3154_v53 = vld [vmem:[#allocation17_spill] sm:$0xff]  ;;  %v2771_v30 = vadd.f32 %v2523_v48, %v3155_v34  ;;  %v2779_v6 = vadd.f32 %v2523_v48, %v2519_v49  ;;  %v2783_v62 = vadd.f32 %v2523_v48, %v2527_v58 }
 0x1b2   :  { %v2767_v51 = vadd.f32 %v2523_v48, %v3154_v53  ;;  %3156 = vst [vmem:[#allocation12_spill] sm:$0xff] %v2775_v5  ;;  %v2787_v53 = vadd.f32 %v2523_v48, %v2531_v25  ;;  %v2791_v34 = vadd.f32 %v2523_v48, %v2535_v11  ;;  %v2795_v35 = vadd.f32 %v2523_v48, %v2539_v26 }
 0x1b3   :  { %3157 = vst [vmem:[#allocation16_spill] sm:$0xff] %v2779_v6  ;;  %3158 = vst [vmem:[#allocation20_spill] sm:$0xff] %v2783_v62  ;;  %v1271_v5 = vmax.f32 %v2543_v14, 0.0  ;;  %v1272_v49 = vmax.f32 %v2547_v20, 0.0  ;;  %v1273_v6 = vmax.f32 %v2551_v33, 0.0  ;;  %v1274_v58 = vmax.f32 %v2555_v44, 0.0 }
 0x1b4   :  { %3159 = vst [vmem:[#allocation22_spill] sm:$0xff] %v2787_v53  ;;  %3160 = vst [vmem:[#allocation19_spill] sm:$0xff] %v2791_v34  ;;  %v1275_v62 = vmax.f32 %v2559_v60, 0.0  ;;  %v1276_v25 = vmax.f32 %v2563_v57, 0.0  ;;  %v1277_v53 = vmax.f32 %v2567_v31, 0.0  ;;  %v1278_v11 = vmax.f32 %v2571_v10, 0.0 }
 0x1b5   :  { %v1279_v34 = vmax.f32 %v2575_v19, 0.0  ;;  %v1280_v48 = vmax.f32 %v2579_v61, 0.0  ;;  %v1281_v26 = vmax.f32 %v2583_v39, 0.0  ;;  %v1282_v14 = vmax.f32 %v2587_v1, 0.0  ;;  %1335 = vst [vmem:[%s3057_s4] sm:$0xff] %v1271_v5  ;;  %1336 = vst [vmem:[%s3057_s4 + $0x8] sm:$0xff] %v1272_v49 }
 0x1b6   :  { %1337 = vst [vmem:[%s3057_s4 + $0x10] sm:$0xff] %v1273_v6  ;;  %1338 = vst [vmem:[%s3057_s4 + $0x18] sm:$0xff] %v1274_v58  ;;  %v1283_v20 = vmax.f32 %v2591_v3, 0.0  ;;  %v1284_v33 = vmax.f32 %v2595_v0, 0.0  ;;  %v1285_v44 = vmax.f32 %v2599_v2, 0.0  ;;  %v1286_v60 = vmax.f32 %v2603_v13, 0.0 }
 0x1b7   :  { %1339 = vst [vmem:[%s3057_s4 + $0x20] sm:$0xff] %v1275_v62  ;;  %1340 = vst [vmem:[%s3057_s4 + $0x28] sm:$0xff] %v1276_v25  ;;  %v1287_v57 = vmax.f32 %v2607_v23, 0.0  ;;  %v1288_v31 = vmax.f32 %v2611_v8, 0.0  ;;  %v1289_v10 = vmax.f32 %v2615_v18, 0.0  ;;  %v1290_v19 = vmax.f32 %v2619_v32, 0.0 }
 0x1b8   :  { %1341 = vst [vmem:[%s3057_s4 + $0x30] sm:$0xff] %v1277_v53  ;;  %1342 = vst [vmem:[%s3057_s4 + $0x38] sm:$0xff] %v1278_v11  ;;  %v1291_v61 = vmax.f32 %v2623_v41, 0.0  ;;  %v1292_v39 = vmax.f32 %v2627_v27, 0.0  ;;  %v1293_v1 = vmax.f32 %v2631_v36, 0.0  ;;  %v1294_v3 = vmax.f32 %v2635_v50, 0.0 }
 0x1b9   :  { %1343 = vst [vmem:[%s3057_s4 + $0x40] sm:$0xff] %v1279_v34  ;;  %1344 = vst [vmem:[%s3057_s4 + $0x48] sm:$0xff] %v1280_v48  ;;  %v1295_v0 = vmax.f32 %v2639_v59, 0.0  ;;  %v1296_v2 = vmax.f32 %v2643_v45, 0.0  ;;  %v1297_v13 = vmax.f32 %v2647_v54, 0.0  ;;  %v1298_v23 = vmax.f32 %v2651_v12, 0.0 }
 0x1ba   :  { %1345 = vst [vmem:[%s3057_s4 + $0x50] sm:$0xff] %v1281_v26  ;;  %1346 = vst [vmem:[%s3057_s4 + $0x58] sm:$0xff] %v1282_v14  ;;  %v1299_v8 = vmax.f32 %v2655_v22, 0.0  ;;  %v1300_v18 = vmax.f32 %v2659_v7, 0.0  ;;  %v1301_v32 = vmax.f32 %v2663_v17, 0.0  ;;  %v1302_v41 = vmax.f32 %v2667_v37, 0.0 }
 0x1bb   :  { %1347 = vst [vmem:[%s3057_s4 + $0x60] sm:$0xff] %v1283_v20  ;;  %1348 = vst [vmem:[%s3057_s4 + $0x68] sm:$0xff] %v1284_v33  ;;  %v1303_v27 = vmax.f32 %v2671_v55, 0.0  ;;  %v1304_v36 = vmax.f32 %v2675_v28, 0.0  ;;  %v1305_v50 = vmax.f32 %v2679_v46, 0.0  ;;  %v1306_v59 = vmax.f32 %v2683_v15, 0.0 }
 0x1bc   :  { %1349 = vst [vmem:[%s3057_s4 + $0x70] sm:$0xff] %v1285_v44  ;;  %1350 = vst [vmem:[%s3057_s4 + $0x78] sm:$0xff] %v1286_v60  ;;  %v1307_v45 = vmax.f32 %v2687_v40, 0.0  ;;  %v1308_v54 = vmax.f32 %v2691_v63, 0.0  ;;  %v1309_v12 = vmax.f32 %v2695_v29, 0.0  ;;  %v1310_v22 = vmax.f32 %v2699_v4, 0.0 }
 0x1bd   :  { %1351 = vst [vmem:[%s3057_s4 + $0x80] sm:$0xff] %v1287_v57  ;;  %1352 = vst [vmem:[%s3057_s4 + $0x88] sm:$0xff] %v1288_v31  ;;  %v1311_v7 = vmax.f32 %v2703_v38, 0.0  ;;  %v1312_v17 = vmax.f32 %v2707_v52, 0.0  ;;  %v1313_v37 = vmax.f32 %v2711_v21, 0.0  ;;  %v1314_v55 = vmax.f32 %v2715_v16, 0.0 }
 0x1be   :  { %1353 = vst [vmem:[%s3057_s4 + $0x90] sm:$0xff] %v1289_v10  ;;  %1354 = vst [vmem:[%s3057_s4 + $0x98] sm:$0xff] %v1290_v19  ;;  %v1315_v28 = vmax.f32 %v2719_v42, 0.0  ;;  %v1316_v46 = vmax.f32 %v2723_v9, 0.0  ;;  %v3161_v15 = vld [vmem:[#allocation7_spill] sm:$0xff]  ;;  %v3163_v4 = vld [vmem:[#allocation5_spill] sm:$0xff] }
 0x1bf   :  { %1355 = vst [vmem:[%s3057_s4 + $0xa0] sm:$0xff] %v1291_v61  ;;  %1356 = vst [vmem:[%s3057_s4 + $0xa8] sm:$0xff] %v1292_v39  ;;  %v1317_v40 = vmax.f32 %v3161_v15, 0.0  ;;  %v3162_v63 = vld [vmem:[#allocation11_spill] sm:$0xff]  ;;  %v1319_v38 = vmax.f32 %v3163_v4, 0.0  ;;  %v3164_v52 = vld [vmem:[#allocation9_spill] sm:$0xff] }
 0x1c0   :  { %1357 = vst [vmem:[%s3057_s4 + $0xb0] sm:$0xff] %v1293_v1  ;;  %1358 = vst [vmem:[%s3057_s4 + $0xb8] sm:$0xff] %v1294_v3  ;;  %v1318_v29 = vmax.f32 %v3162_v63, 0.0  ;;  %v1320_v21 = vmax.f32 %v3164_v52, 0.0  ;;  %v3165_v16 = vld [vmem:[#allocation14_spill] sm:$0xff]  ;;  %v1323_v6 = vmax.f32 %v2751_v56, 0.0 }
 0x1c1   :  { %1359 = vst [vmem:[%s3057_s4 + $0xc0] sm:$0xff] %v1295_v0  ;;  %1360 = vst [vmem:[%s3057_s4 + $0xc8] sm:$0xff] %v1296_v2  ;;  %v1321_v42 = vmax.f32 %v3165_v16, 0.0  ;;  %v3166_v9 = vld [vmem:[#allocation18_spill] sm:$0xff]  ;;  %v1324_v62 = vmax.f32 %v2755_v43, 0.0  ;;  %v1325_v53 = vmax.f32 %v2759_v47, 0.0 }
 0x1c2   :  { %1361 = vst [vmem:[%s3057_s4 + $0xd0] sm:$0xff] %v1297_v13  ;;  %1362 = vst [vmem:[%s3057_s4 + $0xd8] sm:$0xff] %v1298_v23  ;;  %v1322_v5 = vmax.f32 %v3166_v9, 0.0  ;;  %v1326_v34 = vmax.f32 %v2763_v24, 0.0  ;;  %v1327_v56 = vmax.f32 %v2767_v51, 0.0  ;;  %v1328_v43 = vmax.f32 %v2771_v30, 0.0 }
 0x1c3   :  { %1363 = vst [vmem:[%s3057_s4 + $0xe0] sm:$0xff] %v1299_v8  ;;  %1364 = vst [vmem:[%s3057_s4 + $0xe8] sm:$0xff] %v1300_v18  ;;  %v3167_v47 = vld [vmem:[#allocation12_spill] sm:$0xff]  ;;  %v3170_v25 = vld [vmem:[#allocation22_spill] sm:$0xff]  ;;  %v1334_v14 = vmax.f32 %v2795_v35, 0.0 }
 0x1c4   :  { %1365 = vst [vmem:[%s3057_s4 + $0xf0] sm:$0xff] %v1301_v32  ;;  %1366 = vst [vmem:[%s3057_s4 + $0xf8] sm:$0xff] %v1302_v41  ;;  %v1329_v24 = vmax.f32 %v3167_v47, 0.0  ;;  %v3168_v49 = vld [vmem:[#allocation16_spill] sm:$0xff]  ;;  %v1332_v11 = vmax.f32 %v3170_v25, 0.0  ;;  %v3171_v48 = vld [vmem:[#allocation19_spill] sm:$0xff] }
 0x1c5   :  { %1367 = vst [vmem:[%s3057_s4 + $0x100] sm:$0xff] %v1303_v27  ;;  %1368 = vst [vmem:[%s3057_s4 + $0x108] sm:$0xff] %v1304_v36  ;;  %v1330_v58 = vmax.f32 %v3168_v49, 0.0  ;;  %v3169_v51 = vld [vmem:[#allocation20_spill] sm:$0xff]  ;;  %v1333_v26 = vmax.f32 %v3171_v48, 0.0 }
 0x1c6   :  { %1369 = vst [vmem:[%s3057_s4 + $0x110] sm:$0xff] %v1305_v50  ;;  %1370 = vst [vmem:[%s3057_s4 + $0x118] sm:$0xff] %v1306_v59  ;;  %v1331_v30 = vmax.f32 %v3169_v51, 0.0 }
 0x1c7   :  { %1371 = vst [vmem:[%s3057_s4 + $0x120] sm:$0xff] %v1307_v45  ;;  %1372 = vst [vmem:[%s3057_s4 + $0x128] sm:$0xff] %v1308_v54 }
 0x1c8   :  { %1373 = vst [vmem:[%s3057_s4 + $0x130] sm:$0xff] %v1309_v12  ;;  %1374 = vst [vmem:[%s3057_s4 + $0x138] sm:$0xff] %v1310_v22 }
 0x1c9   :  { %1375 = vst [vmem:[%s3057_s4 + $0x140] sm:$0xff] %v1311_v7  ;;  %1376 = vst [vmem:[%s3057_s4 + $0x148] sm:$0xff] %v1312_v17 }
 0x1ca   :  { %1377 = vst [vmem:[%s3057_s4 + $0x150] sm:$0xff] %v1313_v37  ;;  %1378 = vst [vmem:[%s3057_s4 + $0x158] sm:$0xff] %v1314_v55 }
 0x1cb   :  { %1379 = vst [vmem:[%s3057_s4 + $0x160] sm:$0xff] %v1315_v28  ;;  %1380 = vst [vmem:[%s3057_s4 + $0x168] sm:$0xff] %v1316_v46 }
 0x1cc   :  { %1381 = vst [vmem:[%s3057_s4 + $0x170] sm:$0xff] %v1317_v40  ;;  %1382 = vst [vmem:[%s3057_s4 + $0x178] sm:$0xff] %v1318_v29 }
 0x1cd   :  { %1383 = vst [vmem:[%s3057_s4 + $0x180] sm:$0xff] %v1319_v38  ;;  %1384 = vst [vmem:[%s3057_s4 + $0x188] sm:$0xff] %v1320_v21 }
 0x1ce   :  { %1385 = vst [vmem:[%s3057_s4 + $0x190] sm:$0xff] %v1321_v42  ;;  %1386 = vst [vmem:[%s3057_s4 + $0x198] sm:$0xff] %v1322_v5 }
 0x1cf   :  { %1387 = vst [vmem:[%s3057_s4 + $0x1a0] sm:$0xff] %v1323_v6  ;;  %1388 = vst [vmem:[%s3057_s4 + $0x1a8] sm:$0xff] %v1324_v62 }
 0x1d0   :  { %1389 = vst [vmem:[%s3057_s4 + $0x1b0] sm:$0xff] %v1325_v53  ;;  %1390 = vst [vmem:[%s3057_s4 + $0x1b8] sm:$0xff] %v1326_v34 }
 0x1d1   :  { %1391 = vst [vmem:[%s3057_s4 + $0x1c0] sm:$0xff] %v1327_v56  ;;  %1392 = vst [vmem:[%s3057_s4 + $0x1c8] sm:$0xff] %v1328_v43 }
 0x1d2   :  { %1393 = vst [vmem:[%s3057_s4 + $0x1d0] sm:$0xff] %v1329_v24  ;;  %1394 = vst [vmem:[%s3057_s4 + $0x1d8] sm:$0xff] %v1330_v58 }
 0x1d3   :  { %1395 = vst [vmem:[%s3057_s4 + $0x1e0] sm:$0xff] %v1331_v30  ;;  %1396 = vst [vmem:[%s3057_s4 + $0x1e8] sm:$0xff] %v1332_v11 }
 0x1d4   :  { %1397 = vst [vmem:[%s3057_s4 + $0x1f0] sm:$0xff] %v1333_v26  ;;  %1398 = vst [vmem:[%s3057_s4 + $0x1f8] sm:$0xff] %v1334_v14 }

// kernel: generator_forward.7
= control target key start
LH: loop header
LB: loop body
LE: loop exit
PB: predicated region body
PF: predicated region fallthrough
CT: control target
= control target key end

     0   :  { %s3769_s9 = smov 0   ;;  %s3771_s10 = smov 0   ;;  %s4531_s0 = inlined_call_operand.vmem [shape: bf16[4,512,64], index: 0, kind: input, shape index: {}]   ;;  %s4532_s1 = inlined_call_operand.vmem [shape: bf16[4,64,128], index: 1, kind: input, shape index: {}]   ;;  %s4533_s2 = inlined_call_operand.vmem [shape: f32[4,512,128], index: 2, kind: output, shape index: {}]  }
   0x1   :  { %s3773_s11 = smov 0  }
   0x2 LB: > { %s2969_s12 = sadd.s32 4294967295, %s3752_s11   ;;  %s3786_s13 = sadd.s32 1, %s3752_s11   ;;  %s3752_s11 = sphi %s3773_s11, %s4537_s11   ;;  %s3748_s10 = sphi %s3771_s10, %s4536_s10   ;;  %s3744_s9 = sphi %s3769_s9, %s4535_s9  }
   0x3   : > { %s16_s14 = ssub.s32 %s3752_s11, %s3786_s13  ;;  %s19_s15 = sadd.s32 1, %s3748_s10 }
   0x4   : > { %p17_p0 = scmp.eq.s32.totalorder %s16_s14, 0  ;;  %p26_p1 = scmp.ne.s32.totalorder %s3748_s10, %s3744_s9 }
   0x5   : > { %p27_p2 = scmp.eq.s32.totalorder %s3752_s11, 0  ;;  %p77_p3 = scmp.eq.s32.totalorder %s2969_s12, 1 }
   0x6   : > { %s3797_s16 = scalar_select %p17_p0, %s3748_s10, %s19_s15  }
   0x7   : > { %p28_p4 = por %p27_p2, %p26_p1  ;;  %p3799_p5 = por %p77_p3, %p26_p1 }
   0x8   : > { %p2972_p6 = scmp.ge.s32.totalorder %s3752_s11, 2 }
   0xa   : > { %102 = sbr.rel (%p2972_p6) target bundleno = 51 (0x33), region = 20 }
   0xf   : > { %105 = sbr.rel (!%p28_p4) target bundleno = 51 (0x33), region = 24  ;;  %s107_s18 = sand.u32 (%p28_p4), 1, %s3748_s10  }
  0x10   : > { %s3128_s19 = sshll.u32 (%p28_p4), %s3752_s11, 7  ;;  %s2973_s20 = sshll.u32 (%p28_p4), %s107_s18, 9 }
  0x11   : > { %s3809_s23 = scalar_lea.vmem (%p28_p4), %s4531_s0, %s3128_s19  ;;  %s3814_s24 = scalar_lea.vmem (%p28_p4), [#allocation2], %s2973_s20 }
  0x12   : > { %v129_v0 = vld [vmem:[%s3809_s23] sm:$0xff] (%p28_p4)   ;;  %v133_v1 = vld [vmem:[%s3809_s23 + $0x8] sm:$0xff] (%p28_p4)   ;;  %v137_v2 = vld [vmem:[%s3809_s23 + $0x10] sm:$0xff] (%p28_p4)  }
  0x13   : > { %130 = vst [vmem:[%s3814_s24] sm:$0xff] (%p28_p4), %v129_v0   ;;  %134 = vst [vmem:[%s3814_s24 + $0x8] sm:$0xff] (%p28_p4), %v133_v1   ;;  %v141_v3 = vld [vmem:[%s3809_s23 + $0x18] sm:$0xff] (%p28_p4)   ;;  %v145_v4 = vld [vmem:[%s3809_s23 + $0x20] sm:$0xff] (%p28_p4)  }
  0x14   : > { %138 = vst [vmem:[%s3814_s24 + $0x10] sm:$0xff] %v137_v2   ;;  %v149_v5 = vld [vmem:[%s3809_s23 + $0x28] sm:$0xff]   ;;  %142 = vst [vmem:[%s3814_s24 + $0x18] sm:$0xff] %v141_v3   ;;  %v153_v6 = vld [vmem:[%s3809_s23 + $0x30] sm:$0xff]  }
  0x15   : > { %146 = vst [vmem:[%s3814_s24 + $0x20] sm:$0xff] %v145_v4   ;;  %150 = vst [vmem:[%s3814_s24 + $0x28] sm:$0xff] %v149_v5   ;;  %v157_v7 = vld [vmem:[%s3809_s23 + $0x38] sm:$0xff]   ;;  %v161_v8 = vld [vmem:[%s3809_s23 + $0x40] sm:$0xff]  }
  0x16   : > { %154 = vst [vmem:[%s3814_s24 + $0x30] sm:$0xff] %v153_v6   ;;  %158 = vst [vmem:[%s3814_s24 + $0x38] sm:$0xff] %v157_v7   ;;  %v165_v9 = vld [vmem:[%s3809_s23 + $0x48] sm:$0xff]   ;;  %v169_v10 = vld [vmem:[%s3809_s23 + $0x50] sm:$0xff]  }
  0x17   : > { %162 = vst [vmem:[%s3814_s24 + $0x40] sm:$0xff] %v161_v8   ;;  %v173_v11 = vld [vmem:[%s3809_s23 + $0x58] sm:$0xff]   ;;  %166 = vst [vmem:[%s3814_s24 + $0x48] sm:$0xff] %v165_v9   ;;  %v177_v12 = vld [vmem:[%s3809_s23 + $0x60] sm:$0xff]  }
  0x18   : > { %170 = vst [vmem:[%s3814_s24 + $0x50] sm:$0xff] %v169_v10   ;;  %174 = vst [vmem:[%s3814_s24 + $0x58] sm:$0xff] %v173_v11   ;;  %v181_v13 = vld [vmem:[%s3809_s23 + $0x68] sm:$0xff]   ;;  %v185_v14 = vld [vmem:[%s3809_s23 + $0x70] sm:$0xff]  }
  0x19   : > { %178 = vst [vmem:[%s3814_s24 + $0x60] sm:$0xff] %v177_v12   ;;  %182 = vst [vmem:[%s3814_s24 + $0x68] sm:$0xff] %v181_v13   ;;  %v189_v15 = vld [vmem:[%s3809_s23 + $0x78] sm:$0xff]   ;;  %v193_v16 = vld [vmem:[%s3809_s23 + $0x100] sm:$0xff]  }
  0x1a   : > { %186 = vst [vmem:[%s3814_s24 + $0x70] sm:$0xff] %v185_v14   ;;  %v197_v17 = vld [vmem:[%s3809_s23 + $0x108] sm:$0xff]   ;;  %190 = vst [vmem:[%s3814_s24 + $0x78] sm:$0xff] %v189_v15   ;;  %v201_v18 = vld [vmem:[%s3809_s23 + $0x110] sm:$0xff]  }
  0x1b   : > { %194 = vst [vmem:[%s3814_s24 + $0x80] sm:$0xff] %v193_v16   ;;  %198 = vst [vmem:[%s3814_s24 + $0x88] sm:$0xff] %v197_v17   ;;  %v205_v19 = vld [vmem:[%s3809_s23 + $0x118] sm:$0xff]   ;;  %v209_v20 = vld [vmem:[%s3809_s23 + $0x120] sm:$0xff]  }
  0x1c   : > { %202 = vst [vmem:[%s3814_s24 + $0x90] sm:$0xff] %v201_v18   ;;  %206 = vst [vmem:[%s3814_s24 + $0x98] sm:$0xff] %v205_v19   ;;  %v213_v21 = vld [vmem:[%s3809_s23 + $0x128] sm:$0xff]   ;;  %v217_v22 = vld [vmem:[%s3809_s23 + $0x130] sm:$0xff]  }
  0x1d   : > { %210 = vst [vmem:[%s3814_s24 + $0xa0] sm:$0xff] %v209_v20   ;;  %v221_v23 = vld [vmem:[%s3809_s23 + $0x138] sm:$0xff]   ;;  %214 = vst [vmem:[%s3814_s24 + $0xa8] sm:$0xff] %v213_v21   ;;  %v225_v24 = vld [vmem:[%s3809_s23 + $0x140] sm:$0xff]  }
  0x1e   : > { %218 = vst [vmem:[%s3814_s24 + $0xb0] sm:$0xff] %v217_v22   ;;  %222 = vst [vmem:[%s3814_s24 + $0xb8] sm:$0xff] %v221_v23   ;;  %v229_v25 = vld [vmem:[%s3809_s23 + $0x148] sm:$0xff]   ;;  %v233_v26 = vld [vmem:[%s3809_s23 + $0x150] sm:$0xff]  }
  0x1f   : > { %226 = vst [vmem:[%s3814_s24 + $0xc0] sm:$0xff] %v225_v24   ;;  %230 = vst [vmem:[%s3814_s24 + $0xc8] sm:$0xff] %v229_v25   ;;  %v237_v27 = vld [vmem:[%s3809_s23 + $0x158] sm:$0xff]   ;;  %v241_v28 = vld [vmem:[%s3809_s23 + $0x160] sm:$0xff]  }
  0x20   : > { %234 = vst [vmem:[%s3814_s24 + $0xd0] sm:$0xff] %v233_v26   ;;  %v245_v29 = vld [vmem:[%s3809_s23 + $0x168] sm:$0xff]   ;;  %238 = vst [vmem:[%s3814_s24 + $0xd8] sm:$0xff] %v237_v27   ;;  %v249_v30 = vld [vmem:[%s3809_s23 + $0x170] sm:$0xff]  }
  0x21   : > { %242 = vst [vmem:[%s3814_s24 + $0xe0] sm:$0xff] %v241_v28   ;;  %246 = vst [vmem:[%s3814_s24 + $0xe8] sm:$0xff] %v245_v29   ;;  %v253_v31 = vld [vmem:[%s3809_s23 + $0x178] sm:$0xff]   ;;  %v257_v32 = vld [vmem:[%s3809_s23 + $0x200] sm:$0xff]  }
  0x22   : > { %250 = vst [vmem:[%s3814_s24 + $0xf0] sm:$0xff] %v249_v30   ;;  %254 = vst [vmem:[%s3814_s24 + $0xf8] sm:$0xff] %v253_v31   ;;  %v261_v33 = vld [vmem:[%s3809_s23 + $0x208] sm:$0xff]   ;;  %v265_v34 = vld [vmem:[%s3809_s23 + $0x210] sm:$0xff]  }
  0x23   : > { %258 = vst [vmem:[%s3814_s24 + $0x100] sm:$0xff] %v257_v32   ;;  %v269_v35 = vld [vmem:[%s3809_s23 + $0x218] sm:$0xff]   ;;  %262 = vst [vmem:[%s3814_s24 + $0x108] sm:$0xff] %v261_v33   ;;  %v273_v36 = vld [vmem:[%s3809_s23 + $0x220] sm:$0xff]  }
  0x24   : > { %266 = vst [vmem:[%s3814_s24 + $0x110] sm:$0xff] %v265_v34   ;;  %270 = vst [vmem:[%s3814_s24 + $0x118] sm:$0xff] %v269_v35   ;;  %v277_v37 = vld [vmem:[%s3809_s23 + $0x228] sm:$0xff]   ;;  %v281_v38 = vld [vmem:[%s3809_s23 + $0x230] sm:$0xff]  }
  0x25   : > { %274 = vst [vmem:[%s3814_s24 + $0x120] sm:$0xff] %v273_v36   ;;  %278 = vst [vmem:[%s3814_s24 + $0x128] sm:$0xff] %v277_v37   ;;  %v285_v39 = vld [vmem:[%s3809_s23 + $0x238] sm:$0xff]   ;;  %v289_v40 = vld [vmem:[%s3809_s23 + $0x240] sm:$0xff]  }
  0x26   : > { %282 = vst [vmem:[%s3814_s24 + $0x130] sm:$0xff] %v281_v38   ;;  %v293_v41 = vld [vmem:[%s3809_s23 + $0x248] sm:$0xff]   ;;  %286 = vst [vmem:[%s3814_s24 + $0x138] sm:$0xff] %v285_v39   ;;  %v297_v42 = vld [vmem:[%s3809_s23 + $0x250] sm:$0xff]  }
  0x27   : > { %290 = vst [vmem:[%s3814_s24 + $0x140] sm:$0xff] %v289_v40   ;;  %294 = vst [vmem:[%s3814_s24 + $0x148] sm:$0xff] %v293_v41   ;;  %v301_v43 = vld [vmem:[%s3809_s23 + $0x258] sm:$0xff]   ;;  %v305_v44 = vld [vmem:[%s3809_s23 + $0x260] sm:$0xff]  }
  0x28   : > { %298 = vst [vmem:[%s3814_s24 + $0x150] sm:$0xff] %v297_v42   ;;  %302 = vst [vmem:[%s3814_s24 + $0x158] sm:$0xff] %v301_v43   ;;  %v309_v45 = vld [vmem:[%s3809_s23 + $0x268] sm:$0xff]   ;;  %v313_v46 = vld [vmem:[%s3809_s23 + $0x270] sm:$0xff]  }
  0x29   : > { %306 = vst [vmem:[%s3814_s24 + $0x160] sm:$0xff] %v305_v44   ;;  %v317_v47 = vld [vmem:[%s3809_s23 + $0x278] sm:$0xff]   ;;  %310 = vst [vmem:[%s3814_s24 + $0x168] sm:$0xff] %v309_v45   ;;  %v321_v48 = vld [vmem:[%s3809_s23 + $0x300] sm:$0xff]  }
  0x2a   : > { %314 = vst [vmem:[%s3814_s24 + $0x170] sm:$0xff] %v313_v46   ;;  %318 = vst [vmem:[%s3814_s24 + $0x178] sm:$0xff] %v317_v47   ;;  %v325_v49 = vld [vmem:[%s3809_s23 + $0x308] sm:$0xff]   ;;  %v329_v50 = vld [vmem:[%s3809_s23 + $0x310] sm:$0xff]  }
  0x2b   : > { %322 = vst [vmem:[%s3814_s24 + $0x180] sm:$0xff] %v321_v48   ;;  %326 = vst [vmem:[%s3814_s24 + $0x188] sm:$0xff] %v325_v49   ;;  %v333_v51 = vld [vmem:[%s3809_s23 + $0x318] sm:$0xff]   ;;  %v337_v52 = vld [vmem:[%s3809_s23 + $0x320] sm:$0xff]  }
  0x2c   : > { %330 = vst [vmem:[%s3814_s24 + $0x190] sm:$0xff] %v329_v50   ;;  %v341_v53 = vld [vmem:[%s3809_s23 + $0x328] sm:$0xff]   ;;  %334 = vst [vmem:[%s3814_s24 + $0x198] sm:$0xff] %v333_v51   ;;  %v345_v54 = vld [vmem:[%s3809_s23 + $0x330] sm:$0xff]  }
  0x2d   : > { %338 = vst [vmem:[%s3814_s24 + $0x1a0] sm:$0xff] %v337_v52   ;;  %342 = vst [vmem:[%s3814_s24 + $0x1a8] sm:$0xff] %v341_v53   ;;  %v349_v55 = vld [vmem:[%s3809_s23 + $0x338] sm:$0xff]   ;;  %v353_v56 = vld [vmem:[%s3809_s23 + $0x340] sm:$0xff]  }
  0x2e   : > { %346 = vst [vmem:[%s3814_s24 + $0x1b0] sm:$0xff] %v345_v54   ;;  %350 = vst [vmem:[%s3814_s24 + $0x1b8] sm:$0xff] %v349_v55   ;;  %v357_v57 = vld [vmem:[%s3809_s23 + $0x348] sm:$0xff]   ;;  %v361_v58 = vld [vmem:[%s3809_s23 + $0x350] sm:$0xff]  }
  0x2f   : > { %354 = vst [vmem:[%s3814_s24 + $0x1c0] sm:$0xff] %v353_v56   ;;  %v365_v59 = vld [vmem:[%s3809_s23 + $0x358] sm:$0xff]   ;;  %358 = vst [vmem:[%s3814_s24 + $0x1c8] sm:$0xff] %v357_v57   ;;  %v369_v60 = vld [vmem:[%s3809_s23 + $0x360] sm:$0xff]  }
  0x30   : > { %362 = vst [vmem:[%s3814_s24 + $0x1d0] sm:$0xff] %v361_v58   ;;  %366 = vst [vmem:[%s3814_s24 + $0x1d8] sm:$0xff] %v365_v59   ;;  %v373_v61 = vld [vmem:[%s3809_s23 + $0x368] sm:$0xff]   ;;  %v377_v62 = vld [vmem:[%s3809_s23 + $0x370] sm:$0xff]  }
  0x31   : > { %370 = vst [vmem:[%s3814_s24 + $0x1e0] sm:$0xff] %v369_v60   ;;  %374 = vst [vmem:[%s3814_s24 + $0x1e8] sm:$0xff] %v373_v61   ;;  %v381_v63 = vld [vmem:[%s3809_s23 + $0x378] sm:$0xff]  }
  0x32   : > { %378 = vst [vmem:[%s3814_s24 + $0x1f0] sm:$0xff] %v377_v62   ;;  %382 = vst [vmem:[%s3814_s24 + $0x1f8] sm:$0xff] %v381_v63  }
  0x33 PF: > { %p2976_p7 = scmp.ge.s32.totalorder %s3752_s11, 1  ;;  %p663_p8 = scmp.lt.s32.totalorder %s3752_s11, 3 }
  0x35   : > { %p664_p9 = pnand %p2976_p7, %p663_p8 }
  0x36   : > { %s670_s27 = sand.u32 (!%p664_p9), 1, %s3744_s9  }
  0x37   : > { %667 = sbr.rel (%p664_p9) target bundleno = 457 (0x1c9), region = 65  ;;  %s2977_s4 = sshll.u32 (!%p664_p9), %s670_s27, 9 }
  0x38   : > { %s3970_s22 = scalar_lea.vmem (!%p664_p9), [#allocation2], %s2977_s4  ;;  %s2978_s19 = sshll.u32 (!%p664_p9), %s670_s27, 10 }
  0x39   : > { %s4126_s20 = scalar_lea.vmem (!%p664_p9), [#allocation3], %s2978_s19 }
  0x3c   : > { %v3394_v0 = vld [vmem:[%s4532_s1 + $0x18] sm:$0xff]   ;;  %v3396_v2 = vld [vmem:[%s4532_s1 + $0x10] sm:$0xff]   ;;  %v3398_v4 = vld [vmem:[%s4532_s1 + $0x8] sm:$0xff]   ;;  %vm957_vm0 = vcmask 523264   ;;  %s3129_s9 = sshll.u32 (%p3799_p5), %s2969_s12, 8 }
  0x3d   : > { %v3395_v1 = vld [vmem:[%s4532_s1 + $0x38] sm:$0xff]   ;;  %3210 = vmatprep.subr.bf16.mxu0 %v3394_v0  ;;  %v3397_v3 = vld [vmem:[%s4532_s1 + $0x30] sm:$0xff]   ;;  %v3399_v5 = vld [vmem:[%s4532_s1 + $0x28] sm:$0xff]   ;;  %s4266_s17 = scalar_lea.vmem (%p3799_p5), %s4533_s2, %s3129_s9 }
  0x3e   : > { %3250 = vmatprep.subr.bf16.mxu1 %v3395_v1  ;;  %3211 = vmatpush3.bf16.msra.mxu0 %v3394_v0  ;;  %v3400_v6 = vld [vmem:[%s4532_s1] sm:$0xff]   ;;  %v3406_v10 = vld [vmem:[%s4532_s1 + $0x58] sm:$0xff]   ;;  %v3404_v12 = vld [vmem:[%s3970_s22 + $0x8] sm:$0xff]  }
  0x3f   : > { %3251 = vmatpush3.bf16.msra.mxu1 %v3395_v1  ;;  %3212 = vmatprep.subr.bf16.mxu0 %v3396_v2  ;;  %v3401_v7 = vld [vmem:[%s4532_s1 + $0x20] sm:$0xff]   ;;  %v3407_v11 = vld [vmem:[%s4532_s1 + $0x78] sm:$0xff]   ;;  %v3405_v13 = vld [vmem:[%s3970_s22 + $0x88] sm:$0xff]  }
  0x40   : > { %3252 = vmatprep.subr.bf16.mxu1 %v3397_v3  ;;  %v3402_v8 = vld [vmem:[%s3970_s22] sm:$0xff]   ;;  %v3408_v14 = vld [vmem:[%s3970_s22 + $0x10] sm:$0xff]   ;;  %v3410_v16 = vld [vmem:[%s3970_s22 + $0x18] sm:$0xff]  }
  0x41   : > { %v3403_v9 = vld [vmem:[%s3970_s22 + $0x80] sm:$0xff]   ;;  %3218 = vmatprep.mubr.msk.bf16.mxu0 %vm957_vm0, %v3402_v8  ;;  %v3409_v15 = vld [vmem:[%s3970_s22 + $0x90] sm:$0xff]   ;;  %v3411_v17 = vld [vmem:[%s3970_s22 + $0x98] sm:$0xff]  }
  0x42   : > { %3213 = vmatpush3.bf16.msra.mxu0 %v3396_v2  ;;  %3258 = vmatprep.mubr.msk.bf16.mxu1 %vm957_vm0, %v3403_v9  ;;  %v3412_v18 = vld [vmem:[%s3970_s22 + $0x20] sm:$0xff]   ;;  %v3416_v19 = vld [vmem:[%s4532_s1 + $0x50] sm:$0xff]   ;;  %v3414_v22 = vld [vmem:[%s3970_s22 + $0x28] sm:$0xff]  }
  0x43   : > { %3253 = vmatpush3.bf16.msra.mxu1 %v3397_v3  ;;  %3214 = vmatprep.subr.bf16.mxu0 %v3398_v4  ;;  %v3417_v20 = vld [vmem:[%s4532_s1 + $0x70] sm:$0xff]   ;;  %v3413_v21 = vld [vmem:[%s3970_s22 + $0xa0] sm:$0xff]   ;;  %v3415_v23 = vld [vmem:[%s3970_s22 + $0xa8] sm:$0xff]  }
  0x44   : > { %3254 = vmatprep.subr.bf16.mxu1 %v3399_v5  ;;  %v3418_v24 = vld [vmem:[%s3970_s22 + $0x30] sm:$0xff]   ;;  %v3426_v26 = vld [vmem:[%s4532_s1 + $0x48] sm:$0xff]   ;;  %v3420_v28 = vld [vmem:[%s3970_s22 + $0x38] sm:$0xff]  }
  0x45   : > { %v3419_v25 = vld [vmem:[%s3970_s22 + $0xb0] sm:$0xff]   ;;  %v3427_v27 = vld [vmem:[%s4532_s1 + $0x68] sm:$0xff]   ;;  %v3421_v29 = vld [vmem:[%s3970_s22 + $0xb8] sm:$0xff]  }
  0x46   : > { %3215 = vmatpush3.bf16.msra.mxu0 %v3398_v4  ;;  %v3422_v30 = vld [vmem:[%s3970_s22 + $0x40] sm:$0xff]   ;;  %v3424_v34 = vld [vmem:[%s3970_s22 + $0x48] sm:$0xff]   ;;  %v3428_v36 = vld [vmem:[%s3970_s22 + $0x50] sm:$0xff]  }
  0x47   : > { %3255 = vmatpush3.bf16.msra.mxu1 %v3399_v5  ;;  %3216 = vmatprep.subr.bf16.mxu0 %v3400_v6  ;;  %v3423_v31 = vld [vmem:[%s3970_s22 + $0xc0] sm:$0xff]   ;;  %v3425_v35 = vld [vmem:[%s3970_s22 + $0xc8] sm:$0xff]   ;;  %v3429_v37 = vld [vmem:[%s3970_s22 + $0xd0] sm:$0xff]  }
  0x48   : > { %3256 = vmatprep.subr.bf16.mxu1 %v3401_v7  ;;  %v3436_v32 = vld [vmem:[%s4532_s1 + $0x40] sm:$0xff]   ;;  %v3430_v38 = vld [vmem:[%s3970_s22 + $0x58] sm:$0xff]   ;;  %v3434_v42 = vld [vmem:[%s3970_s22 + $0x68] sm:$0xff]  }
  0x49   : > { %v3437_v33 = vld [vmem:[%s4532_s1 + $0x60] sm:$0xff]   ;;  %v3431_v39 = vld [vmem:[%s3970_s22 + $0xd8] sm:$0xff]   ;;  %v3435_v43 = vld [vmem:[%s3970_s22 + $0xe8] sm:$0xff]  }
  0x4a   : > { %3217 = vmatpush3.bf16.msra.mxu0 %v3400_v6  ;;  %v3432_v40 = vld [vmem:[%s3970_s22 + $0x60] sm:$0xff]   ;;  %v3438_v44 = vld [vmem:[%s3970_s22 + $0x70] sm:$0xff]   ;;  %v3440_v46 = vld [vmem:[%s3970_s22 + $0x78] sm:$0xff]  }
  0x4b   : > { %3257 = vmatpush3.bf16.msra.mxu1 %v3401_v7  ;;  %3290 = vmatprep.subr.bf16.mxu0 %v3406_v10  ;;  %v3433_v41 = vld [vmem:[%s3970_s22 + $0xe0] sm:$0xff]   ;;  %v3439_v45 = vld [vmem:[%s3970_s22 + $0xf0] sm:$0xff]   ;;  %v3441_v47 = vld [vmem:[%s3970_s22 + $0xf8] sm:$0xff]  }
  0x4c   : > { %3330 = vmatprep.subr.bf16.mxu1 %v3407_v11  ;;  %v3442_v48 = vld [vmem:[%s3970_s22 + $0x100] sm:$0xff]   ;;  %v3444_v50 = vld [vmem:[%s3970_s22 + $0x108] sm:$0xff]   ;;  %v3446_v52 = vld [vmem:[%s3970_s22 + $0x110] sm:$0xff]  }
  0x4d   : > { %3219 = vmatmul.mubr.msk.bf16.vlgmr.msra.gmra.mxu0 %vm957_vm0, %v3404_v12  ;;  %v3443_v49 = vld [vmem:[%s3970_s22 + $0x180] sm:$0xff]   ;;  %v3445_v51 = vld [vmem:[%s3970_s22 + $0x188] sm:$0xff]   ;;  %v3447_v53 = vld [vmem:[%s3970_s22 + $0x190] sm:$0xff]  }
  0x4e   : > { %3259 = vmatmul.mubr.msk.bf16.vlgmr.msra.gmra.mxu1 %vm957_vm0, %v3405_v13  ;;  %3291 = vmatpush3.bf16.msra.mxu0 %v3406_v10  ;;  %v3448_v54 = vld [vmem:[%s3970_s22 + $0x118] sm:$0xff]   ;;  %v3450_v56 = vld [vmem:[%s3970_s22 + $0x120] sm:$0xff]   ;;  %v3452_v58 = vld [vmem:[%s3970_s22 + $0x128] sm:$0xff]  }
  0x4f   : > { %3331 = vmatpush3.bf16.msra.mxu1 %v3407_v11  ;;  %3222 = vmatprep.mubr.msk.bf16.mxu0 %vm957_vm0, %v3408_v14  ;;  %v3449_v55 = vld [vmem:[%s3970_s22 + $0x198] sm:$0xff]   ;;  %v3451_v57 = vld [vmem:[%s3970_s22 + $0x1a0] sm:$0xff]   ;;  %v3453_v59 = vld [vmem:[%s3970_s22 + $0x1a8] sm:$0xff]  }
  0x50   : > { %3262 = vmatprep.mubr.msk.bf16.mxu1 %vm957_vm0, %v3409_v15  ;;  %3292 = vmatprep.subr.bf16.mxu0 %v3416_v19  ;;  %v3454_v60 = vld [vmem:[%s3970_s22 + $0x130] sm:$0xff]   ;;  %v3456_v62 = vld [vmem:[%s3970_s22 + $0x138] sm:$0xff]   ;;  %v3458_v0 = vld [vmem:[%s3970_s22 + $0x140] sm:$0xff]  }
  0x51   : > { %3332 = vmatprep.subr.bf16.mxu1 %v3417_v20  ;;  %v3455_v61 = vld [vmem:[%s3970_s22 + $0x1b0] sm:$0xff]   ;;  %v3457_v63 = vld [vmem:[%s3970_s22 + $0x1b8] sm:$0xff]   ;;  %v3459_v1 = vld [vmem:[%s3970_s22 + $0x1c0] sm:$0xff]  }
  0x52   : > { %3293 = vmatpush3.bf16.msra.mxu0 %v3416_v19  ;;  %v3460_v2 = vld [vmem:[%s3970_s22 + $0x148] sm:$0xff]   ;;  %v3462_v4 = vld [vmem:[%s3970_s22 + $0x150] sm:$0xff]   ;;  %v3464_v6 = vld [vmem:[%s3970_s22 + $0x158] sm:$0xff]  }
  0x53   : > { %3333 = vmatpush3.bf16.msra.mxu1 %v3417_v20  ;;  %3294 = vmatprep.subr.bf16.mxu0 %v3426_v26  ;;  %v3461_v3 = vld [vmem:[%s3970_s22 + $0x1c8] sm:$0xff]   ;;  %v3463_v5 = vld [vmem:[%s3970_s22 + $0x1d0] sm:$0xff]   ;;  %v3465_v7 = vld [vmem:[%s3970_s22 + $0x1d8] sm:$0xff]  }
  0x54   : > { %3334 = vmatprep.subr.bf16.mxu1 %v3427_v27  ;;  %v3466_v8 = vld [vmem:[%s3970_s22 + $0x160] sm:$0xff]   ;;  %v3468_v10 = vld [vmem:[%s3970_s22 + $0x168] sm:$0xff]   ;;  %v3470_v12 = vld [vmem:[%s3970_s22 + $0x170] sm:$0xff]  }
  0x55   : > { %3223 = vmatmul.mubr.msk.bf16.gmra.mxu0 %vm957_vm0, %v3410_v16  ;;  %v3467_v9 = vld [vmem:[%s3970_s22 + $0x1e0] sm:$0xff]   ;;  %v3469_v11 = vld [vmem:[%s3970_s22 + $0x1e8] sm:$0xff]   ;;  %v3471_v13 = vld [vmem:[%s3970_s22 + $0x1f0] sm:$0xff]  }
  0x56   : > { %3263 = vmatmul.mubr.msk.bf16.gmra.mxu1 %vm957_vm0, %v3411_v17  ;;  %3226 = vmatprep.mubr.msk.bf16.mxu0 %vm957_vm0, %v3412_v18  ;;  %v3472_v14 = vld [vmem:[%s3970_s22 + $0x178] sm:$0xff]  }
  0x57   : > { %3266 = vmatprep.mubr.msk.bf16.mxu1 %vm957_vm0, %v3413_v21  ;;  %3295 = vmatpush3.bf16.msra.mxu0 %v3426_v26  ;;  %v3473_v15 = vld [vmem:[%s3970_s22 + $0x1f8] sm:$0xff]  }
  0x58   : > { %3335 = vmatpush3.bf16.msra.mxu1 %v3427_v27  ;;  %3296 = vmatprep.subr.bf16.mxu0 %v3436_v32 }
  0x59   : > { %3336 = vmatprep.subr.bf16.mxu1 %v3437_v33 }
  0x5b   : > { %3297 = vmatpush3.bf16.msra.mxu0 %v3436_v32 }
  0x5c   : > { %3337 = vmatpush3.bf16.msra.mxu1 %v3437_v33 }
  0x5d   : > { %3227 = vmatmul.mubr.msk.bf16.gmra.mxu0 %vm957_vm0, %v3414_v22 }
  0x5e   : > { %3267 = vmatmul.mubr.msk.bf16.gmra.mxu1 %vm957_vm0, %v3415_v23  ;;  %3230 = vmatprep.mubr.msk.bf16.mxu0 %vm957_vm0, %v3418_v24 }
  0x5f   : > { %3270 = vmatprep.mubr.msk.bf16.mxu1 %vm957_vm0, %v3419_v25 }
  0x65   : > { %3231 = vmatmul.mubr.msk.bf16.gmra.mxu0 %vm957_vm0, %v3420_v28 }
  0x66   : > { %3271 = vmatmul.mubr.msk.bf16.gmra.mxu1 %vm957_vm0, %v3421_v29  ;;  %3234 = vmatprep.mubr.msk.bf16.mxu0 %vm957_vm0, %v3422_v30 }
  0x67   : > { %3274 = vmatprep.mubr.msk.bf16.mxu1 %vm957_vm0, %v3423_v31 }
  0x6d   : > { %3235 = vmatmul.mubr.msk.bf16.gmra.mxu0 %vm957_vm0, %v3424_v34 }
  0x6e   : > { %3275 = vmatmul.mubr.msk.bf16.gmra.mxu1 %vm957_vm0, %v3425_v35  ;;  %3238 = vmatprep.mubr.msk.bf16.mxu0 %vm957_vm0, %v3428_v36 }
  0x6f   : > { %3278 = vmatprep.mubr.msk.bf16.mxu1 %vm957_vm0, %v3429_v37 }
  0x75   : > { %3239 = vmatmul.mubr.msk.bf16.gmra.mxu0 %vm957_vm0, %v3430_v38 }
  0x76   : > { %3279 = vmatmul.mubr.msk.bf16.gmra.mxu1 %vm957_vm0, %v3431_v39  ;;  %3242 = vmatprep.mubr.msk.bf16.mxu0 %vm957_vm0, %v3432_v40 }
  0x77   : > { %3282 = vmatprep.mubr.msk.bf16.mxu1 %vm957_vm0, %v3433_v41 }
  0x7d   : > { %3243 = vmatmul.mubr.msk.bf16.gmra.mxu0 %vm957_vm0, %v3434_v42 }
  0x7e   : > { %3283 = vmatmul.mubr.msk.bf16.gmra.mxu1 %vm957_vm0, %v3435_v43  ;;  %3246 = vmatprep.mubr.msk.bf16.mxu0 %vm957_vm0, %v3438_v44 }
  0x7f   : > { %3286 = vmatprep.mubr.msk.bf16.mxu1 %vm957_vm0, %v3439_v45 }
  0x85   : > { %3247 = vmatmul.mubr.msk.bf16.gmra.mxu0 %vm957_vm0, %v3440_v46 }
  0x86   : > { %3287 = vmatmul.mubr.msk.bf16.gmra.mxu1 %vm957_vm0, %v3441_v47  ;;  %3298 = vmatprep.mubr.msk.bf16.mxu0 %vm957_vm0, %v3442_v48 }
  0x87   : > { %3338 = vmatprep.mubr.msk.bf16.mxu1 %vm957_vm0, %v3443_v49 }
  0x8d   : > { %3299 = vmatmul.mubr.msk.bf16.vlgmr.msra.gmra.mxu0 %vm957_vm0, %v3444_v50 }
  0x8e   : > { %3339 = vmatmul.mubr.msk.bf16.vlgmr.msra.gmra.mxu1 %vm957_vm0, %v3445_v51  ;;  %3302 = vmatprep.mubr.msk.bf16.mxu0 %vm957_vm0, %v3446_v52 }
  0x8f   : > { %3342 = vmatprep.mubr.msk.bf16.mxu1 %vm957_vm0, %v3447_v53 }
  0x95   : > { %3303 = vmatmul.mubr.msk.bf16.gmra.mxu0 %vm957_vm0, %v3448_v54 }
  0x96   : > { %3343 = vmatmul.mubr.msk.bf16.gmra.mxu1 %vm957_vm0, %v3449_v55  ;;  %3306 = vmatprep.mubr.msk.bf16.mxu0 %vm957_vm0, %v3450_v56 }
  0x97   : > { %3346 = vmatprep.mubr.msk.bf16.mxu1 %vm957_vm0, %v3451_v57 }
  0x9d   : > { %3307 = vmatmul.mubr.msk.bf16.gmra.mxu0 %vm957_vm0, %v3452_v58 }
  0x9e   : > { %3347 = vmatmul.mubr.msk.bf16.gmra.mxu1 %vm957_vm0, %v3453_v59  ;;  %3310 = vmatprep.mubr.msk.bf16.mxu0 %vm957_vm0, %v3454_v60 }
  0x9f   : > { %3350 = vmatprep.mubr.msk.bf16.mxu1 %vm957_vm0, %v3455_v61 }
  0xa5   : > { %3311 = vmatmul.mubr.msk.bf16.gmra.mxu0 %vm957_vm0, %v3456_v62 }
  0xa6   : > { %3351 = vmatmul.mubr.msk.bf16.gmra.mxu1 %vm957_vm0, %v3457_v63  ;;  %3314 = vmatprep.mubr.msk.bf16.mxu0 %vm957_vm0, %v3458_v0 }
  0xa7   : > { %3354 = vmatprep.mubr.msk.bf16.mxu1 %vm957_vm0, %v3459_v1 }
  0xad   : > { %3315 = vmatmul.mubr.msk.bf16.gmra.mxu0 %vm957_vm0, %v3460_v2 }
  0xae   : > { %3355 = vmatmul.mubr.msk.bf16.gmra.mxu1 %vm957_vm0, %v3461_v3  ;;  %3318 = vmatprep.mubr.msk.bf16.mxu0 %vm957_vm0, %v3462_v4 }
  0xaf   : > { %3358 = vmatprep.mubr.msk.bf16.mxu1 %vm957_vm0, %v3463_v5 }
  0xb5   : > { %3319 = vmatmul.mubr.msk.bf16.gmra.mxu0 %vm957_vm0, %v3464_v6 }
  0xb6   : > { %3359 = vmatmul.mubr.msk.bf16.gmra.mxu1 %vm957_vm0, %v3465_v7  ;;  %3322 = vmatprep.mubr.msk.bf16.mxu0 %vm957_vm0, %v3466_v8 }
  0xb7   : > { %3362 = vmatprep.mubr.msk.bf16.mxu1 %vm957_vm0, %v3467_v9 }
  0xbd   : > { %3323 = vmatmul.mubr.msk.bf16.gmra.mxu0 %vm957_vm0, %v3468_v10 }
  0xbe   : > { %3363 = vmatmul.mubr.msk.bf16.gmra.mxu1 %vm957_vm0, %v3469_v11  ;;  %3326 = vmatprep.mubr.msk.bf16.mxu0 %vm957_vm0, %v3470_v12 }
  0xbf   : > { %3366 = vmatprep.mubr.msk.bf16.mxu1 %vm957_vm0, %v3471_v13 }
  0xc5   : > { %3327 = vmatmul.mubr.msk.bf16.gmra.mxu0 %vm957_vm0, %v3472_v14 }
  0xc6   : > { %3367 = vmatmul.mubr.msk.bf16.gmra.mxu1 %vm957_vm0, %v3473_v15 }
 0x10d   : > { %v3220_v16 = vpop.f32.mrf.mxu0 }
 0x10e   : > { %3474 = vtanh.f32 %v3220_v16  ;;  %v3260_v17 = vpop.f32.mrf.mxu1 }
 0x10f   : > { %3476 = vtanh.f32 %v3260_v17  ;;  %v1040_v18 = vpop.f32.mrf.mxu0 }
 0x110   : > { %3478 = vtanh.f32 %v1040_v18  ;;  %v1353_v19 = vpop.f32.mrf.mxu1 }
 0x111   : > { %3480 = vtanh.f32 %v1353_v19  ;;  %v3221_v20 = vpop.f32.mrf.mxu0 }
 0x112   : > { %3482 = vtanh.f32 %v3221_v20  ;;  %v3261_v21 = vpop.f32.mrf.mxu1 }
 0x113   : > { %3484 = vtanh.f32 %v3261_v21  ;;  %v1043_v22 = vpop.f32.mrf.mxu0 }
 0x114   : > { %3486 = vtanh.f32 %v1043_v22  ;;  %v1356_v23 = vpop.f32.mrf.mxu1 }
 0x115   : > { %3488 = vtanh.f32 %v1356_v23  ;;  %v3224_v24 = vpop.f32.mrf.mxu0 }
 0x116   : > { %3490 = vtanh.f32 %v3224_v24  ;;  %v3264_v25 = vpop.f32.mrf.mxu1 }
 0x117   : > { %3492 = vtanh.f32 %v3264_v25  ;;  %v1056_v26 = vpop.f32.mrf.mxu0 }
 0x118   : > { %3494 = vtanh.f32 %v1056_v26  ;;  %v1369_v27 = vpop.f32.mrf.mxu1 }
 0x119   : > { %3496 = vtanh.f32 %v1369_v27  ;;  %v3225_v28 = vpop.f32.mrf.mxu0 }
 0x11a   : > { %3498 = vtanh.f32 %v3225_v28  ;;  %v3265_v29 = vpop.f32.mrf.mxu1 }
 0x11b   : > { %v3475_v30 = vpop.eup %3474  ;;  %3500 = vtanh.f32 %v3265_v29  ;;  %v1059_v31 = vpop.f32.mrf.mxu0 }
 0x11c   : > { %v3477_v32 = vpop.eup %3476  ;;  %2236 = vst [vmem:[%s4126_s20 + $0x10] sm:$0xff] %v3475_v30  ;;  %3502 = vtanh.f32 %v1059_v31  ;;  %v1372_v33 = vpop.f32.mrf.mxu1 }
 0x11d   : > { %v3479_v34 = vpop.eup %3478  ;;  %2268 = vst [vmem:[%s4126_s20 + $0x110] sm:$0xff] %v3477_v32  ;;  %3504 = vtanh.f32 %v1372_v33  ;;  %v3228_v35 = vpop.f32.mrf.mxu0 }
 0x11e   : > { %v3481_v36 = vpop.eup %3480  ;;  %2234 = vst [vmem:[%s4126_s20] sm:$0xff] %v3479_v34  ;;  %3506 = vtanh.f32 %v3228_v35  ;;  %v3268_v37 = vpop.f32.mrf.mxu1 }
 0x11f   : > { %v3483_v38 = vpop.eup %3482  ;;  %2266 = vst [vmem:[%s4126_s20 + $0x100] sm:$0xff] %v3481_v36  ;;  %3508 = vtanh.f32 %v3268_v37  ;;  %v1072_v39 = vpop.f32.mrf.mxu0 }
 0x120   : > { %v3485_v40 = vpop.eup %3484  ;;  %2237 = vst [vmem:[%s4126_s20 + $0x18] sm:$0xff] %v3483_v38  ;;  %3510 = vtanh.f32 %v1072_v39  ;;  %v1385_v41 = vpop.f32.mrf.mxu1 }
 0x121   : > { %v3487_v42 = vpop.eup %3486  ;;  %2269 = vst [vmem:[%s4126_s20 + $0x118] sm:$0xff] %v3485_v40  ;;  %3512 = vtanh.f32 %v1385_v41  ;;  %v3229_v43 = vpop.f32.mrf.mxu0 }
 0x122   : > { %v3489_v44 = vpop.eup %3488  ;;  %2235 = vst [vmem:[%s4126_s20 + $0x8] sm:$0xff] %v3487_v42  ;;  %3514 = vtanh.f32 %v3229_v43  ;;  %v3269_v45 = vpop.f32.mrf.mxu1 }
 0x123   : > { %v3491_v46 = vpop.eup %3490  ;;  %2267 = vst [vmem:[%s4126_s20 + $0x108] sm:$0xff] %v3489_v44  ;;  %3516 = vtanh.f32 %v3269_v45  ;;  %v1075_v47 = vpop.f32.mrf.mxu0 }
 0x124   : > { %v3493_v48 = vpop.eup %3492  ;;  %2240 = vst [vmem:[%s4126_s20 + $0x30] sm:$0xff] %v3491_v46  ;;  %3518 = vtanh.f32 %v1075_v47  ;;  %v1388_v49 = vpop.f32.mrf.mxu1 }
 0x125   : > { %v3495_v50 = vpop.eup %3494  ;;  %2272 = vst [vmem:[%s4126_s20 + $0x130] sm:$0xff] %v3493_v48  ;;  %3520 = vtanh.f32 %v1388_v49  ;;  %v3232_v51 = vpop.f32.mrf.mxu0 }
 0x126   : > { %v3497_v52 = vpop.eup %3496  ;;  %2238 = vst [vmem:[%s4126_s20 + $0x20] sm:$0xff] %v3495_v50  ;;  %3522 = vtanh.f32 %v3232_v51  ;;  %v3272_v53 = vpop.f32.mrf.mxu1 }
 0x127   : > { %v3499_v54 = vpop.eup %3498  ;;  %2270 = vst [vmem:[%s4126_s20 + $0x120] sm:$0xff] %v3497_v52  ;;  %3524 = vtanh.f32 %v3272_v53  ;;  %v1088_v55 = vpop.f32.mrf.mxu0 }
 0x128   : > { %v3501_v56 = vpop.eup %3500  ;;  %2241 = vst [vmem:[%s4126_s20 + $0x38] sm:$0xff] %v3499_v54  ;;  %3526 = vtanh.f32 %v1088_v55  ;;  %v1401_v57 = vpop.f32.mrf.mxu1 }
 0x129   : > { %v3503_v58 = vpop.eup %3502  ;;  %2273 = vst [vmem:[%s4126_s20 + $0x138] sm:$0xff] %v3501_v56  ;;  %3528 = vtanh.f32 %v1401_v57  ;;  %v3233_v59 = vpop.f32.mrf.mxu0 }
 0x12a   : > { %v3505_v60 = vpop.eup %3504  ;;  %2239 = vst [vmem:[%s4126_s20 + $0x28] sm:$0xff] %v3503_v58  ;;  %3530 = vtanh.f32 %v3233_v59  ;;  %v3273_v61 = vpop.f32.mrf.mxu1 }
 0x12b   : > { %v3507_v62 = vpop.eup %3506  ;;  %2271 = vst [vmem:[%s4126_s20 + $0x128] sm:$0xff] %v3505_v60  ;;  %3532 = vtanh.f32 %v3273_v61  ;;  %v1091_v63 = vpop.f32.mrf.mxu0 }
 0x12c   : > { %v3509_v0 = vpop.eup %3508  ;;  %2244 = vst [vmem:[%s4126_s20 + $0x50] sm:$0xff] %v3507_v62  ;;  %3534 = vtanh.f32 %v1091_v63  ;;  %v1404_v1 = vpop.f32.mrf.mxu1 }
 0x12d   : > { %v3511_v2 = vpop.eup %3510  ;;  %2276 = vst [vmem:[%s4126_s20 + $0x150] sm:$0xff] %v3509_v0  ;;  %3536 = vtanh.f32 %v1404_v1  ;;  %v3236_v3 = vpop.f32.mrf.mxu0 }
 0x12e   : > { %v3513_v4 = vpop.eup %3512  ;;  %2242 = vst [vmem:[%s4126_s20 + $0x40] sm:$0xff] %v3511_v2  ;;  %3538 = vtanh.f32 %v3236_v3  ;;  %v3276_v5 = vpop.f32.mrf.mxu1 }
 0x12f   : > { %v3515_v6 = vpop.eup %3514  ;;  %2274 = vst [vmem:[%s4126_s20 + $0x140] sm:$0xff] %v3513_v4  ;;  %3540 = vtanh.f32 %v3276_v5  ;;  %v1104_v7 = vpop.f32.mrf.mxu0 }
 0x130   : > { %v3517_v8 = vpop.eup %3516  ;;  %2245 = vst [vmem:[%s4126_s20 + $0x58] sm:$0xff] %v3515_v6  ;;  %3542 = vtanh.f32 %v1104_v7  ;;  %v1417_v9 = vpop.f32.mrf.mxu1 }
 0x131   : > { %v3519_v10 = vpop.eup %3518  ;;  %2277 = vst [vmem:[%s4126_s20 + $0x158] sm:$0xff] %v3517_v8  ;;  %3544 = vtanh.f32 %v1417_v9  ;;  %v3237_v11 = vpop.f32.mrf.mxu0 }
 0x132   : > { %v3521_v12 = vpop.eup %3520  ;;  %2243 = vst [vmem:[%s4126_s20 + $0x48] sm:$0xff] %v3519_v10  ;;  %3546 = vtanh.f32 %v3237_v11  ;;  %v3277_v13 = vpop.f32.mrf.mxu1 }
 0x133   : > { %v3523_v14 = vpop.eup %3522  ;;  %2275 = vst [vmem:[%s4126_s20 + $0x148] sm:$0xff] %v3521_v12  ;;  %3548 = vtanh.f32 %v3277_v13  ;;  %v1107_v15 = vpop.f32.mrf.mxu0 }
 0x134   : > { %v3525_v16 = vpop.eup %3524  ;;  %2248 = vst [vmem:[%s4126_s20 + $0x70] sm:$0xff] %v3523_v14  ;;  %3550 = vtanh.f32 %v1107_v15  ;;  %v1420_v17 = vpop.f32.mrf.mxu1 }
 0x135   : > { %v3527_v18 = vpop.eup %3526  ;;  %2280 = vst [vmem:[%s4126_s20 + $0x170] sm:$0xff] %v3525_v16  ;;  %3552 = vtanh.f32 %v1420_v17  ;;  %v3240_v19 = vpop.f32.mrf.mxu0 }
 0x136   : > { %v3529_v20 = vpop.eup %3528  ;;  %2246 = vst [vmem:[%s4126_s20 + $0x60] sm:$0xff] %v3527_v18  ;;  %3554 = vtanh.f32 %v3240_v19  ;;  %v3280_v21 = vpop.f32.mrf.mxu1 }
 0x137   : > { %v3531_v22 = vpop.eup %3530  ;;  %2278 = vst [vmem:[%s4126_s20 + $0x160] sm:$0xff] %v3529_v20  ;;  %3556 = vtanh.f32 %v3280_v21  ;;  %v1120_v23 = vpop.f32.mrf.mxu0 }
 0x138   : > { %v3533_v24 = vpop.eup %3532  ;;  %2249 = vst [vmem:[%s4126_s20 + $0x78] sm:$0xff] %v3531_v22  ;;  %3558 = vtanh.f32 %v1120_v23  ;;  %v1433_v25 = vpop.f32.mrf.mxu1 }
 0x139   : > { %v3535_v26 = vpop.eup %3534  ;;  %2281 = vst [vmem:[%s4126_s20 + $0x178] sm:$0xff] %v3533_v24  ;;  %3560 = vtanh.f32 %v1433_v25  ;;  %v3241_v27 = vpop.f32.mrf.mxu0 }
 0x13a   : > { %v3537_v28 = vpop.eup %3536  ;;  %2247 = vst [vmem:[%s4126_s20 + $0x68] sm:$0xff] %v3535_v26  ;;  %3562 = vtanh.f32 %v3241_v27  ;;  %v3281_v29 = vpop.f32.mrf.mxu1 }
 0x13b   : > { %v3539_v30 = vpop.eup %3538  ;;  %2279 = vst [vmem:[%s4126_s20 + $0x168] sm:$0xff] %v3537_v28  ;;  %3564 = vtanh.f32 %v3281_v29  ;;  %v1123_v31 = vpop.f32.mrf.mxu0 }
 0x13c   : > { %v3541_v32 = vpop.eup %3540  ;;  %2252 = vst [vmem:[%s4126_s20 + $0x90] sm:$0xff] %v3539_v30  ;;  %3566 = vtanh.f32 %v1123_v31  ;;  %v1436_v33 = vpop.f32.mrf.mxu1 }
 0x13d   : > { %v3543_v34 = vpop.eup %3542  ;;  %2284 = vst [vmem:[%s4126_s20 + $0x190] sm:$0xff] %v3541_v32  ;;  %3568 = vtanh.f32 %v1436_v33  ;;  %v3244_v35 = vpop.f32.mrf.mxu0 }
 0x13e   : > { %v3545_v36 = vpop.eup %3544  ;;  %2250 = vst [vmem:[%s4126_s20 + $0x80] sm:$0xff] %v3543_v34  ;;  %3570 = vtanh.f32 %v3244_v35  ;;  %v3284_v37 = vpop.f32.mrf.mxu1 }
 0x13f   : > { %v3547_v38 = vpop.eup %3546  ;;  %2282 = vst [vmem:[%s4126_s20 + $0x180] sm:$0xff] %v3545_v36  ;;  %3572 = vtanh.f32 %v3284_v37  ;;  %v1136_v39 = vpop.f32.mrf.mxu0 }
 0x140   : > { %v3549_v40 = vpop.eup %3548  ;;  %2253 = vst [vmem:[%s4126_s20 + $0x98] sm:$0xff] %v3547_v38  ;;  %3574 = vtanh.f32 %v1136_v39  ;;  %v1449_v41 = vpop.f32.mrf.mxu1 }
 0x141   : > { %v3551_v42 = vpop.eup %3550  ;;  %2285 = vst [vmem:[%s4126_s20 + $0x198] sm:$0xff] %v3549_v40  ;;  %3576 = vtanh.f32 %v1449_v41  ;;  %v3245_v43 = vpop.f32.mrf.mxu0 }
 0x142   : > { %v3553_v44 = vpop.eup %3552  ;;  %2251 = vst [vmem:[%s4126_s20 + $0x88] sm:$0xff] %v3551_v42  ;;  %3578 = vtanh.f32 %v3245_v43  ;;  %v3285_v45 = vpop.f32.mrf.mxu1 }
 0x143   : > { %v3555_v46 = vpop.eup %3554  ;;  %2283 = vst [vmem:[%s4126_s20 + $0x188] sm:$0xff] %v3553_v44  ;;  %3580 = vtanh.f32 %v3285_v45  ;;  %v1139_v47 = vpop.f32.mrf.mxu0 }
 0x144   : > { %v3557_v48 = vpop.eup %3556  ;;  %2256 = vst [vmem:[%s4126_s20 + $0xb0] sm:$0xff] %v3555_v46  ;;  %3582 = vtanh.f32 %v1139_v47  ;;  %v1452_v49 = vpop.f32.mrf.mxu1 }
 0x145   : > { %v3559_v50 = vpop.eup %3558  ;;  %2288 = vst [vmem:[%s4126_s20 + $0x1b0] sm:$0xff] %v3557_v48  ;;  %3584 = vtanh.f32 %v1452_v49  ;;  %v3248_v51 = vpop.f32.mrf.mxu0 }
 0x146   : > { %v3561_v52 = vpop.eup %3560  ;;  %2254 = vst [vmem:[%s4126_s20 + $0xa0] sm:$0xff] %v3559_v50  ;;  %3586 = vtanh.f32 %v3248_v51  ;;  %v3288_v53 = vpop.f32.mrf.mxu1 }
 0x147   : > { %v3563_v54 = vpop.eup %3562  ;;  %2286 = vst [vmem:[%s4126_s20 + $0x1a0] sm:$0xff] %v3561_v52  ;;  %3588 = vtanh.f32 %v3288_v53  ;;  %v1152_v55 = vpop.f32.mrf.mxu0 }
 0x148   : > { %v3565_v56 = vpop.eup %3564  ;;  %2257 = vst [vmem:[%s4126_s20 + $0xb8] sm:$0xff] %v3563_v54  ;;  %3590 = vtanh.f32 %v1152_v55  ;;  %v1465_v57 = vpop.f32.mrf.mxu1 }
 0x149   : > { %v3567_v58 = vpop.eup %3566  ;;  %2289 = vst [vmem:[%s4126_s20 + $0x1b8] sm:$0xff] %v3565_v56  ;;  %3592 = vtanh.f32 %v1465_v57  ;;  %v3249_v59 = vpop.f32.mrf.mxu0 }
 0x14a   : > { %v3569_v60 = vpop.eup %3568  ;;  %2255 = vst [vmem:[%s4126_s20 + $0xa8] sm:$0xff] %v3567_v58  ;;  %3594 = vtanh.f32 %v3249_v59  ;;  %v3289_v61 = vpop.f32.mrf.mxu1 }
 0x14b   : > { %v3571_v62 = vpop.eup %3570  ;;  %2287 = vst [vmem:[%s4126_s20 + $0x1a8] sm:$0xff] %v3569_v60  ;;  %3596 = vtanh.f32 %v3289_v61  ;;  %v1155_v63 = vpop.f32.mrf.mxu0 }
 0x14c   : > { %v3573_v0 = vpop.eup %3572  ;;  %2260 = vst [vmem:[%s4126_s20 + $0xd0] sm:$0xff] %v3571_v62  ;;  %3598 = vtanh.f32 %v1155_v63  ;;  %v1468_v1 = vpop.f32.mrf.mxu1 }
 0x14d   : > { %v3575_v2 = vpop.eup %3574  ;;  %2292 = vst [vmem:[%s4126_s20 + $0x1d0] sm:$0xff] %v3573_v0  ;;  %3600 = vtanh.f32 %v1468_v1  ;;  %v3300_v3 = vpop.f32.mrf.mxu0 }
 0x14e   : > { %v3577_v4 = vpop.eup %3576  ;;  %2258 = vst [vmem:[%s4126_s20 + $0xc0] sm:$0xff] %v3575_v2  ;;  %3602 = vtanh.f32 %v3300_v3  ;;  %v3340_v5 = vpop.f32.mrf.mxu1 }
 0x14f   : > { %v3579_v6 = vpop.eup %3578  ;;  %2290 = vst [vmem:[%s4126_s20 + $0x1c0] sm:$0xff] %v3577_v4  ;;  %3604 = vtanh.f32 %v3340_v5  ;;  %v1666_v7 = vpop.f32.mrf.mxu0 }
 0x150   : > { %v3581_v8 = vpop.eup %3580  ;;  %2261 = vst [vmem:[%s4126_s20 + $0xd8] sm:$0xff] %v3579_v6  ;;  %3606 = vtanh.f32 %v1666_v7  ;;  %v1979_v9 = vpop.f32.mrf.mxu1 }
 0x151   : > { %v3583_v10 = vpop.eup %3582  ;;  %2293 = vst [vmem:[%s4126_s20 + $0x1d8] sm:$0xff] %v3581_v8  ;;  %3608 = vtanh.f32 %v1979_v9  ;;  %v3301_v11 = vpop.f32.mrf.mxu0 }
 0x152   : > { %v3585_v12 = vpop.eup %3584  ;;  %2259 = vst [vmem:[%s4126_s20 + $0xc8] sm:$0xff] %v3583_v10  ;;  %3610 = vtanh.f32 %v3301_v11  ;;  %v3341_v13 = vpop.f32.mrf.mxu1 }
 0x153   : > { %v3587_v14 = vpop.eup %3586  ;;  %2291 = vst [vmem:[%s4126_s20 + $0x1c8] sm:$0xff] %v3585_v12  ;;  %3612 = vtanh.f32 %v3341_v13  ;;  %v1669_v15 = vpop.f32.mrf.mxu0 }
 0x154   : > { %v3589_v16 = vpop.eup %3588  ;;  %2264 = vst [vmem:[%s4126_s20 + $0xf0] sm:$0xff] %v3587_v14  ;;  %3614 = vtanh.f32 %v1669_v15  ;;  %v1982_v17 = vpop.f32.mrf.mxu1 }
 0x155   : > { %v3591_v18 = vpop.eup %3590  ;;  %2296 = vst [vmem:[%s4126_s20 + $0x1f0] sm:$0xff] %v3589_v16  ;;  %3616 = vtanh.f32 %v1982_v17  ;;  %v3304_v19 = vpop.f32.mrf.mxu0 }
 0x156   : > { %v3593_v20 = vpop.eup %3592  ;;  %2262 = vst [vmem:[%s4126_s20 + $0xe0] sm:$0xff] %v3591_v18  ;;  %3618 = vtanh.f32 %v3304_v19  ;;  %v3344_v21 = vpop.f32.mrf.mxu1 }
 0x157   : > { %v3595_v22 = vpop.eup %3594  ;;  %2294 = vst [vmem:[%s4126_s20 + $0x1e0] sm:$0xff] %v3593_v20  ;;  %3620 = vtanh.f32 %v3344_v21  ;;  %v1682_v23 = vpop.f32.mrf.mxu0 }
 0x158   : > { %v3597_v24 = vpop.eup %3596  ;;  %2265 = vst [vmem:[%s4126_s20 + $0xf8] sm:$0xff] %v3595_v22  ;;  %3622 = vtanh.f32 %v1682_v23  ;;  %v1995_v25 = vpop.f32.mrf.mxu1 }
 0x159   : > { %v3599_v26 = vpop.eup %3598  ;;  %2297 = vst [vmem:[%s4126_s20 + $0x1f8] sm:$0xff] %v3597_v24  ;;  %3624 = vtanh.f32 %v1995_v25  ;;  %v3305_v27 = vpop.f32.mrf.mxu0 }
 0x15a   : > { %v3601_v28 = vpop.eup %3600  ;;  %2263 = vst [vmem:[%s4126_s20 + $0xe8] sm:$0xff] %v3599_v26  ;;  %3626 = vtanh.f32 %v3305_v27  ;;  %v3345_v29 = vpop.f32.mrf.mxu1 }
 0x15b   : > { %v3603_v30 = vpop.eup %3602  ;;  %2295 = vst [vmem:[%s4126_s20 + $0x1e8] sm:$0xff] %v3601_v28  ;;  %3628 = vtanh.f32 %v3345_v29  ;;  %v1685_v31 = vpop.f32.mrf.mxu0 }
 0x15c   : > { %v3605_v32 = vpop.eup %3604  ;;  %2300 = vst [vmem:[%s4126_s20 + $0x210] sm:$0xff] %v3603_v30  ;;  %3630 = vtanh.f32 %v1685_v31  ;;  %v1998_v33 = vpop.f32.mrf.mxu1 }
 0x15d   : > { %v3607_v34 = vpop.eup %3606  ;;  %2332 = vst [vmem:[%s4126_s20 + $0x310] sm:$0xff] %v3605_v32  ;;  %3632 = vtanh.f32 %v1998_v33  ;;  %v3308_v35 = vpop.f32.mrf.mxu0 }
 0x15e   : > { %v3609_v36 = vpop.eup %3608  ;;  %2298 = vst [vmem:[%s4126_s20 + $0x200] sm:$0xff] %v3607_v34  ;;  %3634 = vtanh.f32 %v3308_v35  ;;  %v3348_v37 = vpop.f32.mrf.mxu1 }
 0x15f   : > { %v3611_v38 = vpop.eup %3610  ;;  %2330 = vst [vmem:[%s4126_s20 + $0x300] sm:$0xff] %v3609_v36  ;;  %3636 = vtanh.f32 %v3348_v37  ;;  %v1698_v39 = vpop.f32.mrf.mxu0 }
 0x160   : > { %v3613_v40 = vpop.eup %3612  ;;  %2301 = vst [vmem:[%s4126_s20 + $0x218] sm:$0xff] %v3611_v38  ;;  %3638 = vtanh.f32 %v1698_v39  ;;  %v2011_v41 = vpop.f32.mrf.mxu1 }
 0x161   : > { %v3615_v42 = vpop.eup %3614  ;;  %2333 = vst [vmem:[%s4126_s20 + $0x318] sm:$0xff] %v3613_v40  ;;  %3640 = vtanh.f32 %v2011_v41  ;;  %v3309_v43 = vpop.f32.mrf.mxu0 }
 0x162   : > { %v3617_v44 = vpop.eup %3616  ;;  %2299 = vst [vmem:[%s4126_s20 + $0x208] sm:$0xff] %v3615_v42  ;;  %3642 = vtanh.f32 %v3309_v43  ;;  %v3349_v45 = vpop.f32.mrf.mxu1 }
 0x163   : > { %v3619_v46 = vpop.eup %3618  ;;  %2331 = vst [vmem:[%s4126_s20 + $0x308] sm:$0xff] %v3617_v44  ;;  %3644 = vtanh.f32 %v3349_v45  ;;  %v1701_v47 = vpop.f32.mrf.mxu0 }
 0x164   : > { %v3621_v48 = vpop.eup %3620  ;;  %2304 = vst [vmem:[%s4126_s20 + $0x230] sm:$0xff] %v3619_v46  ;;  %3646 = vtanh.f32 %v1701_v47  ;;  %v2014_v49 = vpop.f32.mrf.mxu1 }
 0x165   : > { %v3623_v50 = vpop.eup %3622  ;;  %2336 = vst [vmem:[%s4126_s20 + $0x330] sm:$0xff] %v3621_v48  ;;  %3648 = vtanh.f32 %v2014_v49  ;;  %v3312_v51 = vpop.f32.mrf.mxu0 }
 0x166   : > { %v3625_v52 = vpop.eup %3624  ;;  %2302 = vst [vmem:[%s4126_s20 + $0x220] sm:$0xff] %v3623_v50  ;;  %3650 = vtanh.f32 %v3312_v51  ;;  %v3352_v53 = vpop.f32.mrf.mxu1 }
 0x167   : > { %v3627_v54 = vpop.eup %3626  ;;  %2334 = vst [vmem:[%s4126_s20 + $0x320] sm:$0xff] %v3625_v52  ;;  %3652 = vtanh.f32 %v3352_v53  ;;  %v1714_v55 = vpop.f32.mrf.mxu0 }
 0x168   : > { %v3629_v56 = vpop.eup %3628  ;;  %2305 = vst [vmem:[%s4126_s20 + $0x238] sm:$0xff] %v3627_v54  ;;  %3654 = vtanh.f32 %v1714_v55  ;;  %v2027_v57 = vpop.f32.mrf.mxu1 }
 0x169   : > { %v3631_v58 = vpop.eup %3630  ;;  %2337 = vst [vmem:[%s4126_s20 + $0x338] sm:$0xff] %v3629_v56  ;;  %3656 = vtanh.f32 %v2027_v57  ;;  %v3313_v59 = vpop.f32.mrf.mxu0 }
 0x16a   : > { %v3633_v60 = vpop.eup %3632  ;;  %2303 = vst [vmem:[%s4126_s20 + $0x228] sm:$0xff] %v3631_v58  ;;  %3658 = vtanh.f32 %v3313_v59  ;;  %v3353_v61 = vpop.f32.mrf.mxu1 }
 0x16b   : > { %v3635_v62 = vpop.eup %3634  ;;  %2335 = vst [vmem:[%s4126_s20 + $0x328] sm:$0xff] %v3633_v60  ;;  %3660 = vtanh.f32 %v3353_v61  ;;  %v1717_v63 = vpop.f32.mrf.mxu0 }
 0x16c   : > { %v3637_v0 = vpop.eup %3636  ;;  %2308 = vst [vmem:[%s4126_s20 + $0x250] sm:$0xff] %v3635_v62  ;;  %3662 = vtanh.f32 %v1717_v63  ;;  %v2030_v1 = vpop.f32.mrf.mxu1 }
 0x16d   : > { %v3639_v2 = vpop.eup %3638  ;;  %2340 = vst [vmem:[%s4126_s20 + $0x350] sm:$0xff] %v3637_v0  ;;  %3664 = vtanh.f32 %v2030_v1  ;;  %v3316_v3 = vpop.f32.mrf.mxu0 }
 0x16e   : > { %v3641_v4 = vpop.eup %3640  ;;  %2306 = vst [vmem:[%s4126_s20 + $0x240] sm:$0xff] %v3639_v2  ;;  %3666 = vtanh.f32 %v3316_v3  ;;  %v3356_v5 = vpop.f32.mrf.mxu1 }
 0x16f   : > { %v3643_v6 = vpop.eup %3642  ;;  %2338 = vst [vmem:[%s4126_s20 + $0x340] sm:$0xff] %v3641_v4  ;;  %3668 = vtanh.f32 %v3356_v5  ;;  %v1730_v7 = vpop.f32.mrf.mxu0 }
 0x170   : > { %v3645_v8 = vpop.eup %3644  ;;  %2309 = vst [vmem:[%s4126_s20 + $0x258] sm:$0xff] %v3643_v6  ;;  %3670 = vtanh.f32 %v1730_v7  ;;  %v2043_v9 = vpop.f32.mrf.mxu1 }
 0x171   : > { %v3647_v10 = vpop.eup %3646  ;;  %2341 = vst [vmem:[%s4126_s20 + $0x358] sm:$0xff] %v3645_v8  ;;  %3672 = vtanh.f32 %v2043_v9  ;;  %v3317_v11 = vpop.f32.mrf.mxu0 }
 0x172   : > { %v3649_v12 = vpop.eup %3648  ;;  %2307 = vst [vmem:[%s4126_s20 + $0x248] sm:$0xff] %v3647_v10  ;;  %3674 = vtanh.f32 %v3317_v11  ;;  %v3357_v13 = vpop.f32.mrf.mxu1 }
 0x173   : > { %v3651_v14 = vpop.eup %3650  ;;  %2339 = vst [vmem:[%s4126_s20 + $0x348] sm:$0xff] %v3649_v12  ;;  %3676 = vtanh.f32 %v3357_v13  ;;  %v1733_v15 = vpop.f32.mrf.mxu0 }
 0x174   : > { %v3653_v16 = vpop.eup %3652  ;;  %2312 = vst [vmem:[%s4126_s20 + $0x270] sm:$0xff] %v3651_v14  ;;  %3678 = vtanh.f32 %v1733_v15  ;;  %v2046_v17 = vpop.f32.mrf.mxu1 }
 0x175   : > { %v3655_v18 = vpop.eup %3654  ;;  %2344 = vst [vmem:[%s4126_s20 + $0x370] sm:$0xff] %v3653_v16  ;;  %3680 = vtanh.f32 %v2046_v17  ;;  %v3320_v19 = vpop.f32.mrf.mxu0  ;;  %v2654_v16 = vld [vmem:[%s4126_s20] sm:$0xff] (%p3799_p5)  ;;  %v2656_v17 = vld [vmem:[%s4126_s20 + $0x8] sm:$0xff] (%p3799_p5) }
 0x176   : > { %v3657_v20 = vpop.eup %3656  ;;  %2310 = vst [vmem:[%s4126_s20 + $0x260] sm:$0xff] %v3655_v18  ;;  %3682 = vtanh.f32 %v3320_v19  ;;  %v3360_v21 = vpop.f32.mrf.mxu1  ;;  %v2658_v18 = vld [vmem:[%s4126_s20 + $0x10] sm:$0xff] (%p3799_p5)  ;;  %v2660_v19 = vld [vmem:[%s4126_s20 + $0x18] sm:$0xff] (%p3799_p5)  ;;  %2655 = vst [vmem:[%s4266_s17] sm:$0xff] (%p3799_p5), %v2654_v16 }
 0x177   : > { %v3659_v22 = vpop.eup %3658  ;;  %2342 = vst [vmem:[%s4126_s20 + $0x360] sm:$0xff] %v3657_v20  ;;  %3684 = vtanh.f32 %v3360_v21  ;;  %v1746_v23 = vpop.f32.mrf.mxu0  ;;  %v2662_v20 = vld [vmem:[%s4126_s20 + $0x20] sm:$0xff] (%p3799_p5)  ;;  %v2664_v21 = vld [vmem:[%s4126_s20 + $0x28] sm:$0xff] (%p3799_p5)  ;;  %2657 = vst [vmem:[%s4266_s17 + $0x8] sm:$0xff] (%p3799_p5), %v2656_v17 }
 0x178   : > { %v3661_v24 = vpop.eup %3660  ;;  %2313 = vst [vmem:[%s4126_s20 + $0x278] sm:$0xff] %v3659_v22  ;;  %3686 = vtanh.f32 %v1746_v23  ;;  %v2059_v25 = vpop.f32.mrf.mxu1  ;;  %2659 = vst [vmem:[%s4266_s17 + $0x10] sm:$0xff] (%p3799_p5), %v2658_v18  ;;  %v2666_v22 = vld [vmem:[%s4126_s20 + $0x30] sm:$0xff] (%p3799_p5)  ;;  %v2668_v23 = vld [vmem:[%s4126_s20 + $0x38] sm:$0xff] (%p3799_p5) }
 0x179   : > { %v3663_v26 = vpop.eup %3662  ;;  %2345 = vst [vmem:[%s4126_s20 + $0x378] sm:$0xff] %v3661_v24  ;;  %3688 = vtanh.f32 %v2059_v25  ;;  %v3321_v27 = vpop.f32.mrf.mxu0  ;;  %2661 = vst [vmem:[%s4266_s17 + $0x18] sm:$0xff] (%p3799_p5), %v2660_v19  ;;  %v2670_v24 = vld [vmem:[%s4126_s20 + $0x40] sm:$0xff] (%p3799_p5)  ;;  %v2672_v25 = vld [vmem:[%s4126_s20 + $0x48] sm:$0xff] (%p3799_p5) }
 0x17a   : > { %v3665_v28 = vpop.eup %3664  ;;  %2311 = vst [vmem:[%s4126_s20 + $0x268] sm:$0xff] %v3663_v26  ;;  %3690 = vtanh.f32 %v3321_v27  ;;  %v3361_v29 = vpop.f32.mrf.mxu1  ;;  %2663 = vst [vmem:[%s4266_s17 + $0x20] sm:$0xff] (%p3799_p5), %v2662_v20  ;;  %v2674_v26 = vld [vmem:[%s4126_s20 + $0x50] sm:$0xff] (%p3799_p5)  ;;  %v2676_v27 = vld [vmem:[%s4126_s20 + $0x58] sm:$0xff] (%p3799_p5) }
 0x17b   : > { %v3667_v30 = vpop.eup %3666  ;;  %2343 = vst [vmem:[%s4126_s20 + $0x368] sm:$0xff] %v3665_v28  ;;  %3692 = vtanh.f32 %v3361_v29  ;;  %v1749_v31 = vpop.f32.mrf.mxu0  ;;  %2665 = vst [vmem:[%s4266_s17 + $0x28] sm:$0xff] (%p3799_p5), %v2664_v21  ;;  %v2678_v28 = vld [vmem:[%s4126_s20 + $0x60] sm:$0xff] (%p3799_p5)  ;;  %v2680_v29 = vld [vmem:[%s4126_s20 + $0x68] sm:$0xff] (%p3799_p5) }
 0x17c   : > { %v3669_v32 = vpop.eup %3668  ;;  %2316 = vst [vmem:[%s4126_s20 + $0x290] sm:$0xff] %v3667_v30  ;;  %3694 = vtanh.f32 %v1749_v31  ;;  %v2062_v33 = vpop.f32.mrf.mxu1  ;;  %2667 = vst [vmem:[%s4266_s17 + $0x30] sm:$0xff] (%p3799_p5), %v2666_v22  ;;  %v2682_v30 = vld [vmem:[%s4126_s20 + $0x70] sm:$0xff] (%p3799_p5)  ;;  %v2684_v31 = vld [vmem:[%s4126_s20 + $0x78] sm:$0xff] (%p3799_p5) }
 0x17d   : > { %v3671_v34 = vpop.eup %3670  ;;  %2348 = vst [vmem:[%s4126_s20 + $0x390] sm:$0xff] %v3669_v32  ;;  %3696 = vtanh.f32 %v2062_v33  ;;  %v3324_v35 = vpop.f32.mrf.mxu0  ;;  %2669 = vst [vmem:[%s4266_s17 + $0x38] sm:$0xff] (%p3799_p5), %v2668_v23  ;;  %v2686_v32 = vld [vmem:[%s4126_s20 + $0x80] sm:$0xff] (%p3799_p5)  ;;  %v2688_v33 = vld [vmem:[%s4126_s20 + $0x88] sm:$0xff] (%p3799_p5) }
 0x17e   : > { %v3673_v36 = vpop.eup %3672  ;;  %2314 = vst [vmem:[%s4126_s20 + $0x280] sm:$0xff] %v3671_v34  ;;  %3698 = vtanh.f32 %v3324_v35  ;;  %v3364_v37 = vpop.f32.mrf.mxu1  ;;  %2671 = vst [vmem:[%s4266_s17 + $0x40] sm:$0xff] (%p3799_p5), %v2670_v24  ;;  %v2690_v34 = vld [vmem:[%s4126_s20 + $0x90] sm:$0xff] (%p3799_p5)  ;;  %v2692_v35 = vld [vmem:[%s4126_s20 + $0x98] sm:$0xff] (%p3799_p5) }
 0x17f   : > { %v3675_v38 = vpop.eup %3674  ;;  %2346 = vst [vmem:[%s4126_s20 + $0x380] sm:$0xff] %v3673_v36  ;;  %3700 = vtanh.f32 %v3364_v37  ;;  %v1762_v39 = vpop.f32.mrf.mxu0  ;;  %2673 = vst [vmem:[%s4266_s17 + $0x48] sm:$0xff] (%p3799_p5), %v2672_v25  ;;  %v2694_v36 = vld [vmem:[%s4126_s20 + $0xa0] sm:$0xff] (%p3799_p5)  ;;  %v2696_v37 = vld [vmem:[%s4126_s20 + $0xa8] sm:$0xff] (%p3799_p5) }
 0x180   : > { %v3677_v40 = vpop.eup %3676  ;;  %2317 = vst [vmem:[%s4126_s20 + $0x298] sm:$0xff] %v3675_v38  ;;  %3702 = vtanh.f32 %v1762_v39  ;;  %v2075_v41 = vpop.f32.mrf.mxu1  ;;  %2675 = vst [vmem:[%s4266_s17 + $0x50] sm:$0xff] (%p3799_p5), %v2674_v26  ;;  %v2698_v38 = vld [vmem:[%s4126_s20 + $0xb0] sm:$0xff] (%p3799_p5)  ;;  %v2700_v39 = vld [vmem:[%s4126_s20 + $0xb8] sm:$0xff] (%p3799_p5) }
 0x181   : > { %v3679_v42 = vpop.eup %3678  ;;  %2349 = vst [vmem:[%s4126_s20 + $0x398] sm:$0xff] %v3677_v40  ;;  %3704 = vtanh.f32 %v2075_v41  ;;  %v3325_v43 = vpop.f32.mrf.mxu0  ;;  %2677 = vst [vmem:[%s4266_s17 + $0x58] sm:$0xff] (%p3799_p5), %v2676_v27  ;;  %v2702_v40 = vld [vmem:[%s4126_s20 + $0xc0] sm:$0xff] (%p3799_p5)  ;;  %v2704_v41 = vld [vmem:[%s4126_s20 + $0xc8] sm:$0xff] (%p3799_p5) }
 0x182   : > { %v3681_v44 = vpop.eup %3680  ;;  %2315 = vst [vmem:[%s4126_s20 + $0x288] sm:$0xff] %v3679_v42  ;;  %3706 = vtanh.f32 %v3325_v43  ;;  %v3365_v45 = vpop.f32.mrf.mxu1  ;;  %2679 = vst [vmem:[%s4266_s17 + $0x60] sm:$0xff] (%p3799_p5), %v2678_v28  ;;  %v2706_v42 = vld [vmem:[%s4126_s20 + $0xd0] sm:$0xff] (%p3799_p5)  ;;  %v2708_v43 = vld [vmem:[%s4126_s20 + $0xd8] sm:$0xff] (%p3799_p5) }
 0x183   : > { %v3683_v46 = vpop.eup %3682  ;;  %2347 = vst [vmem:[%s4126_s20 + $0x388] sm:$0xff] %v3681_v44  ;;  %3708 = vtanh.f32 %v3365_v45  ;;  %v1765_v47 = vpop.f32.mrf.mxu0  ;;  %2681 = vst [vmem:[%s4266_s17 + $0x68] sm:$0xff] (%p3799_p5), %v2680_v29  ;;  %v2710_v44 = vld [vmem:[%s4126_s20 + $0xe0] sm:$0xff] (%p3799_p5)  ;;  %v2712_v45 = vld [vmem:[%s4126_s20 + $0xe8] sm:$0xff] (%p3799_p5) }
 0x184   : > { %v3685_v48 = vpop.eup %3684  ;;  %2320 = vst [vmem:[%s4126_s20 + $0x2b0] sm:$0xff] %v3683_v46  ;;  %3710 = vtanh.f32 %v1765_v47  ;;  %v2078_v49 = vpop.f32.mrf.mxu1  ;;  %2683 = vst [vmem:[%s4266_s17 + $0x70] sm:$0xff] (%p3799_p5), %v2682_v30  ;;  %v2714_v46 = vld [vmem:[%s4126_s20 + $0xf0] sm:$0xff] (%p3799_p5)  ;;  %v2716_v47 = vld [vmem:[%s4126_s20 + $0xf8] sm:$0xff] (%p3799_p5) }
 0x185   : > { %v3687_v50 = vpop.eup %3686  ;;  %2352 = vst [vmem:[%s4126_s20 + $0x3b0] sm:$0xff] %v3685_v48  ;;  %3712 = vtanh.f32 %v2078_v49  ;;  %v3328_v51 = vpop.f32.mrf.mxu0  ;;  %2685 = vst [vmem:[%s4266_s17 + $0x78] sm:$0xff] (%p3799_p5), %v2684_v31  ;;  %v2718_v48 = vld [vmem:[%s4126_s20 + $0x100] sm:$0xff] (%p3799_p5)  ;;  %v2720_v49 = vld [vmem:[%s4126_s20 + $0x108] sm:$0xff] (%p3799_p5) }
 0x186   : > { %v3689_v52 = vpop.eup %3688  ;;  %2318 = vst [vmem:[%s4126_s20 + $0x2a0] sm:$0xff] %v3687_v50  ;;  %3714 = vtanh.f32 %v3328_v51  ;;  %v3368_v53 = vpop.f32.mrf.mxu1  ;;  %2687 = vst [vmem:[%s4266_s17 + $0x80] sm:$0xff] (%p3799_p5), %v2686_v32  ;;  %v2722_v50 = vld [vmem:[%s4126_s20 + $0x110] sm:$0xff] (%p3799_p5)  ;;  %v2724_v51 = vld [vmem:[%s4126_s20 + $0x118] sm:$0xff] (%p3799_p5) }
 0x187   : > { %v3691_v54 = vpop.eup %3690  ;;  %2350 = vst [vmem:[%s4126_s20 + $0x3a0] sm:$0xff] %v3689_v52  ;;  %3716 = vtanh.f32 %v3368_v53  ;;  %v1778_v55 = vpop.f32.mrf.mxu0  ;;  %2689 = vst [vmem:[%s4266_s17 + $0x88] sm:$0xff] (%p3799_p5), %v2688_v33  ;;  %v2726_v52 = vld [vmem:[%s4126_s20 + $0x120] sm:$0xff] (%p3799_p5)  ;;  %v2728_v53 = vld [vmem:[%s4126_s20 + $0x128] sm:$0xff] (%p3799_p5) }
 0x188   : > { %v3693_v56 = vpop.eup %3692  ;;  %2321 = vst [vmem:[%s4126_s20 + $0x2b8] sm:$0xff] %v3691_v54  ;;  %3718 = vtanh.f32 %v1778_v55  ;;  %v2091_v57 = vpop.f32.mrf.mxu1  ;;  %2691 = vst [vmem:[%s4266_s17 + $0x90] sm:$0xff] (%p3799_p5), %v2690_v34  ;;  %v2730_v54 = vld [vmem:[%s4126_s20 + $0x130] sm:$0xff] (%p3799_p5)  ;;  %v2732_v55 = vld [vmem:[%s4126_s20 + $0x138] sm:$0xff] (%p3799_p5) }
 0x189   : > { %v3695_v58 = vpop.eup %3694  ;;  %2353 = vst [vmem:[%s4126_s20 + $0x3b8] sm:$0xff] %v3693_v56  ;;  %3720 = vtanh.f32 %v2091_v57  ;;  %v3329_v59 = vpop.f32.mrf.mxu0  ;;  %2693 = vst [vmem:[%s4266_s17 + $0x98] sm:$0xff] (%p3799_p5), %v2692_v35  ;;  %v2734_v56 = vld [vmem:[%s4126_s20 + $0x140] sm:$0xff] (%p3799_p5)  ;;  %v2736_v57 = vld [vmem:[%s4126_s20 + $0x148] sm:$0xff] (%p3799_p5) }
 0x18a   : > { %v3697_v60 = vpop.eup %3696  ;;  %2319 = vst [vmem:[%s4126_s20 + $0x2a8] sm:$0xff] %v3695_v58  ;;  %3722 = vtanh.f32 %v3329_v59  ;;  %v3369_v61 = vpop.f32.mrf.mxu1  ;;  %2695 = vst [vmem:[%s4266_s17 + $0xa0] sm:$0xff] (%p3799_p5), %v2694_v36  ;;  %v2738_v58 = vld [vmem:[%s4126_s20 + $0x150] sm:$0xff] (%p3799_p5)  ;;  %v2740_v59 = vld [vmem:[%s4126_s20 + $0x158] sm:$0xff] (%p3799_p5) }
 0x18b   : > { %v3699_v62 = vpop.eup %3698  ;;  %2351 = vst [vmem:[%s4126_s20 + $0x3a8] sm:$0xff] %v3697_v60  ;;  %3724 = vtanh.f32 %v3369_v61  ;;  %v1781_v63 = vpop.f32.mrf.mxu0  ;;  %2697 = vst [vmem:[%s4266_s17 + $0xa8] sm:$0xff] (%p3799_p5), %v2696_v37  ;;  %v2742_v60 = vld [vmem:[%s4126_s20 + $0x160] sm:$0xff] (%p3799_p5)  ;;  %v2744_v61 = vld [vmem:[%s4126_s20 + $0x168] sm:$0xff] (%p3799_p5) }
 0x18c   : > { %v3701_v0 = vpop.eup %3700  ;;  %2324 = vst [vmem:[%s4126_s20 + $0x2d0] sm:$0xff] %v3699_v62  ;;  %3726 = vtanh.f32 %v1781_v63  ;;  %v2094_v1 = vpop.f32.mrf.mxu1  ;;  %2699 = vst [vmem:[%s4266_s17 + $0xb0] sm:$0xff] (%p3799_p5), %v2698_v38  ;;  %v2746_v62 = vld [vmem:[%s4126_s20 + $0x170] sm:$0xff] (%p3799_p5)  ;;  %v2748_v63 = vld [vmem:[%s4126_s20 + $0x178] sm:$0xff] (%p3799_p5) }
 0x18d   : > { %v3703_v2 = vpop.eup %3702  ;;  %2356 = vst [vmem:[%s4126_s20 + $0x3d0] sm:$0xff] %v3701_v0  ;;  %3728 = vtanh.f32 %v2094_v1  ;;  %2701 = vst [vmem:[%s4266_s17 + $0xb8] sm:$0xff] (%p3799_p5), %v2700_v39  ;;  %v2750_v0 = vld [vmem:[%s4126_s20 + $0x180] sm:$0xff] (%p3799_p5)  ;;  %v2752_v1 = vld [vmem:[%s4126_s20 + $0x188] sm:$0xff] (%p3799_p5) }
 0x18e   : > { %v3705_v3 = vpop.eup %3704  ;;  %2322 = vst [vmem:[%s4126_s20 + $0x2c0] sm:$0xff] %v3703_v2  ;;  %2703 = vst [vmem:[%s4266_s17 + $0xc0] sm:$0xff] (%p3799_p5), %v2702_v40  ;;  %v2754_v2 = vld [vmem:[%s4126_s20 + $0x190] sm:$0xff] (%p3799_p5)  ;;  %v2782_v16 = vld [vmem:[%s4126_s20 + $0x200] sm:$0xff] (%p3799_p5) }
 0x18f   : > { %v3707_v4 = vpop.eup %3706  ;;  %2354 = vst [vmem:[%s4126_s20 + $0x3c0] sm:$0xff] %v3705_v3  ;;  %2705 = vst [vmem:[%s4266_s17 + $0xc8] sm:$0xff] (%p3799_p5), %v2704_v41  ;;  %v2756_v3 = vld [vmem:[%s4126_s20 + $0x198] sm:$0xff] (%p3799_p5)  ;;  %v2784_v17 = vld [vmem:[%s4126_s20 + $0x208] sm:$0xff] (%p3799_p5) }
 0x190   : > { %v3709_v5 = vpop.eup %3708  ;;  %2325 = vst [vmem:[%s4126_s20 + $0x2d8] sm:$0xff] %v3707_v4  ;;  %2707 = vst [vmem:[%s4266_s17 + $0xd0] sm:$0xff] (%p3799_p5), %v2706_v42  ;;  %v2758_v4 = vld [vmem:[%s4126_s20 + $0x1a0] sm:$0xff] (%p3799_p5)  ;;  %v2786_v18 = vld [vmem:[%s4126_s20 + $0x210] sm:$0xff] (%p3799_p5) }
 0x191   : > { %v3711_v6 = vpop.eup %3710  ;;  %2357 = vst [vmem:[%s4126_s20 + $0x3d8] sm:$0xff] %v3709_v5  ;;  %2709 = vst [vmem:[%s4266_s17 + $0xd8] sm:$0xff] (%p3799_p5), %v2708_v43  ;;  %v2760_v5 = vld [vmem:[%s4126_s20 + $0x1a8] sm:$0xff] (%p3799_p5)  ;;  %v2788_v19 = vld [vmem:[%s4126_s20 + $0x218] sm:$0xff] (%p3799_p5) }
 0x192   : > { %v3713_v7 = vpop.eup %3712  ;;  %2323 = vst [vmem:[%s4126_s20 + $0x2c8] sm:$0xff] %v3711_v6  ;;  %2711 = vst [vmem:[%s4266_s17 + $0xe0] sm:$0xff] (%p3799_p5), %v2710_v44  ;;  %v2762_v6 = vld [vmem:[%s4126_s20 + $0x1b0] sm:$0xff] (%p3799_p5)  ;;  %v2790_v20 = vld [vmem:[%s4126_s20 + $0x220] sm:$0xff] (%p3799_p5) }
 0x193   : > { %v3715_v8 = vpop.eup %3714  ;;  %2355 = vst [vmem:[%s4126_s20 + $0x3c8] sm:$0xff] %v3713_v7  ;;  %2713 = vst [vmem:[%s4266_s17 + $0xe8] sm:$0xff] (%p3799_p5), %v2712_v45  ;;  %v2764_v7 = vld [vmem:[%s4126_s20 + $0x1b8] sm:$0xff] (%p3799_p5)  ;;  %v2792_v21 = vld [vmem:[%s4126_s20 + $0x228] sm:$0xff] (%p3799_p5) }
 0x194   : > { %v3717_v9 = vpop.eup %3716  ;;  %2328 = vst [vmem:[%s4126_s20 + $0x2f0] sm:$0xff] %v3715_v8  ;;  %2715 = vst [vmem:[%s4266_s17 + $0xf0] sm:$0xff] (%p3799_p5), %v2714_v46  ;;  %v2766_v8 = vld [vmem:[%s4126_s20 + $0x1c0] sm:$0xff] (%p3799_p5)  ;;  %v2794_v22 = vld [vmem:[%s4126_s20 + $0x230] sm:$0xff] (%p3799_p5) }
 0x195   : > { %v3719_v10 = vpop.eup %3718  ;;  %2360 = vst [vmem:[%s4126_s20 + $0x3f0] sm:$0xff] %v3717_v9  ;;  %2717 = vst [vmem:[%s4266_s17 + $0xf8] sm:$0xff] (%p3799_p5), %v2716_v47  ;;  %v2768_v9 = vld [vmem:[%s4126_s20 + $0x1c8] sm:$0xff] (%p3799_p5)  ;;  %v2796_v23 = vld [vmem:[%s4126_s20 + $0x238] sm:$0xff] (%p3799_p5) }
 0x196   : > { %v3721_v11 = vpop.eup %3720  ;;  %2326 = vst [vmem:[%s4126_s20 + $0x2e0] sm:$0xff] %v3719_v10  ;;  %2719 = vst [vmem:[%s4266_s17 + $0x200] sm:$0xff] (%p3799_p5), %v2718_v48  ;;  %v2770_v10 = vld [vmem:[%s4126_s20 + $0x1d0] sm:$0xff] (%p3799_p5)  ;;  %v2798_v24 = vld [vmem:[%s4126_s20 + $0x240] sm:$0xff] (%p3799_p5) }
 0x197   : > { %v3723_v12 = vpop.eup %3722  ;;  %2358 = vst [vmem:[%s4126_s20 + $0x3e0] sm:$0xff] %v3721_v11  ;;  %2368 = sbr.rel (!%p3799_p5) target bundleno = 457 (0x1c9), region = 73  ;;  %2721 = vst [vmem:[%s4266_s17 + $0x208] sm:$0xff] (%p3799_p5), %v2720_v49  ;;  %v2772_v11 = vld [vmem:[%s4126_s20 + $0x1d8] sm:$0xff] (%p3799_p5)  ;;  %v2800_v25 = vld [vmem:[%s4126_s20 + $0x248] sm:$0xff] (%p3799_p5) }
 0x198   : > { %v3725_v13 = vpop.eup %3724  ;;  %2329 = vst [vmem:[%s4126_s20 + $0x2f8] sm:$0xff] %v3723_v12  ;;  %2723 = vst [vmem:[%s4266_s17 + $0x210] sm:$0xff] (%p3799_p5), %v2722_v50  ;;  %v2774_v12 = vld [vmem:[%s4126_s20 + $0x1e0] sm:$0xff] (%p3799_p5)  ;;  %v2802_v26 = vld [vmem:[%s4126_s20 + $0x250] sm:$0xff] (%p3799_p5) }
 0x199   : > { %v3727_v14 = vpop.eup %3726  ;;  %2361 = vst [vmem:[%s4126_s20 + $0x3f8] sm:$0xff] %v3725_v13  ;;  %2725 = vst [vmem:[%s4266_s17 + $0x218] sm:$0xff] (%p3799_p5), %v2724_v51  ;;  %v2776_v13 = vld [vmem:[%s4126_s20 + $0x1e8] sm:$0xff] (%p3799_p5)  ;;  %v2804_v27 = vld [vmem:[%s4126_s20 + $0x258] sm:$0xff] (%p3799_p5) }
 0x19a   : > { %v3729_v15 = vpop.eup %3728  ;;  %2327 = vst [vmem:[%s4126_s20 + $0x2e8] sm:$0xff] %v3727_v14  ;;  %2727 = vst [vmem:[%s4266_s17 + $0x220] sm:$0xff] (%p3799_p5), %v2726_v52  ;;  %v2778_v14 = vld [vmem:[%s4126_s20 + $0x1f0] sm:$0xff] (%p3799_p5)  ;;  %v2806_v28 = vld [vmem:[%s4126_s20 + $0x260] sm:$0xff] (%p3799_p5) }
 0x19b   : > { %2359 = vst [vmem:[%s4126_s20 + $0x3e8] sm:$0xff] %v3729_v15  ;;  %2729 = vst [vmem:[%s4266_s17 + $0x228] sm:$0xff] (%p3799_p5), %v2728_v53  ;;  %v2780_v15 = vld [vmem:[%s4126_s20 + $0x1f8] sm:$0xff] (%p3799_p5)  ;;  %v2808_v29 = vld [vmem:[%s4126_s20 + $0x268] sm:$0xff] (%p3799_p5) }
 0x19c   : > { %2731 = vst [vmem:[%s4266_s17 + $0x230] sm:$0xff] %v2730_v54  ;;  %2733 = vst [vmem:[%s4266_s17 + $0x238] sm:$0xff] %v2732_v55  ;;  %v2810_v30 = vld [vmem:[%s4126_s20 + $0x270] sm:$0xff]  ;;  %v2812_v31 = vld [vmem:[%s4126_s20 + $0x278] sm:$0xff] }
 0x19d   : > { %2735 = vst [vmem:[%s4266_s17 + $0x240] sm:$0xff] %v2734_v56  ;;  %2737 = vst [vmem:[%s4266_s17 + $0x248] sm:$0xff] %v2736_v57  ;;  %v2814_v32 = vld [vmem:[%s4126_s20 + $0x280] sm:$0xff]  ;;  %v2816_v33 = vld [vmem:[%s4126_s20 + $0x288] sm:$0xff] }
 0x19e   : > { %2739 = vst [vmem:[%s4266_s17 + $0x250] sm:$0xff] %v2738_v58  ;;  %2741 = vst [vmem:[%s4266_s17 + $0x258] sm:$0xff] %v2740_v59  ;;  %v2818_v34 = vld [vmem:[%s4126_s20 + $0x290] sm:$0xff]  ;;  %v2820_v35 = vld [vmem:[%s4126_s20 + $0x298] sm:$0xff] }
 0x19f   : > { %2743 = vst [vmem:[%s4266_s17 + $0x260] sm:$0xff] %v2742_v60  ;;  %2745 = vst [vmem:[%s4266_s17 + $0x268] sm:$0xff] %v2744_v61  ;;  %v2822_v36 = vld [vmem:[%s4126_s20 + $0x2a0] sm:$0xff]  ;;  %v2824_v37 = vld [vmem:[%s4126_s20 + $0x2a8] sm:$0xff] }
 0x1a0   : > { %2747 = vst [vmem:[%s4266_s17 + $0x270] sm:$0xff] %v2746_v62  ;;  %2749 = vst [vmem:[%s4266_s17 + $0x278] sm:$0xff] %v2748_v63  ;;  %v2826_v38 = vld [vmem:[%s4126_s20 + $0x2b0] sm:$0xff]  ;;  %v2828_v39 = vld [vmem:[%s4126_s20 + $0x2b8] sm:$0xff] }
 0x1a1   : > { %2751 = vst [vmem:[%s4266_s17 + $0x280] sm:$0xff] %v2750_v0  ;;  %2753 = vst [vmem:[%s4266_s17 + $0x288] sm:$0xff] %v2752_v1  ;;  %v2830_v40 = vld [vmem:[%s4126_s20 + $0x2c0] sm:$0xff]  ;;  %v2832_v41 = vld [vmem:[%s4126_s20 + $0x2c8] sm:$0xff] }
 0x1a2   : > { %2755 = vst [vmem:[%s4266_s17 + $0x290] sm:$0xff] %v2754_v2  ;;  %2757 = vst [vmem:[%s4266_s17 + $0x298] sm:$0xff] %v2756_v3  ;;  %v2834_v42 = vld [vmem:[%s4126_s20 + $0x2d0] sm:$0xff]  ;;  %v2836_v43 = vld [vmem:[%s4126_s20 + $0x2d8] sm:$0xff] }
 0x1a3   : > { %2759 = vst [vmem:[%s4266_s17 + $0x2a0] sm:$0xff] %v2758_v4  ;;  %2761 = vst [vmem:[%s4266_s17 + $0x2a8] sm:$0xff] %v2760_v5  ;;  %v2838_v44 = vld [vmem:[%s4126_s20 + $0x2e0] sm:$0xff]  ;;  %v2840_v45 = vld [vmem:[%s4126_s20 + $0x2e8] sm:$0xff] }
 0x1a4   : > { %2763 = vst [vmem:[%s4266_s17 + $0x2b0] sm:$0xff] %v2762_v6  ;;  %2765 = vst [vmem:[%s4266_s17 + $0x2b8] sm:$0xff] %v2764_v7  ;;  %v2842_v46 = vld [vmem:[%s4126_s20 + $0x2f0] sm:$0xff]  ;;  %v2844_v47 = vld [vmem:[%s4126_s20 + $0x2f8] sm:$0xff] }
 0x1a5   : > { %2767 = vst [vmem:[%s4266_s17 + $0x2c0] sm:$0xff] %v2766_v8  ;;  %2769 = vst [vmem:[%s4266_s17 + $0x2c8] sm:$0xff] %v2768_v9  ;;  %v2846_v48 = vld [vmem:[%s4126_s20 + $0x300] sm:$0xff]  ;;  %v2848_v49 = vld [vmem:[%s4126_s20 + $0x308] sm:$0xff] }
 0x1a6   : > { %2771 = vst [vmem:[%s4266_s17 + $0x2d0] sm:$0xff] %v2770_v10  ;;  %2773 = vst [vmem:[%s4266_s17 + $0x2d8] sm:$0xff] %v2772_v11  ;;  %v2850_v50 = vld [vmem:[%s4126_s20 + $0x310] sm:$0xff]  ;;  %v2852_v51 = vld [vmem:[%s4126_s20 + $0x318] sm:$0xff] }
 0x1a7   : > { %2775 = vst [vmem:[%s4266_s17 + $0x2e0] sm:$0xff] %v2774_v12  ;;  %2777 = vst [vmem:[%s4266_s17 + $0x2e8] sm:$0xff] %v2776_v13  ;;  %v2854_v52 = vld [vmem:[%s4126_s20 + $0x320] sm:$0xff]  ;;  %v2856_v53 = vld [vmem:[%s4126_s20 + $0x328] sm:$0xff] }
 0x1a8   : > { %2779 = vst [vmem:[%s4266_s17 + $0x2f0] sm:$0xff] %v2778_v14  ;;  %2781 = vst [vmem:[%s4266_s17 + $0x2f8] sm:$0xff] %v2780_v15  ;;  %v2858_v54 = vld [vmem:[%s4126_s20 + $0x330] sm:$0xff]  ;;  %v2860_v55 = vld [vmem:[%s4126_s20 + $0x338] sm:$0xff] }
 0x1a9   : > { %2783 = vst [vmem:[%s4266_s17 + $0x400] sm:$0xff] %v2782_v16  ;;  %2785 = vst [vmem:[%s4266_s17 + $0x408] sm:$0xff] %v2784_v17  ;;  %v2862_v56 = vld [vmem:[%s4126_s20 + $0x340] sm:$0xff]  ;;  %v2864_v57 = vld [vmem:[%s4126_s20 + $0x348] sm:$0xff] }
 0x1aa   : > { %2787 = vst [vmem:[%s4266_s17 + $0x410] sm:$0xff] %v2786_v18  ;;  %2789 = vst [vmem:[%s4266_s17 + $0x418] sm:$0xff] %v2788_v19  ;;  %v2866_v58 = vld [vmem:[%s4126_s20 + $0x350] sm:$0xff]  ;;  %v2868_v59 = vld [vmem:[%s4126_s20 + $0x358] sm:$0xff] }
 0x1ab   : > { %2791 = vst [vmem:[%s4266_s17 + $0x420] sm:$0xff] %v2790_v20  ;;  %2793 = vst [vmem:[%s4266_s17 + $0x428] sm:$0xff] %v2792_v21  ;;  %v2870_v60 = vld [vmem:[%s4126_s20 + $0x360] sm:$0xff]  ;;  %v2872_v61 = vld [vmem:[%s4126_s20 + $0x368] sm:$0xff] }
 0x1ac   : > { %2795 = vst [vmem:[%s4266_s17 + $0x430] sm:$0xff] %v2794_v22  ;;  %2797 = vst [vmem:[%s4266_s17 + $0x438] sm:$0xff] %v2796_v23  ;;  %v2874_v62 = vld [vmem:[%s4126_s20 + $0x370] sm:$0xff]  ;;  %v2876_v63 = vld [vmem:[%s4126_s20 + $0x378] sm:$0xff] }
 0x1ad   : > { %2799 = vst [vmem:[%s4266_s17 + $0x440] sm:$0xff] %v2798_v24  ;;  %2801 = vst [vmem:[%s4266_s17 + $0x448] sm:$0xff] %v2800_v25  ;;  %v2878_v0 = vld [vmem:[%s4126_s20 + $0x380] sm:$0xff]  ;;  %v2880_v1 = vld [vmem:[%s4126_s20 + $0x388] sm:$0xff] }
 0x1ae   : > { %2803 = vst [vmem:[%s4266_s17 + $0x450] sm:$0xff] %v2802_v26  ;;  %2805 = vst [vmem:[%s4266_s17 + $0x458] sm:$0xff] %v2804_v27  ;;  %v2882_v2 = vld [vmem:[%s4126_s20 + $0x390] sm:$0xff]  ;;  %v2884_v3 = vld [vmem:[%s4126_s20 + $0x398] sm:$0xff] }
 0x1af   : > { %2807 = vst [vmem:[%s4266_s17 + $0x460] sm:$0xff] %v2806_v28  ;;  %2809 = vst [vmem:[%s4266_s17 + $0x468] sm:$0xff] %v2808_v29  ;;  %v2886_v4 = vld [vmem:[%s4126_s20 + $0x3a0] sm:$0xff]  ;;  %v2888_v5 = vld [vmem:[%s4126_s20 + $0x3a8] sm:$0xff] }
 0x1b0   : > { %2811 = vst [vmem:[%s4266_s17 + $0x470] sm:$0xff] %v2810_v30  ;;  %2813 = vst [vmem:[%s4266_s17 + $0x478] sm:$0xff] %v2812_v31  ;;  %v2890_v6 = vld [vmem:[%s4126_s20 + $0x3b0] sm:$0xff]  ;;  %v2892_v7 = vld [vmem:[%s4126_s20 + $0x3b8] sm:$0xff] }
 0x1b1   : > { %2815 = vst [vmem:[%s4266_s17 + $0x480] sm:$0xff] %v2814_v32  ;;  %2817 = vst [vmem:[%s4266_s17 + $0x488] sm:$0xff] %v2816_v33  ;;  %v2894_v8 = vld [vmem:[%s4126_s20 + $0x3c0] sm:$0xff]  ;;  %v2896_v9 = vld [vmem:[%s4126_s20 + $0x3c8] sm:$0xff] }
 0x1b2   : > { %2819 = vst [vmem:[%s4266_s17 + $0x490] sm:$0xff] %v2818_v34  ;;  %2821 = vst [vmem:[%s4266_s17 + $0x498] sm:$0xff] %v2820_v35  ;;  %v2898_v10 = vld [vmem:[%s4126_s20 + $0x3d0] sm:$0xff]  ;;  %v2900_v11 = vld [vmem:[%s4126_s20 + $0x3d8] sm:$0xff] }
 0x1b3   : > { %2823 = vst [vmem:[%s4266_s17 + $0x4a0] sm:$0xff] %v2822_v36  ;;  %2825 = vst [vmem:[%s4266_s17 + $0x4a8] sm:$0xff] %v2824_v37  ;;  %v2902_v12 = vld [vmem:[%s4126_s20 + $0x3e0] sm:$0xff]  ;;  %v2904_v13 = vld [vmem:[%s4126_s20 + $0x3e8] sm:$0xff] }
 0x1b4   : > { %2827 = vst [vmem:[%s4266_s17 + $0x4b0] sm:$0xff] %v2826_v38  ;;  %2829 = vst [vmem:[%s4266_s17 + $0x4b8] sm:$0xff] %v2828_v39  ;;  %v2906_v14 = vld [vmem:[%s4126_s20 + $0x3f0] sm:$0xff]  ;;  %v2908_v15 = vld [vmem:[%s4126_s20 + $0x3f8] sm:$0xff] }
 0x1b5   : > { %2831 = vst [vmem:[%s4266_s17 + $0x4c0] sm:$0xff] %v2830_v40  ;;  %2833 = vst [vmem:[%s4266_s17 + $0x4c8] sm:$0xff] %v2832_v41 }
 0x1b6   : > { %2835 = vst [vmem:[%s4266_s17 + $0x4d0] sm:$0xff] %v2834_v42  ;;  %2837 = vst [vmem:[%s4266_s17 + $0x4d8] sm:$0xff] %v2836_v43 }
 0x1b7   : > { %2839 = vst [vmem:[%s4266_s17 + $0x4e0] sm:$0xff] %v2838_v44  ;;  %2841 = vst [vmem:[%s4266_s17 + $0x4e8] sm:$0xff] %v2840_v45 }
 0x1b8   : > { %2843 = vst [vmem:[%s4266_s17 + $0x4f0] sm:$0xff] %v2842_v46  ;;  %2845 = vst [vmem:[%s4266_s17 + $0x4f8] sm:$0xff] %v2844_v47 }
 0x1b9   : > { %2847 = vst [vmem:[%s4266_s17 + $0x600] sm:$0xff] %v2846_v48  ;;  %2849 = vst [vmem:[%s4266_s17 + $0x608] sm:$0xff] %v2848_v49 }
 0x1ba   : > { %2851 = vst [vmem:[%s4266_s17 + $0x610] sm:$0xff] %v2850_v50  ;;  %2853 = vst [vmem:[%s4266_s17 + $0x618] sm:$0xff] %v2852_v51 }
 0x1bb   : > { %2855 = vst [vmem:[%s4266_s17 + $0x620] sm:$0xff] %v2854_v52  ;;  %2857 = vst [vmem:[%s4266_s17 + $0x628] sm:$0xff] %v2856_v53 }
 0x1bc   : > { %2859 = vst [vmem:[%s4266_s17 + $0x630] sm:$0xff] %v2858_v54  ;;  %2861 = vst [vmem:[%s4266_s17 + $0x638] sm:$0xff] %v2860_v55 }
 0x1bd   : > { %2863 = vst [vmem:[%s4266_s17 + $0x640] sm:$0xff] %v2862_v56  ;;  %2865 = vst [vmem:[%s4266_s17 + $0x648] sm:$0xff] %v2864_v57 }
 0x1be   : > { %2867 = vst [vmem:[%s4266_s17 + $0x650] sm:$0xff] %v2866_v58  ;;  %2869 = vst [vmem:[%s4266_s17 + $0x658] sm:$0xff] %v2868_v59 }
 0x1bf   : > { %2871 = vst [vmem:[%s4266_s17 + $0x660] sm:$0xff] %v2870_v60  ;;  %2873 = vst [vmem:[%s4266_s17 + $0x668] sm:$0xff] %v2872_v61 }
 0x1c0   : > { %2875 = vst [vmem:[%s4266_s17 + $0x670] sm:$0xff] %v2874_v62  ;;  %2877 = vst [vmem:[%s4266_s17 + $0x678] sm:$0xff] %v2876_v63 }
 0x1c1   : > { %2879 = vst [vmem:[%s4266_s17 + $0x680] sm:$0xff] %v2878_v0  ;;  %2881 = vst [vmem:[%s4266_s17 + $0x688] sm:$0xff] %v2880_v1 }
 0x1c2   : > { %2883 = vst [vmem:[%s4266_s17 + $0x690] sm:$0xff] %v2882_v2  ;;  %2885 = vst [vmem:[%s4266_s17 + $0x698] sm:$0xff] %v2884_v3 }
 0x1c3   : > { %2887 = vst [vmem:[%s4266_s17 + $0x6a0] sm:$0xff] %v2886_v4  ;;  %2889 = vst [vmem:[%s4266_s17 + $0x6a8] sm:$0xff] %v2888_v5 }
 0x1c4   : > { %2891 = vst [vmem:[%s4266_s17 + $0x6b0] sm:$0xff] %v2890_v6  ;;  %2893 = vst [vmem:[%s4266_s17 + $0x6b8] sm:$0xff] %v2892_v7 }
 0x1c5   : > { %2895 = vst [vmem:[%s4266_s17 + $0x6c0] sm:$0xff] %v2894_v8  ;;  %2897 = vst [vmem:[%s4266_s17 + $0x6c8] sm:$0xff] %v2896_v9 }
 0x1c6   : > { %2899 = vst [vmem:[%s4266_s17 + $0x6d0] sm:$0xff] %v2898_v10  ;;  %2901 = vst [vmem:[%s4266_s17 + $0x6d8] sm:$0xff] %v2900_v11 }
 0x1c7   : > { %2903 = vst [vmem:[%s4266_s17 + $0x6e0] sm:$0xff] %v2902_v12  ;;  %2905 = vst [vmem:[%s4266_s17 + $0x6e8] sm:$0xff] %v2904_v13 }
 0x1c8   : > { %2907 = vst [vmem:[%s4266_s17 + $0x6f0] sm:$0xff] %v2906_v14  ;;  %2909 = vst [vmem:[%s4266_s17 + $0x6f8] sm:$0xff] %v2908_v15 }
 0x1c9 PF: > { %p9_p10 = scmp.ge.s32.totalorder %s3786_s13, 4   ;;  %s4535_s9 = smov %s3748_s10 }
 0x1ca   : > { %s4536_s10 = smov %s3797_s16  ;;  %s4537_s11 = smov %s3786_s13 }
 0x1cb   :  { %11 = sbr.rel (!%p9_p10) target bundleno = 2 (0x2), region = 142 }

</bundles_post_ra>
